<compile_context>
chip_gen: v6e
topology: v6e:2x2x1
jax: 0.10.0
libtpu: 0.0.40
codegen_flags: <defaults>
</compile_context>

<pallas_src>
import functools

import jax
import jax.numpy as jnp
from jax.experimental import pallas as pl
from jax.experimental.pallas import tpu as pltpu


# --------------------------------------------------------------------------
# Fused kernel: LePE conv + qkv + multi-head attention + residual + proj
#   x_ref       : (1, H, W, C)        input tile (one batch element), f32
#   wq/wk/wv    : (heads, C, hd)      head-major projection weights (scale in wq)
#   lepe_w_ref  : (K*K, C)            depthwise weights, w[ky*K+kx, c]
#   lepe_b_ref  : (1, C)              conv bias
#   wproj_h_ref : (heads, hd, C)      proj weight grouped by head rows
#   wproj_ref   : (C, C)              proj weight (for the lepe residual path)
#   bproj_ref   : (1, C)              proj bias
#   out_ref     : (1, H, W, C)
#   xpad_ref    : VMEM (H+2p, W+2p, C) scratch for the zero-padded conv input
# --------------------------------------------------------------------------
def _fused_kernel(x_ref, wq_ref, wk_ref, wv_ref, lepe_w_ref, lepe_b_ref,
                  wproj_h_ref, wproj_ref, bproj_ref, out_ref, xpad_ref,
                  *, num_heads, K, compute_dtype):
    _, H, W, C = out_ref.shape
    N = H * W
    p = K // 2
    cdt = compute_dtype

    xs = x_ref[0]                                             # (H, W, C) f32

    # ---- LePE depthwise conv (zero halo built in VMEM, f32 on the VPU) ----
    xpad_ref[...] = jnp.zeros_like(xpad_ref)
    xpad_ref[p:p + H, p:p + W, :] = xs
    w = lepe_w_ref[...]                                       # (K*K, C)
    acc = jnp.zeros((H, W, C), jnp.float32)
    for dy in range(K):
        for dx in range(K):
            win = xpad_ref[dy:dy + H, dx:dx + W, :]           # (H, W, C)
            acc = acc + win * w[dy * K + dx].reshape(1, 1, C)
    lepe = (acc + lepe_b_ref[...].reshape(1, 1, C)).reshape(N, C)   # f32

    # ---- qkv projection, head-major (batched over heads, scale in wq) ----
    x2 = xs.reshape(N, C).astype(cdt)                         # (N, C)
    xb = jnp.broadcast_to(x2, (num_heads, N, C))              # (h, N, C)
    q = jnp.einsum('hnc,hcd->hnd', xb, wq_ref[...],
                   preferred_element_type=jnp.float32)        # (h, N, hd)
    k = jnp.einsum('hnc,hcd->hnd', xb, wk_ref[...],
                   preferred_element_type=jnp.float32)
    v = jnp.einsum('hnc,hcd->hnd', xb, wv_ref[...],
                   preferred_element_type=jnp.float32)

    # ---- attention (softmax stats in f32, matmuls in compute_dtype) ----
    s = jnp.einsum('hnd,hmd->hnm', q.astype(cdt), k.astype(cdt),
                   preferred_element_type=jnp.float32)        # (h, N, N)
    s = s - jnp.max(s, axis=-1, keepdims=True)
    e = jnp.exp(s)
    pr = e * pl.reciprocal(jnp.sum(e, axis=-1, keepdims=True), approx=True)
    # attn_drop is a no-op (attn_drop=0.0)
    ctx = jnp.einsum('hnm,hmd->hnd', pr.astype(cdt), v.astype(cdt),
                     preferred_element_type=jnp.float32)      # (h, N, hd)

    # ---- LePE residual + output projection (no head transpose needed) ----
    yh = jnp.einsum('hnd,hdc->hnc', ctx.astype(cdt), wproj_h_ref[...],
                    preferred_element_type=jnp.float32)       # (h, N, C)
    y = jnp.sum(yh, axis=0)                                   # (N, C)
    y = y + jnp.dot(lepe.astype(cdt), wproj_ref[...],
                    preferred_element_type=jnp.float32)
    y = y + bproj_ref[...]
    # proj_drop is a no-op (proj_drop=0.0)
    out_ref[0] = y.reshape(H, W, C).astype(out_ref.dtype)


# --------------------------------------------------------------------------
# Wrapper
# --------------------------------------------------------------------------
def attention_lepe(x, params, *, num_heads=8, side_dwconv=5,
                   compute_dtype=jnp.bfloat16):
    B, H, W, C = x.shape
    hd = C // num_heads
    scale = hd ** (-0.5)
    K = side_dwconv
    p = K // 2
    Hp, Wp = H + 2 * p, W + 2 * p
    cdt = compute_dtype

    wqkv = params["qkv_w"]                                          # (C, 3C)
    # Head-major projection weights; fold the softmax scale into Wq offline.
    wq = (wqkv[:, 0:C] * scale).reshape(C, num_heads, hd).transpose(1, 0, 2).astype(cdt)
    wk = wqkv[:, C:2 * C].reshape(C, num_heads, hd).transpose(1, 0, 2).astype(cdt)
    wv = wqkv[:, 2 * C:3 * C].reshape(C, num_heads, hd).transpose(1, 0, 2).astype(cdt)
    wproj = params["proj_w"].astype(cdt)                            # (C, C)
    wproj_h = params["proj_w"].reshape(num_heads, hd, C).astype(cdt)  # (h, hd, C)
    bproj = params["proj_b"].astype(jnp.float32)                    # (1, C)
    lepe_w = params["lepe_w"].astype(jnp.float32)                   # (K*K, C)
    lepe_b = params["lepe_b"].astype(jnp.float32)                   # (1, C)

    kernel = functools.partial(_fused_kernel, num_heads=num_heads, K=K,
                               compute_dtype=cdt)
    return pl.pallas_call(
        kernel,
        out_shape=jax.ShapeDtypeStruct((B, H, W, C), x.dtype),
        grid=(B,),
        in_specs=[
            pl.BlockSpec((1, H, W, C), lambda b: (b, 0, 0, 0)),
            pl.BlockSpec((num_heads, C, hd), lambda b: (0, 0, 0)),
            pl.BlockSpec((num_heads, C, hd), lambda b: (0, 0, 0)),
            pl.BlockSpec((num_heads, C, hd), lambda b: (0, 0, 0)),
            pl.BlockSpec((K * K, C), lambda b: (0, 0)),
            pl.BlockSpec((1, C), lambda b: (0, 0)),
            pl.BlockSpec((num_heads, hd, C), lambda b: (0, 0, 0)),
            pl.BlockSpec((C, C), lambda b: (0, 0)),
            pl.BlockSpec((1, C), lambda b: (0, 0)),
        ],
        out_specs=pl.BlockSpec((1, H, W, C), lambda b: (b, 0, 0, 0)),
        scratch_shapes=[pltpu.VMEM((Hp, Wp, C), jnp.float32)],
        compiler_params=pltpu.CompilerParams(
            dimension_semantics=("parallel",)),
    )(x, wq, wk, wv, lepe_w, lepe_b, wproj_h, wproj, bproj)


# --------------------------------------------------------------------------
# Pure-JAX f32 reference (for correctness check)
# --------------------------------------------------------------------------
def attention_lepe_ref(x, params, *, num_heads=8, side_dwconv=5):
    B, H, W, C = x.shape
    N = H * W
    hd = C // num_heads
    scale = hd ** (-0.5)
    K = side_dwconv

    xf = x.reshape(B, N, C)
    qkv = xf @ params["qkv_w"]
    qkv = qkv.reshape(B, N, 3, num_heads, hd).transpose(2, 0, 3, 1, 4)
    q, k, v = qkv[0], qkv[1], qkv[2]                          # (B, heads, N, hd)

    lepe = jax.lax.conv_general_dilated(
        x, params["lepe_w"].reshape(K, K, 1, C),
        window_strides=(1, 1), padding="SAME",
        dimension_numbers=("NHWC", "HWIO", "NHWC"),
        feature_group_count=C)
    lepe = lepe + params["lepe_b"].reshape(1, 1, 1, C)
    lepe = lepe.reshape(B, N, C)

    attn = (q @ jnp.swapaxes(k, -2, -1)) * scale
    attn = jax.nn.softmax(attn, axis=-1)
    o = (attn @ v).transpose(0, 2, 1, 3).reshape(B, N, C)
    o = o + lepe
    y = o @ params["proj_w"] + params["proj_b"]
    return y.reshape(B, H, W, C)


# --------------------------------------------------------------------------
# Deterministic parameter construction (synthetic; no checkpoint load)
# --------------------------------------------------------------------------
def make_params(key, dim, side_dwconv):
    K = side_dwconv
    k1, k2, k3, k4, k5 = jax.random.split(key, 5)
    return {
        # qkv Linear (bias=False). Stored as (in, out) so y = x @ W.
        "qkv_w": 0.1 * jax.random.normal(k1, (dim, 3 * dim), jnp.float32),
        # proj Linear (bias=True)
        "proj_w": 0.1 * jax.random.normal(k2, (dim, dim), jnp.float32),
        "proj_b": 0.1 * jax.random.normal(k3, (1, dim), jnp.float32),
        # depthwise conv weights (K*K, dim) == PyTorch weight[c, 0, ky, kx]
        "lepe_w": 0.1 * jax.random.normal(k4, (K * K, dim), jnp.float32),
        "lepe_b": 0.1 * jax.random.normal(k5, (1, dim), jnp.float32),
    }


if __name__ == "__main__":
    B, H, W, C = 2, 8, 8, 32
    num_heads = 8
    side_dwconv = 5

    key = jax.random.PRNGKey(0)
    kx, kp = jax.random.split(key)
    x = jax.random.normal(kx, (B, H, W, C), jnp.float32)
    params = make_params(kp, C, side_dwconv)

    out = attention_lepe(x, params, num_heads=num_heads,
                         side_dwconv=side_dwconv)
    out = jax.block_until_ready(out)

    ref = attention_lepe_ref(x, params, num_heads=num_heads,
                             side_dwconv=side_dwconv)
    ref = jax.block_until_ready(ref)

    assert out.shape == (B, H, W, C)
    err = float(jnp.max(jnp.abs(out - ref)))
    # Kernel uses bf16 MXU matmuls with f32 accumulation vs the pure-f32 ref.
    assert jnp.allclose(out, ref, rtol=2e-2, atol=2e-2), err

    print("KERNEL_OK")
</pallas_src>

<mosaic_0001>
module attributes {stable_mosaic.version = 11 : i64} {
  func.func @_fused_kernel(%arg0: i32, %arg1: memref<1x8x8x32xf32, #tpu.memory_space<vmem>>, %arg2: memref<8x32x4xbf16, #tpu.memory_space<vmem>>, %arg3: memref<8x32x4xbf16, #tpu.memory_space<vmem>>, %arg4: memref<8x32x4xbf16, #tpu.memory_space<vmem>>, %arg5: memref<25x32xf32, #tpu.memory_space<vmem>>, %arg6: memref<1x32xf32, #tpu.memory_space<vmem>>, %arg7: memref<8x4x32xbf16, #tpu.memory_space<vmem>>, %arg8: memref<32x32xbf16, #tpu.memory_space<vmem>>, %arg9: memref<1x32xf32, #tpu.memory_space<vmem>>, %arg10: memref<1x8x8x32xf32, #tpu.memory_space<vmem>>, %arg11: memref<12x12x32xf32, #tpu.memory_space<vmem>>) attributes {dimension_semantics = [#tpu.dimension_semantics<parallel>], iteration_bounds = array<i64: 2>, scalar_prefetch = 0 : i64, scratch_operands = 1 : i64, tpu.core_type = #tpu.core_type<tc>, window_params = [{transform_indices = @transform_0, window_bounds = array<i64: 1, 8, 8, 32>}, {pipeline_mode = #tpu.pipeline_mode<synchronous>, transform_indices = @transform_1, window_bounds = array<i64: 8, 32, 4>}, {pipeline_mode = #tpu.pipeline_mode<synchronous>, transform_indices = @transform_2, window_bounds = array<i64: 8, 32, 4>}, {pipeline_mode = #tpu.pipeline_mode<synchronous>, transform_indices = @transform_3, window_bounds = array<i64: 8, 32, 4>}, {pipeline_mode = #tpu.pipeline_mode<synchronous>, transform_indices = @transform_4, window_bounds = array<i64: 25, 32>}, {pipeline_mode = #tpu.pipeline_mode<synchronous>, transform_indices = @transform_5, window_bounds = array<i64: 1, 32>}, {pipeline_mode = #tpu.pipeline_mode<synchronous>, transform_indices = @transform_6, window_bounds = array<i64: 8, 4, 32>}, {pipeline_mode = #tpu.pipeline_mode<synchronous>, transform_indices = @transform_7, window_bounds = array<i64: 32, 32>}, {pipeline_mode = #tpu.pipeline_mode<synchronous>, transform_indices = @transform_8, window_bounds = array<i64: 1, 32>}, {transform_indices = @transform_9, window_bounds = array<i64: 1, 8, 8, 32>}]} {
    %c0 = arith.constant 0 : index
    %c0_0 = arith.constant 0 : index
    %c0_1 = arith.constant 0 : index
    %c0_2 = arith.constant 0 : index
    %0 = vector.load %arg1[%c0, %c0_0, %c0_1, %c0_2] : memref<1x8x8x32xf32, #tpu.memory_space<vmem>>, vector<1x8x8x32xf32>
    %1 = vector.shape_cast %0 : vector<1x8x8x32xf32> to vector<8x8x32xf32>
    %cst = arith.constant 0.000000e+00 : f32
    %2 = vector.broadcast %cst : f32 to vector<12x12x32xf32>
    %c0_3 = arith.constant 0 : index
    %c0_4 = arith.constant 0 : index
    %c0_5 = arith.constant 0 : index
    %3 = vector.load %arg11[%c0_3, %c0_4, %c0_5] : memref<12x12x32xf32, #tpu.memory_space<vmem>>, vector<12x12x32xf32>
    tpu.vector_store %arg11[%c0_3, %c0_4, %c0_5], %2 {strides = array<i32>} : memref<12x12x32xf32, #tpu.memory_space<vmem>>, vector<12x12x32xf32>,
    %c2 = arith.constant 2 : index
    %c2_6 = arith.constant 2 : index
    %c0_7 = arith.constant 0 : index
    %4 = vector.load %arg11[%c2, %c2_6, %c0_7] : memref<12x12x32xf32, #tpu.memory_space<vmem>>, vector<8x8x32xf32>
    tpu.vector_store %arg11[%c2, %c2_6, %c0_7], %1 {strides = array<i32>} : memref<12x12x32xf32, #tpu.memory_space<vmem>>, vector<8x8x32xf32>,
    %c0_8 = arith.constant 0 : index
    %c0_9 = arith.constant 0 : index
    %5 = vector.load %arg5[%c0_8, %c0_9] : memref<25x32xf32, #tpu.memory_space<vmem>>, vector<25x32xf32>
    %cst_10 = arith.constant 0.000000e+00 : f32
    %6 = vector.broadcast %cst_10 : f32 to vector<8x8x32xf32>
    %c0_11 = arith.constant 0 : index
    %c0_12 = arith.constant 0 : index
    %c0_13 = arith.constant 0 : index
    %7 = vector.load %arg11[%c0_11, %c0_12, %c0_13] : memref<12x12x32xf32, #tpu.memory_space<vmem>>, vector<8x8x32xf32>
    %8 = vector.extract_strided_slice %5 {offsets = [0, 0], sizes = [1, 32], strides = [1, 1]} : vector<25x32xf32> to vector<1x32xf32>
    %9 = vector.shape_cast %8 : vector<1x32xf32> to vector<32xf32>
    %10 = vector.shape_cast %9 : vector<32xf32> to vector<1x1x32xf32>
    %11 = vector.broadcast %10 : vector<1x1x32xf32> to vector<8x8x32xf32>
    %12 = arith.mulf %7, %11 : vector<8x8x32xf32>
    %13 = arith.addf %6, %12 : vector<8x8x32xf32>
    %c0_14 = arith.constant 0 : index
    %c1 = arith.constant 1 : index
    %c0_15 = arith.constant 0 : index
    %14 = vector.load %arg11[%c0_14, %c1, %c0_15] : memref<12x12x32xf32, #tpu.memory_space<vmem>>, vector<8x8x32xf32>
    %15 = vector.extract_strided_slice %5 {offsets = [1, 0], sizes = [1, 32], strides = [1, 1]} : vector<25x32xf32> to vector<1x32xf32>
    %16 = vector.shape_cast %15 : vector<1x32xf32> to vector<32xf32>
    %17 = vector.shape_cast %16 : vector<32xf32> to vector<1x1x32xf32>
    %18 = vector.broadcast %17 : vector<1x1x32xf32> to vector<8x8x32xf32>
    %19 = arith.mulf %14, %18 : vector<8x8x32xf32>
    %20 = arith.addf %13, %19 : vector<8x8x32xf32>
    %c0_16 = arith.constant 0 : index
    %c2_17 = arith.constant 2 : index
    %c0_18 = arith.constant 0 : index
    %21 = vector.load %arg11[%c0_16, %c2_17, %c0_18] : memref<12x12x32xf32, #tpu.memory_space<vmem>>, vector<8x8x32xf32>
    %22 = vector.extract_strided_slice %5 {offsets = [2, 0], sizes = [1, 32], strides = [1, 1]} : vector<25x32xf32> to vector<1x32xf32>
    %23 = vector.shape_cast %22 : vector<1x32xf32> to vector<32xf32>
    %24 = vector.shape_cast %23 : vector<32xf32> to vector<1x1x32xf32>
    %25 = vector.broadcast %24 : vector<1x1x32xf32> to vector<8x8x32xf32>
    %26 = arith.mulf %21, %25 : vector<8x8x32xf32>
    %27 = arith.addf %20, %26 : vector<8x8x32xf32>
    %c0_19 = arith.constant 0 : index
    %c3 = arith.constant 3 : index
    %c0_20 = arith.constant 0 : index
    %28 = vector.load %arg11[%c0_19, %c3, %c0_20] : memref<12x12x32xf32, #tpu.memory_space<vmem>>, vector<8x8x32xf32>
    %29 = vector.extract_strided_slice %5 {offsets = [3, 0], sizes = [1, 32], strides = [1, 1]} : vector<25x32xf32> to vector<1x32xf32>
    %30 = vector.shape_cast %29 : vector<1x32xf32> to vector<32xf32>
    %31 = vector.shape_cast %30 : vector<32xf32> to vector<1x1x32xf32>
    %32 = vector.broadcast %31 : vector<1x1x32xf32> to vector<8x8x32xf32>
    %33 = arith.mulf %28, %32 : vector<8x8x32xf32>
    %34 = arith.addf %27, %33 : vector<8x8x32xf32>
    %c0_21 = arith.constant 0 : index
    %c4 = arith.constant 4 : index
    %c0_22 = arith.constant 0 : index
    %35 = vector.load %arg11[%c0_21, %c4, %c0_22] : memref<12x12x32xf32, #tpu.memory_space<vmem>>, vector<8x8x32xf32>
    %36 = vector.extract_strided_slice %5 {offsets = [4, 0], sizes = [1, 32], strides = [1, 1]} : vector<25x32xf32> to vector<1x32xf32>
    %37 = vector.shape_cast %36 : vector<1x32xf32> to vector<32xf32>
    %38 = vector.shape_cast %37 : vector<32xf32> to vector<1x1x32xf32>
    %39 = vector.broadcast %38 : vector<1x1x32xf32> to vector<8x8x32xf32>
    %40 = arith.mulf %35, %39 : vector<8x8x32xf32>
    %41 = arith.addf %34, %40 : vector<8x8x32xf32>
    %c1_23 = arith.constant 1 : index
    %c0_24 = arith.constant 0 : index
    %c0_25 = arith.constant 0 : index
    %42 = vector.load %arg11[%c1_23, %c0_24, %c0_25] : memref<12x12x32xf32, #tpu.memory_space<vmem>>, vector<8x8x32xf32>
    %43 = vector.extract_strided_slice %5 {offsets = [5, 0], sizes = [1, 32], strides = [1, 1]} : vector<25x32xf32> to vector<1x32xf32>
    %44 = vector.shape_cast %43 : vector<1x32xf32> to vector<32xf32>
    %45 = vector.shape_cast %44 : vector<32xf32> to vector<1x1x32xf32>
    %46 = vector.broadcast %45 : vector<1x1x32xf32> to vector<8x8x32xf32>
    %47 = arith.mulf %42, %46 : vector<8x8x32xf32>
    %48 = arith.addf %41, %47 : vector<8x8x32xf32>
    %c1_26 = arith.constant 1 : index
    %c1_27 = arith.constant 1 : index
    %c0_28 = arith.constant 0 : index
    %49 = vector.load %arg11[%c1_26, %c1_27, %c0_28] : memref<12x12x32xf32, #tpu.memory_space<vmem>>, vector<8x8x32xf32>
    %50 = vector.extract_strided_slice %5 {offsets = [6, 0], sizes = [1, 32], strides = [1, 1]} : vector<25x32xf32> to vector<1x32xf32>
    %51 = vector.shape_cast %50 : vector<1x32xf32> to vector<32xf32>
    %52 = vector.shape_cast %51 : vector<32xf32> to vector<1x1x32xf32>
    %53 = vector.broadcast %52 : vector<1x1x32xf32> to vector<8x8x32xf32>
    %54 = arith.mulf %49, %53 : vector<8x8x32xf32>
    %55 = arith.addf %48, %54 : vector<8x8x32xf32>
    %c1_29 = arith.constant 1 : index
    %c2_30 = arith.constant 2 : index
    %c0_31 = arith.constant 0 : index
    %56 = vector.load %arg11[%c1_29, %c2_30, %c0_31] : memref<12x12x32xf32, #tpu.memory_space<vmem>>, vector<8x8x32xf32>
    %57 = vector.extract_strided_slice %5 {offsets = [7, 0], sizes = [1, 32], strides = [1, 1]} : vector<25x32xf32> to vector<1x32xf32>
    %58 = vector.shape_cast %57 : vector<1x32xf32> to vector<32xf32>
    %59 = vector.shape_cast %58 : vector<32xf32> to vector<1x1x32xf32>
    %60 = vector.broadcast %59 : vector<1x1x32xf32> to vector<8x8x32xf32>
    %61 = arith.mulf %56, %60 : vector<8x8x32xf32>
    %62 = arith.addf %55, %61 : vector<8x8x32xf32>
    %c1_32 = arith.constant 1 : index
    %c3_33 = arith.constant 3 : index
    %c0_34 = arith.constant 0 : index
    %63 = vector.load %arg11[%c1_32, %c3_33, %c0_34] : memref<12x12x32xf32, #tpu.memory_space<vmem>>, vector<8x8x32xf32>
    %64 = vector.extract_strided_slice %5 {offsets = [8, 0], sizes = [1, 32], strides = [1, 1]} : vector<25x32xf32> to vector<1x32xf32>
    %65 = vector.shape_cast %64 : vector<1x32xf32> to vector<32xf32>
    %66 = vector.shape_cast %65 : vector<32xf32> to vector<1x1x32xf32>
    %67 = vector.broadcast %66 : vector<1x1x32xf32> to vector<8x8x32xf32>
    %68 = arith.mulf %63, %67 : vector<8x8x32xf32>
    %69 = arith.addf %62, %68 : vector<8x8x32xf32>
    %c1_35 = arith.constant 1 : index
    %c4_36 = arith.constant 4 : index
    %c0_37 = arith.constant 0 : index
    %70 = vector.load %arg11[%c1_35, %c4_36, %c0_37] : memref<12x12x32xf32, #tpu.memory_space<vmem>>, vector<8x8x32xf32>
    %71 = vector.extract_strided_slice %5 {offsets = [9, 0], sizes = [1, 32], strides = [1, 1]} : vector<25x32xf32> to vector<1x32xf32>
    %72 = vector.shape_cast %71 : vector<1x32xf32> to vector<32xf32>
    %73 = vector.shape_cast %72 : vector<32xf32> to vector<1x1x32xf32>
    %74 = vector.broadcast %73 : vector<1x1x32xf32> to vector<8x8x32xf32>
    %75 = arith.mulf %70, %74 : vector<8x8x32xf32>
    %76 = arith.addf %69, %75 : vector<8x8x32xf32>
    %c2_38 = arith.constant 2 : index
    %c0_39 = arith.constant 0 : index
    %c0_40 = arith.constant 0 : index
    %77 = vector.load %arg11[%c2_38, %c0_39, %c0_40] : memref<12x12x32xf32, #tpu.memory_space<vmem>>, vector<8x8x32xf32>
    %78 = vector.extract_strided_slice %5 {offsets = [10, 0], sizes = [1, 32], strides = [1, 1]} : vector<25x32xf32> to vector<1x32xf32>
    %79 = vector.shape_cast %78 : vector<1x32xf32> to vector<32xf32>
    %80 = vector.shape_cast %79 : vector<32xf32> to vector<1x1x32xf32>
    %81 = vector.broadcast %80 : vector<1x1x32xf32> to vector<8x8x32xf32>
    %82 = arith.mulf %77, %81 : vector<8x8x32xf32>
    %83 = arith.addf %76, %82 : vector<8x8x32xf32>
    %c2_41 = arith.constant 2 : index
    %c1_42 = arith.constant 1 : index
    %c0_43 = arith.constant 0 : index
    %84 = vector.load %arg11[%c2_41, %c1_42, %c0_43] : memref<12x12x32xf32, #tpu.memory_space<vmem>>, vector<8x8x32xf32>
    %85 = vector.extract_strided_slice %5 {offsets = [11, 0], sizes = [1, 32], strides = [1, 1]} : vector<25x32xf32> to vector<1x32xf32>
    %86 = vector.shape_cast %85 : vector<1x32xf32> to vector<32xf32>
    %87 = vector.shape_cast %86 : vector<32xf32> to vector<1x1x32xf32>
    %88 = vector.broadcast %87 : vector<1x1x32xf32> to vector<8x8x32xf32>
    %89 = arith.mulf %84, %88 : vector<8x8x32xf32>
    %90 = arith.addf %83, %89 : vector<8x8x32xf32>
    %c2_44 = arith.constant 2 : index
    %c2_45 = arith.constant 2 : index
    %c0_46 = arith.constant 0 : index
    %91 = vector.load %arg11[%c2_44, %c2_45, %c0_46] : memref<12x12x32xf32, #tpu.memory_space<vmem>>, vector<8x8x32xf32>
    %92 = vector.extract_strided_slice %5 {offsets = [12, 0], sizes = [1, 32], strides = [1, 1]} : vector<25x32xf32> to vector<1x32xf32>
    %93 = vector.shape_cast %92 : vector<1x32xf32> to vector<32xf32>
    %94 = vector.shape_cast %93 : vector<32xf32> to vector<1x1x32xf32>
    %95 = vector.broadcast %94 : vector<1x1x32xf32> to vector<8x8x32xf32>
    %96 = arith.mulf %91, %95 : vector<8x8x32xf32>
    %97 = arith.addf %90, %96 : vector<8x8x32xf32>
    %c2_47 = arith.constant 2 : index
    %c3_48 = arith.constant 3 : index
    %c0_49 = arith.constant 0 : index
    %98 = vector.load %arg11[%c2_47, %c3_48, %c0_49] : memref<12x12x32xf32, #tpu.memory_space<vmem>>, vector<8x8x32xf32>
    %99 = vector.extract_strided_slice %5 {offsets = [13, 0], sizes = [1, 32], strides = [1, 1]} : vector<25x32xf32> to vector<1x32xf32>
    %100 = vector.shape_cast %99 : vector<1x32xf32> to vector<32xf32>
    %101 = vector.shape_cast %100 : vector<32xf32> to vector<1x1x32xf32>
    %102 = vector.broadcast %101 : vector<1x1x32xf32> to vector<8x8x32xf32>
    %103 = arith.mulf %98, %102 : vector<8x8x32xf32>
    %104 = arith.addf %97, %103 : vector<8x8x32xf32>
    %c2_50 = arith.constant 2 : index
    %c4_51 = arith.constant 4 : index
    %c0_52 = arith.constant 0 : index
    %105 = vector.load %arg11[%c2_50, %c4_51, %c0_52] : memref<12x12x32xf32, #tpu.memory_space<vmem>>, vector<8x8x32xf32>
    %106 = vector.extract_strided_slice %5 {offsets = [14, 0], sizes = [1, 32], strides = [1, 1]} : vector<25x32xf32> to vector<1x32xf32>
    %107 = vector.shape_cast %106 : vector<1x32xf32> to vector<32xf32>
    %108 = vector.shape_cast %107 : vector<32xf32> to vector<1x1x32xf32>
    %109 = vector.broadcast %108 : vector<1x1x32xf32> to vector<8x8x32xf32>
    %110 = arith.mulf %105, %109 : vector<8x8x32xf32>
    %111 = arith.addf %104, %110 : vector<8x8x32xf32>
    %c3_53 = arith.constant 3 : index
    %c0_54 = arith.constant 0 : index
    %c0_55 = arith.constant 0 : index
    %112 = vector.load %arg11[%c3_53, %c0_54, %c0_55] : memref<12x12x32xf32, #tpu.memory_space<vmem>>, vector<8x8x32xf32>
    %113 = vector.extract_strided_slice %5 {offsets = [15, 0], sizes = [1, 32], strides = [1, 1]} : vector<25x32xf32> to vector<1x32xf32>
    %114 = vector.shape_cast %113 : vector<1x32xf32> to vector<32xf32>
    %115 = vector.shape_cast %114 : vector<32xf32> to vector<1x1x32xf32>
    %116 = vector.broadcast %115 : vector<1x1x32xf32> to vector<8x8x32xf32>
    %117 = arith.mulf %112, %116 : vector<8x8x32xf32>
    %118 = arith.addf %111, %117 : vector<8x8x32xf32>
    %c3_56 = arith.constant 3 : index
    %c1_57 = arith.constant 1 : index
    %c0_58 = arith.constant 0 : index
    %119 = vector.load %arg11[%c3_56, %c1_57, %c0_58] : memref<12x12x32xf32, #tpu.memory_space<vmem>>, vector<8x8x32xf32>
    %120 = vector.extract_strided_slice %5 {offsets = [16, 0], sizes = [1, 32], strides = [1, 1]} : vector<25x32xf32> to vector<1x32xf32>
    %121 = vector.shape_cast %120 : vector<1x32xf32> to vector<32xf32>
    %122 = vector.shape_cast %121 : vector<32xf32> to vector<1x1x32xf32>
    %123 = vector.broadcast %122 : vector<1x1x32xf32> to vector<8x8x32xf32>
    %124 = arith.mulf %119, %123 : vector<8x8x32xf32>
    %125 = arith.addf %118, %124 : vector<8x8x32xf32>
    %c3_59 = arith.constant 3 : index
    %c2_60 = arith.constant 2 : index
    %c0_61 = arith.constant 0 : index
    %126 = vector.load %arg11[%c3_59, %c2_60, %c0_61] : memref<12x12x32xf32, #tpu.memory_space<vmem>>, vector<8x8x32xf32>
    %127 = vector.extract_strided_slice %5 {offsets = [17, 0], sizes = [1, 32], strides = [1, 1]} : vector<25x32xf32> to vector<1x32xf32>
    %128 = vector.shape_cast %127 : vector<1x32xf32> to vector<32xf32>
    %129 = vector.shape_cast %128 : vector<32xf32> to vector<1x1x32xf32>
    %130 = vector.broadcast %129 : vector<1x1x32xf32> to vector<8x8x32xf32>
    %131 = arith.mulf %126, %130 : vector<8x8x32xf32>
    %132 = arith.addf %125, %131 : vector<8x8x32xf32>
    %c3_62 = arith.constant 3 : index
    %c3_63 = arith.constant 3 : index
    %c0_64 = arith.constant 0 : index
    %133 = vector.load %arg11[%c3_62, %c3_63, %c0_64] : memref<12x12x32xf32, #tpu.memory_space<vmem>>, vector<8x8x32xf32>
    %134 = vector.extract_strided_slice %5 {offsets = [18, 0], sizes = [1, 32], strides = [1, 1]} : vector<25x32xf32> to vector<1x32xf32>
    %135 = vector.shape_cast %134 : vector<1x32xf32> to vector<32xf32>
    %136 = vector.shape_cast %135 : vector<32xf32> to vector<1x1x32xf32>
    %137 = vector.broadcast %136 : vector<1x1x32xf32> to vector<8x8x32xf32>
    %138 = arith.mulf %133, %137 : vector<8x8x32xf32>
    %139 = arith.addf %132, %138 : vector<8x8x32xf32>
    %c3_65 = arith.constant 3 : index
    %c4_66 = arith.constant 4 : index
    %c0_67 = arith.constant 0 : index
    %140 = vector.load %arg11[%c3_65, %c4_66, %c0_67] : memref<12x12x32xf32, #tpu.memory_space<vmem>>, vector<8x8x32xf32>
    %141 = vector.extract_strided_slice %5 {offsets = [19, 0], sizes = [1, 32], strides = [1, 1]} : vector<25x32xf32> to vector<1x32xf32>
    %142 = vector.shape_cast %141 : vector<1x32xf32> to vector<32xf32>
    %143 = vector.shape_cast %142 : vector<32xf32> to vector<1x1x32xf32>
    %144 = vector.broadcast %143 : vector<1x1x32xf32> to vector<8x8x32xf32>
    %145 = arith.mulf %140, %144 : vector<8x8x32xf32>
    %146 = arith.addf %139, %145 : vector<8x8x32xf32>
    %c4_68 = arith.constant 4 : index
    %c0_69 = arith.constant 0 : index
    %c0_70 = arith.constant 0 : index
    %147 = vector.load %arg11[%c4_68, %c0_69, %c0_70] : memref<12x12x32xf32, #tpu.memory_space<vmem>>, vector<8x8x32xf32>
    %148 = vector.extract_strided_slice %5 {offsets = [20, 0], sizes = [1, 32], strides = [1, 1]} : vector<25x32xf32> to vector<1x32xf32>
    %149 = vector.shape_cast %148 : vector<1x32xf32> to vector<32xf32>
    %150 = vector.shape_cast %149 : vector<32xf32> to vector<1x1x32xf32>
    %151 = vector.broadcast %150 : vector<1x1x32xf32> to vector<8x8x32xf32>
    %152 = arith.mulf %147, %151 : vector<8x8x32xf32>
    %153 = arith.addf %146, %152 : vector<8x8x32xf32>
    %c4_71 = arith.constant 4 : index
    %c1_72 = arith.constant 1 : index
    %c0_73 = arith.constant 0 : index
    %154 = vector.load %arg11[%c4_71, %c1_72, %c0_73] : memref<12x12x32xf32, #tpu.memory_space<vmem>>, vector<8x8x32xf32>
    %155 = vector.extract_strided_slice %5 {offsets = [21, 0], sizes = [1, 32], strides = [1, 1]} : vector<25x32xf32> to vector<1x32xf32>
    %156 = vector.shape_cast %155 : vector<1x32xf32> to vector<32xf32>
    %157 = vector.shape_cast %156 : vector<32xf32> to vector<1x1x32xf32>
    %158 = vector.broadcast %157 : vector<1x1x32xf32> to vector<8x8x32xf32>
    %159 = arith.mulf %154, %158 : vector<8x8x32xf32>
    %160 = arith.addf %153, %159 : vector<8x8x32xf32>
    %c4_74 = arith.constant 4 : index
    %c2_75 = arith.constant 2 : index
    %c0_76 = arith.constant 0 : index
    %161 = vector.load %arg11[%c4_74, %c2_75, %c0_76] : memref<12x12x32xf32, #tpu.memory_space<vmem>>, vector<8x8x32xf32>
    %162 = vector.extract_strided_slice %5 {offsets = [22, 0], sizes = [1, 32], strides = [1, 1]} : vector<25x32xf32> to vector<1x32xf32>
    %163 = vector.shape_cast %162 : vector<1x32xf32> to vector<32xf32>
    %164 = vector.shape_cast %163 : vector<32xf32> to vector<1x1x32xf32>
    %165 = vector.broadcast %164 : vector<1x1x32xf32> to vector<8x8x32xf32>
    %166 = arith.mulf %161, %165 : vector<8x8x32xf32>
    %167 = arith.addf %160, %166 : vector<8x8x32xf32>
    %c4_77 = arith.constant 4 : index
    %c3_78 = arith.constant 3 : index
    %c0_79 = arith.constant 0 : index
    %168 = vector.load %arg11[%c4_77, %c3_78, %c0_79] : memref<12x12x32xf32, #tpu.memory_space<vmem>>, vector<8x8x32xf32>
    %169 = vector.extract_strided_slice %5 {offsets = [23, 0], sizes = [1, 32], strides = [1, 1]} : vector<25x32xf32> to vector<1x32xf32>
    %170 = vector.shape_cast %169 : vector<1x32xf32> to vector<32xf32>
    %171 = vector.shape_cast %170 : vector<32xf32> to vector<1x1x32xf32>
    %172 = vector.broadcast %171 : vector<1x1x32xf32> to vector<8x8x32xf32>
    %173 = arith.mulf %168, %172 : vector<8x8x32xf32>
    %174 = arith.addf %167, %173 : vector<8x8x32xf32>
    %c4_80 = arith.constant 4 : index
    %c4_81 = arith.constant 4 : index
    %c0_82 = arith.constant 0 : index
    %175 = vector.load %arg11[%c4_80, %c4_81, %c0_82] : memref<12x12x32xf32, #tpu.memory_space<vmem>>, vector<8x8x32xf32>
    %176 = vector.extract_strided_slice %5 {offsets = [24, 0], sizes = [1, 32], strides = [1, 1]} : vector<25x32xf32> to vector<1x32xf32>
    %177 = vector.shape_cast %176 : vector<1x32xf32> to vector<32xf32>
    %178 = vector.shape_cast %177 : vector<32xf32> to vector<1x1x32xf32>
    %179 = vector.broadcast %178 : vector<1x1x32xf32> to vector<8x8x32xf32>
    %180 = arith.mulf %175, %179 : vector<8x8x32xf32>
    %181 = arith.addf %174, %180 : vector<8x8x32xf32>
    %c0_83 = arith.constant 0 : index
    %c0_84 = arith.constant 0 : index
    %182 = vector.load %arg6[%c0_83, %c0_84] : memref<1x32xf32, #tpu.memory_space<vmem>>, vector<1x32xf32>
    %183 = vector.shape_cast %182 : vector<1x32xf32> to vector<1x1x32xf32>
    %184 = vector.broadcast %183 : vector<1x1x32xf32> to vector<8x8x32xf32>
    %185 = arith.addf %181, %184 : vector<8x8x32xf32>
    %186 = vector.shape_cast %185 : vector<8x8x32xf32> to vector<64x32xf32>
    %187 = vector.shape_cast %1 : vector<8x8x32xf32> to vector<64x32xf32>
    %188 = arith.truncf %187 : vector<64x32xf32> to vector<64x32xbf16>
    %189 = vector.shape_cast %188 : vector<64x32xbf16> to vector<1x64x32xbf16>
    %190 = vector.broadcast %189 : vector<1x64x32xbf16> to vector<8x64x32xbf16>
    %c0_85 = arith.constant 0 : index
    %c0_86 = arith.constant 0 : index
    %c0_87 = arith.constant 0 : index
    %191 = vector.load %arg2[%c0_85, %c0_86, %c0_87] : memref<8x32x4xbf16, #tpu.memory_space<vmem>>, vector<8x32x4xbf16>
    "tpu.trace_start"() <{level = 10 : i32, message = "hnc,hcd->hnd"}> : () -> ()
    %cst_88 = arith.constant dense<0.000000e+00> : vector<8x64x4xf32>
    %192 = tpu.matmul %190, %191, %cst_88 {dimension_numbers = #tpu.dot_dimension_numbers<[2], [1], [1], [2], [0, 0, 0, 1, 1, 2], [0], [0]>} : vector<8x64x32xbf16>, vector<8x32x4xbf16>, vector<8x64x4xf32> -> vector<8x64x4xf32>
    "tpu.trace_stop"() : () -> ()
    %c0_89 = arith.constant 0 : index
    %c0_90 = arith.constant 0 : index
    %c0_91 = arith.constant 0 : index
    %193 = vector.load %arg3[%c0_89, %c0_90, %c0_91] : memref<8x32x4xbf16, #tpu.memory_space<vmem>>, vector<8x32x4xbf16>
    "tpu.trace_start"() <{level = 10 : i32, message = "hnc,hcd->hnd"}> : () -> ()
    %cst_92 = arith.constant dense<0.000000e+00> : vector<8x64x4xf32>
    %194 = tpu.matmul %190, %193, %cst_92 {dimension_numbers = #tpu.dot_dimension_numbers<[2], [1], [1], [2], [0, 0, 0, 1, 1, 2], [0], [0]>} : vector<8x64x32xbf16>, vector<8x32x4xbf16>, vector<8x64x4xf32> -> vector<8x64x4xf32>
    "tpu.trace_stop"() : () -> ()
    %c0_93 = arith.constant 0 : index
    %c0_94 = arith.constant 0 : index
    %c0_95 = arith.constant 0 : index
    %195 = vector.load %arg4[%c0_93, %c0_94, %c0_95] : memref<8x32x4xbf16, #tpu.memory_space<vmem>>, vector<8x32x4xbf16>
    "tpu.trace_start"() <{level = 10 : i32, message = "hnc,hcd->hnd"}> : () -> ()
    %cst_96 = arith.constant dense<0.000000e+00> : vector<8x64x4xf32>
    %196 = tpu.matmul %190, %195, %cst_96 {dimension_numbers = #tpu.dot_dimension_numbers<[2], [1], [1], [2], [0, 0, 0, 1, 1, 2], [0], [0]>} : vector<8x64x32xbf16>, vector<8x32x4xbf16>, vector<8x64x4xf32> -> vector<8x64x4xf32>
    "tpu.trace_stop"() : () -> ()
    %197 = arith.truncf %192 : vector<8x64x4xf32> to vector<8x64x4xbf16>
    %198 = arith.truncf %194 : vector<8x64x4xf32> to vector<8x64x4xbf16>
    "tpu.trace_start"() <{level = 10 : i32, message = "hnd,hmd->hnm"}> : () -> ()
    %cst_97 = arith.constant dense<0.000000e+00> : vector<8x64x64xf32>
    %199 = tpu.matmul %197, %198, %cst_97 {dimension_numbers = #tpu.dot_dimension_numbers<[2], [2], [1], [1], [0, 0, 0, 1, 1, 1], [0], [0]>} : vector<8x64x4xbf16>, vector<8x64x4xbf16>, vector<8x64x64xf32> -> vector<8x64x64xf32>
    "tpu.trace_stop"() : () -> ()
    %cst_98 = arith.constant dense<0xFF800000> : vector<8x64xf32>
    %200 = vector.multi_reduction <maximumf>, %199, %cst_98 [2] : vector<8x64x64xf32> to vector<8x64xf32>
    %201 = vector.shape_cast %200 : vector<8x64xf32> to vector<8x64x1xf32>
    %202 = vector.broadcast %201 : vector<8x64x1xf32> to vector<8x64x64xf32>
    %203 = arith.subf %199, %202 : vector<8x64x64xf32>
    %204 = math.exp %203 : vector<8x64x64xf32>
    %cst_99 = arith.constant dense<0.000000e+00> : vector<8x64xf32>
    %205 = vector.multi_reduction <add>, %204, %cst_99 [2] : vector<8x64x64xf32> to vector<8x64xf32>
    %206 = vector.shape_cast %205 : vector<8x64xf32> to vector<8x64x1xf32>
    %207 = tpu.reciprocal %206 {approx = true} : vector<8x64x1xf32> -> vector<8x64x1xf32>
    %208 = vector.broadcast %207 : vector<8x64x1xf32> to vector<8x64x64xf32>
    %209 = arith.mulf %204, %208 : vector<8x64x64xf32>
    %210 = arith.truncf %209 : vector<8x64x64xf32> to vector<8x64x64xbf16>
    %211 = arith.truncf %196 : vector<8x64x4xf32> to vector<8x64x4xbf16>
    "tpu.trace_start"() <{level = 10 : i32, message = "hnm,hmd->hnd"}> : () -> ()
    %cst_100 = arith.constant dense<0.000000e+00> : vector<8x64x4xf32>
    %212 = tpu.matmul %210, %211, %cst_100 {dimension_numbers = #tpu.dot_dimension_numbers<[2], [1], [1], [2], [0, 0, 0, 1, 1, 2], [0], [0]>} : vector<8x64x64xbf16>, vector<8x64x4xbf16>, vector<8x64x4xf32> -> vector<8x64x4xf32>
    "tpu.trace_stop"() : () -> ()
    %213 = arith.truncf %212 : vector<8x64x4xf32> to vector<8x64x4xbf16>
    %c0_101 = arith.constant 0 : index
    %c0_102 = arith.constant 0 : index
    %c0_103 = arith.constant 0 : index
    %214 = vector.load %arg7[%c0_101, %c0_102, %c0_103] : memref<8x4x32xbf16, #tpu.memory_space<vmem>>, vector<8x4x32xbf16>
    "tpu.trace_start"() <{level = 10 : i32, message = "hnd,hdc->hnc"}> : () -> ()
    %cst_104 = arith.constant dense<0.000000e+00> : vector<8x64x32xf32>
    %215 = tpu.matmul %213, %214, %cst_104 {dimension_numbers = #tpu.dot_dimension_numbers<[2], [1], [1], [2], [0, 0, 0, 1, 1, 2], [0], [0]>} : vector<8x64x4xbf16>, vector<8x4x32xbf16>, vector<8x64x32xf32> -> vector<8x64x32xf32>
    "tpu.trace_stop"() : () -> ()
    %cst_105 = arith.constant dense<0.000000e+00> : vector<64x32xf32>
    %216 = vector.multi_reduction <add>, %215, %cst_105 [0] : vector<8x64x32xf32> to vector<64x32xf32>
    %217 = arith.truncf %186 : vector<64x32xf32> to vector<64x32xbf16>
    %c0_106 = arith.constant 0 : index
    %c0_107 = arith.constant 0 : index
    %218 = vector.load %arg8[%c0_106, %c0_107] : memref<32x32xbf16, #tpu.memory_space<vmem>>, vector<32x32xbf16>
    %cst_108 = arith.constant dense<0.000000e+00> : vector<64x32xf32>
    %219 = tpu.matmul %217, %218, %cst_108 {dimension_numbers = #tpu.dot_dimension_numbers<[1], [0], [0], [1], [0, 0, 1, 1], [], []>} : vector<64x32xbf16>, vector<32x32xbf16>, vector<64x32xf32> -> vector<64x32xf32>
    %220 = arith.addf %216, %219 : vector<64x32xf32>
    %c0_109 = arith.constant 0 : index
    %c0_110 = arith.constant 0 : index
    %221 = vector.load %arg9[%c0_109, %c0_110] : memref<1x32xf32, #tpu.memory_space<vmem>>, vector<1x32xf32>
    %222 = vector.broadcast %221 : vector<1x32xf32> to vector<64x32xf32>
    %223 = arith.addf %220, %222 : vector<64x32xf32>
    %224 = vector.shape_cast %223 : vector<64x32xf32> to vector<8x8x32xf32>
    %c0_111 = arith.constant 0 : index
    %c0_112 = arith.constant 0 : index
    %c0_113 = arith.constant 0 : index
    %c0_114 = arith.constant 0 : index
    %225 = vector.load %arg10[%c0_111, %c0_112, %c0_113, %c0_114] : memref<1x8x8x32xf32, #tpu.memory_space<vmem>>, vector<1x8x8x32xf32>
    %226 = vector.shape_cast %225 : vector<1x8x8x32xf32> to vector<8x8x32xf32>
    %227 = vector.shape_cast %224 : vector<8x8x32xf32> to vector<1x8x8x32xf32>
    tpu.vector_store %arg10[%c0_111, %c0_112, %c0_113, %c0_114], %227 {strides = array<i32>} : memref<1x8x8x32xf32, #tpu.memory_space<vmem>>, vector<1x8x8x32xf32>,
    return
  }
  func.func @transform_0(%arg0: i32) -> (i32, i32, i32, i32) {
    %c0_i32 = arith.constant 0 : i32
    %c0_i32_0 = arith.constant 0 : i32
    %c0_i32_1 = arith.constant 0 : i32
    %c0_i32_2 = arith.constant 0 : i32
    return %arg0, %c0_i32, %c0_i32_0, %c0_i32_1 : i32, i32, i32, i32
  }
  func.func @transform_1(%arg0: i32) -> (i32, i32, i32) {
    %c0_i32 = arith.constant 0 : i32
    %c0_i32_0 = arith.constant 0 : i32
    %c0_i32_1 = arith.constant 0 : i32
    %c0_i32_2 = arith.constant 0 : i32
    return %c0_i32, %c0_i32_0, %c0_i32_1 : i32, i32, i32
  }
  func.func @transform_2(%arg0: i32) -> (i32, i32, i32) {
    %c0_i32 = arith.constant 0 : i32
    %c0_i32_0 = arith.constant 0 : i32
    %c0_i32_1 = arith.constant 0 : i32
    %c0_i32_2 = arith.constant 0 : i32
    return %c0_i32, %c0_i32_0, %c0_i32_1 : i32, i32, i32
  }
  func.func @transform_3(%arg0: i32) -> (i32, i32, i32) {
    %c0_i32 = arith.constant 0 : i32
    %c0_i32_0 = arith.constant 0 : i32
    %c0_i32_1 = arith.constant 0 : i32
    %c0_i32_2 = arith.constant 0 : i32
    return %c0_i32, %c0_i32_0, %c0_i32_1 : i32, i32, i32
  }
  func.func @transform_4(%arg0: i32) -> (i32, i32) {
    %c0_i32 = arith.constant 0 : i32
    %c0_i32_0 = arith.constant 0 : i32
    %c0_i32_1 = arith.constant 0 : i32
    return %c0_i32, %c0_i32_0 : i32, i32
  }
  func.func @transform_5(%arg0: i32) -> (i32, i32) {
    %c0_i32 = arith.constant 0 : i32
    %c0_i32_0 = arith.constant 0 : i32
    %c0_i32_1 = arith.constant 0 : i32
    return %c0_i32, %c0_i32_0 : i32, i32
  }
  func.func @transform_6(%arg0: i32) -> (i32, i32, i32) {
    %c0_i32 = arith.constant 0 : i32
    %c0_i32_0 = arith.constant 0 : i32
    %c0_i32_1 = arith.constant 0 : i32
    %c0_i32_2 = arith.constant 0 : i32
    return %c0_i32, %c0_i32_0, %c0_i32_1 : i32, i32, i32
  }
  func.func @transform_7(%arg0: i32) -> (i32, i32) {
    %c0_i32 = arith.constant 0 : i32
    %c0_i32_0 = arith.constant 0 : i32
    %c0_i32_1 = arith.constant 0 : i32
    return %c0_i32, %c0_i32_0 : i32, i32
  }
  func.func @transform_8(%arg0: i32) -> (i32, i32) {
    %c0_i32 = arith.constant 0 : i32
    %c0_i32_0 = arith.constant 0 : i32
    %c0_i32_1 = arith.constant 0 : i32
    return %c0_i32, %c0_i32_0 : i32, i32
  }
  func.func @transform_9(%arg0: i32) -> (i32, i32, i32, i32) {
    %c0_i32 = arith.constant 0 : i32
    %c0_i32_0 = arith.constant 0 : i32
    %c0_i32_1 = arith.constant 0 : i32
    %c0_i32_2 = arith.constant 0 : i32
    return %arg0, %c0_i32, %c0_i32_0, %c0_i32_1 : i32, i32, i32, i32
  }
}

</mosaic_0001>

<bundles_post_ra>
// kernel: tpu_custom_call.1
= control target key start
LH: loop header
LB: loop body
LE: loop exit
PB: predicated region body
PF: predicated region fallthrough
CT: control target
= control target key end

     0   :  { %14 = vsyncpa [#allocation4], 0  ;;  %s10678_s0 = inlined_call_operand.vmem [shape: f32[2,8,8,32], index: 0, kind: input, shape index: {}]   ;;  %s10679_s1 = inlined_call_operand.vmem [shape: bf16[8,32,4], index: 1, kind: input, shape index: {}]   ;;  %s10680_s2 = inlined_call_operand.vmem [shape: bf16[8,32,4], index: 2, kind: input, shape index: {}]   ;;  %s10681_s3 = inlined_call_operand.vmem [shape: bf16[8,32,4], index: 3, kind: input, shape index: {}]   ;;  %s10682_s4 = inlined_call_operand.vmem [shape: f32[25,32], index: 4, kind: input, shape index: {}]   ;;  %s10683_s5 = inlined_call_operand.vmem [shape: f32[1,32], index: 5, kind: input, shape index: {}]   ;;  %s10684_s6 = inlined_call_operand.vmem [shape: bf16[8,4,32], index: 6, kind: input, shape index: {}]   ;;  %s10685_s7 = inlined_call_operand.vmem [shape: bf16[32,32], index: 7, kind: input, shape index: {}]   ;;  %s10686_s8 = inlined_call_operand.vmem [shape: f32[1,32], index: 8, kind: input, shape index: {}]   ;;  %s10687_s9 = inlined_call_operand.hbm [shape: f32[2,8,8,32], index: 9, kind: output, shape index: {}]  }
   0x1   :  { %16 = vsyncpa [#allocation4 + $0x1], 0  ;;  %s7949_s30 = smov 0   ;;  %s7951_s10 = smov 0  }
   0x2   :  { %s7953_s11 = smov 0   ;;  %s7955_s12 = smov 0  }
   0x3 LB: > { %s7970_s13 = sadd.s32 4294967295, %s7893_s12   ;;  %s6224_s14 = sadd.s32 4294967294, %s7893_s12   ;;  %s7893_s12 = sphi %s7955_s12, %s11098_s12   ;;  %s7889_s11 = sphi %s7953_s11, %s11097_s11   ;;  %s7885_s10 = sphi %s7951_s10, %s11096_s10   ;;  %s7881_s30 = sphi %s7949_s30, %s11095_s30  }
   0x4   : > { %s7974_s15 = sadd.s32 1, %s7893_s12   ;;  %s223_s16 = sadd.s32 1, %s7889_s11 }
   0x5   : > { %s220_s17 = ssub.s32 %s7893_s12, %s7974_s15  ;;  %p233_p0 = scmp.ne.s32.totalorder %s7889_s11, %s7885_s10 }
   0x6   : > { %p221_p1 = scmp.eq.s32.totalorder %s220_s17, 0  ;;  %p234_p2 = scmp.eq.s32.totalorder %s7970_s13, 1 }
   0x7   : > { %p239_p3 = scmp.ne.s32.totalorder %s7885_s10, %s7881_s30  ;;  %p240_p4 = scmp.eq.s32.totalorder %s6224_s14, 1 }
   0x8   : > { %s7985_s18 = scalar_select %p221_p1, %s7889_s11, %s223_s16  }
   0x9   : > { %p7987_p5 = por %p234_p2, %p233_p0  ;;  %p7991_p6 = por %p240_p4, %p239_p3 }
   0xa   : > { %p6227_p7 = scmp.ge.s32.totalorder %s7893_s12, 1  ;;  %p290_p8 = scmp.lt.s32.totalorder %s7893_s12, 3 }
   0xc   : > { %p291_p9 = pnand %p6227_p7, %p290_p8 }
   0xe   : > { %294 = sbr.rel (%p291_p9) target bundleno = 1387 (0x56b), region = 56 }
  0x13   : > { %v7527_v0 = vld [vmem:[%s10679_s1 + $0x8] sm:$0xff]   ;;  %p326_p10 = scmp.lt.s32.totalorder %s7970_s13, 1  ;;  %v7528_v1 = vld [vmem:[%s10679_s1] sm:$0xff]   ;;  %v7529_v2 = vld [vmem:[%s10679_s1 + $0x18] sm:$0xff]   ;;  %vm340_vm0 = vcmask 261120   ;;  %vm3121_vm1 = vcmask 31744  }
  0x14   : > { %6805 = vmatprep.subr.bf16.mxu0 %v7527_v0  ;;  %7441 = vmatprep.subr.bf16.mxu1 %v7527_v0  ;;  %v7530_v3 = vld [vmem:[%s10679_s1 + $0x28] sm:$0xff]   ;;  %v7532_v7 = vld [vmem:[%s10679_s1 + $0x20] sm:$0xff]   ;;  %v7531_v17 = vld [vmem:[%s10679_s1 + $0x10] sm:$0xff]   ;;  %vm3834_vm2 = vcmask 523264   ;;  %vm5271_vm3 = vcmask 1041408   ;;  %vm342_vm4 = vcmask 257024  }
  0x15   : > { %s327_s25 = scalar_select %p326_p10, %s7970_s13, 1  ;;  %6806 = vmatpush3.bf16.msra.mxu0 %v7527_v0  ;;  %7443 = vmatpush3.bf16.msra.mxu1 %v7527_v0  ;;  %v7534_v18 = vld [vmem:[%s10679_s1 + $0x48] sm:$0xff]   ;;  %v7533_v19 = vld [vmem:[%s10679_s1 + $0x38] sm:$0xff]   ;;  %v7535_v20 = vld [vmem:[%s10679_s1 + $0x30] sm:$0xff]  }
  0x16   : > { %6807 = vmatprep.subr.bf16.mxu0 %v7528_v1  ;;  %7442 = vmatprep.subr.bf16.mxu1 %v7528_v1  ;;  %v7536_v21 = vld [vmem:[%s10679_s1 + $0x40] sm:$0xff]   ;;  %v7538_v22 = vld [vmem:[%s10679_s1 + $0x68] sm:$0xff]   ;;  %v7537_v23 = vld [vmem:[%s10679_s1 + $0x58] sm:$0xff]   ;;  %s323_s17 = sand.u32 1, %s7885_s10   ;;  %s7896_s16 = smov [#allocation3]  }
  0x17   : > { %s6485_s28 = sshll.u32 %s327_s25, 6  ;;  %v7539_v24 = vld [vmem:[%s10679_s1 + $0x50] sm:$0xff]   ;;  %v7540_v25 = vld [vmem:[%s10679_s1 + $0x60] sm:$0xff]   ;;  %v7542_v26 = vld [vmem:[%s10680_s2 + $0x8] sm:$0xff]   ;;  %s6486_s25 = sshll.u32 %s7970_s13, 10 }
  0x18   : > { %s330_s21 = scalar_lea.vmem %s10678_s0, %s6485_s28  ;;  %v7541_v27 = vld [vmem:[%s10679_s1 + $0x78] sm:$0xff]   ;;  %v7543_v28 = vld [vmem:[%s10679_s1 + $0x70] sm:$0xff]   ;;  %v7544_v29 = vld [vmem:[%s10680_s2] sm:$0xff]   ;;  %s10627_s29 = scalar_lea.hbm %s10687_s9, %s6486_s25 }
  0x19   : > { %v8014_v4 = vld [vmem:[%s330_s21] sm:$0xff]  ;;  %v8016_v5 = vld [vmem:[%s330_s21 + $0x8] sm:$0xff]  ;;  %6808 = vmatpush3.bf16.msra.mxu0 %v7528_v1  ;;  %7444 = vmatpush3.bf16.msra.mxu1 %v7528_v1  ;;  %v8029_v10 = vld [vmem:[%s330_s21 + $0x10] sm:$0xff]  ;;  %s10638_s13 = scalar_lea.sflag [#allocation4], %s323_s17 }
  0x1a   : > { %10810 = vst [vmem:[#allocation6_spill] sm:$0xff] %v8014_v4  ;;  %10811 = vst [vmem:[#allocation7_spill] sm:$0xff] %v8016_v5  ;;  %v8018_v6 = vld [vmem:[%s330_s21 + $0x20] sm:$0xff]  ;;  %v8025_v8 = vpack.c.bf16 %v8016_v5, %v8014_v4  ;;  %v8027_v9 = vld [vmem:[%s330_s21 + $0x28] sm:$0xff]  ;;  %6817 = vmatprep.subr.bf16.mxu1 %v7529_v2  ;;  %6829 = vmatprep.subr.bf16.mxu0 %v7530_v3 }
  0x1b   : > { %10812 = vst [vmem:[#allocation8_spill] sm:$0xff] %v8018_v6  ;;  %10813 = vst [vmem:[#allocation9_spill] sm:$0xff] %v8027_v9  ;;  %v8031_v11 = vld [vmem:[%s330_s21 + $0x18] sm:$0xff]  ;;  %v8035_v12 = vpack.c.bf16 %v8027_v9, %v8018_v6  ;;  %v8041_v14 = vld [vmem:[%s330_s21 + $0x30] sm:$0xff] }
  0x1c   : > { %10814 = vst [vmem:[#allocation10_spill] sm:$0xff] %v8029_v10  ;;  %10815 = vst [vmem:[#allocation11_spill] sm:$0xff] %v8031_v11  ;;  %v8039_v13 = vpack.c.bf16 %v8031_v11, %v8029_v10  ;;  %v8043_v15 = vld [vmem:[%s330_s21 + $0x38] sm:$0xff]  ;;  %6809 = vmatprep.mubr.msk.bf16.mxu0 %vm340_vm0, %v8025_v8  ;;  %v7547_v30 = vld [vmem:[%s10680_s2 + $0x28] sm:$0xff]   ;;  %s6228_s21 = sshll.u32 %s323_s17, 6 }
  0x1d   : > { %10816 = vst [vmem:[#allocation12_spill] sm:$0xff] %v8041_v14  ;;  %10817 = vst [vmem:[#allocation13_spill] sm:$0xff] %v8043_v15  ;;  %v8049_v16 = vpack.c.bf16 %v8043_v15, %v8041_v14  ;;  %6813 = vmatprep.mubr.msk.bf16.mxu1 %vm340_vm0, %v8035_v12  ;;  %v7545_v31 = vld [vmem:[%s10680_s2 + $0x18] sm:$0xff]   ;;  %v7546_v32 = vld [vmem:[%s10680_s2 + $0x10] sm:$0xff]   ;;  %s10593_s24 = scalar_lea.vmem [#allocation3], %s6228_s21  ;;  %s7837_s21 = sshll.u32 %s7896_s16, 4  ;;  %s7838_s21 = int_to_ptr.vmem [resolvable:$false] %s7837_s21 }
  0x1e   : > { %6810 = vmatmul.mubr.msk.bf16.vlgmr.msra.gmra.mxu0 %vm340_vm0, %v8039_v13  ;;  %v7548_v33 = vld [vmem:[%s10680_s2 + $0x20] sm:$0xff]   ;;  %v7549_v34 = vld [vmem:[%s10680_s2 + $0x38] sm:$0xff]   ;;  %v7551_v35 = vld [vmem:[%s10680_s2 + $0x48] sm:$0xff]   ;;  %s6162_s26 = sshll.u32 %s10593_s24, 4  ;;  %s7839_s22 = scalar_lea.vmem %s7838_s21, 2048  ;;  %s10629_s26 = int_to_ptr.vmem [resolvable:$true] %s6162_s26 }
  0x1f   : > { %6814 = vmatmul.mubr.msk.bf16.vlgmr.msra.gmra.mxu1 %vm340_vm0, %v8049_v16  ;;  %6830 = vmatpush3.bf16.msra.mxu0 %v7530_v3  ;;  %v7550_v36 = vld [vmem:[%s10680_s2 + $0x30] sm:$0xff]   ;;  %v7552_v37 = vld [vmem:[%s10680_s2 + $0x40] sm:$0xff]   ;;  %v7553_v38 = vld [vmem:[%s10680_s2 + $0x58] sm:$0xff]   ;;  %s7833_s14 = scalar_lea.vmem %s10629_s26, 1024  ;;  %p7840_p0 = scmp.lt.s32.totalorder %s10629_s26, %s7838_s21 }
  0x20   : > { %6818 = vmatpush3.bf16.msra.mxu1 %v7529_v2  ;;  %6831 = vmatprep.subr.bf16.mxu0 %v7532_v7  ;;  %v7555_v39 = vld [vmem:[%s10680_s2 + $0x68] sm:$0xff]   ;;  %v7554_v40 = vld [vmem:[%s10680_s2 + $0x50] sm:$0xff]   ;;  %v7556_v41 = vld [vmem:[%s10680_s2 + $0x60] sm:$0xff]   ;;  %p7834_p11 = scmp.ne.s32.totalorder %s10629_s26, %s7833_s14  ;;  %p7841_p1 = scmp.lt.s32.totalorder %s7839_s22, %s7833_s14 }
  0x21   : > { %6819 = vmatprep.subr.bf16.mxu1 %v7531_v17  ;;  %6821 = vmatprep.mubr.msk.bf16.mxu1 %vm340_vm0, %v8025_v8  ;;  %v7557_v42 = vld [vmem:[%s10680_s2 + $0x78] sm:$0xff]   ;;  %v7559_v43 = vld [vmem:[%s10681_s3 + $0x8] sm:$0xff]   ;;  %v7558_v44 = vld [vmem:[%s10680_s2 + $0x70] sm:$0xff]  }
  0x22   : > { %6833 = vmatprep.mubr.msk.bf16.mxu0 %vm340_vm0, %v8025_v8  ;;  %v7560_v45 = vld [vmem:[%s10681_s3] sm:$0xff]   ;;  %v7561_v46 = vld [vmem:[%s10681_s3 + $0x18] sm:$0xff]   ;;  %v7563_v47 = vld [vmem:[%s10681_s3 + $0x28] sm:$0xff]   ;;  %p7835_p12 = pnand %p7834_p11, %p7987_p5  ;;  %p7842_p2 = por %p7841_p1, %p7840_p0 }
  0x23   : > { %6832 = vmatpush3.bf16.msra.mxu0 %v7532_v7  ;;  %v7562_v48 = vld [vmem:[%s10681_s3 + $0x10] sm:$0xff]   ;;  %v7564_v49 = vld [vmem:[%s10681_s3 + $0x20] sm:$0xff]   ;;  %v7565_v50 = vld [vmem:[%s10681_s3 + $0x38] sm:$0xff]  }
  0x24   : > { %6820 = vmatpush3.bf16.msra.mxu1 %v7531_v17  ;;  %6853 = vmatprep.subr.bf16.mxu0 %v7534_v18  ;;  %v7567_v51 = vld [vmem:[%s10681_s3 + $0x48] sm:$0xff]   ;;  %v7566_v52 = vld [vmem:[%s10681_s3 + $0x30] sm:$0xff]   ;;  %v7568_v53 = vld [vmem:[%s10681_s3 + $0x40] sm:$0xff]   ;;  %p7836_p13 = pneg %p7835_p12 }
  0x25   : > { %6841 = vmatprep.subr.bf16.mxu1 %v7533_v19  ;;  %v7569_v54 = vld [vmem:[%s10681_s3 + $0x58] sm:$0xff]   ;;  %v7571_v55 = vld [vmem:[%s10681_s3 + $0x68] sm:$0xff]   ;;  %v7570_v56 = vld [vmem:[%s10681_s3 + $0x50] sm:$0xff]  }
  0x26   : > { %6834 = vmatmul.mubr.msk.bf16.vlgmr.msra.gmra.mxu0 %vm340_vm0, %v8039_v13  ;;  %v7572_v57 = vld [vmem:[%s10681_s3 + $0x60] sm:$0xff]   ;;  %v7573_v58 = vld [vmem:[%s10681_s3 + $0x78] sm:$0xff]   ;;  %v7574_v59 = vld [vmem:[%s10681_s3 + $0x70] sm:$0xff]   ;;  %p7843_p3 = pnand %p7842_p2, %p7836_p13 }
  0x27   : > { %6822 = vmatmul.mubr.msk.bf16.vlgmr.msra.gmra.mxu1 %vm340_vm0, %v8039_v13  ;;  %6854 = vmatpush3.bf16.msra.mxu0 %v7534_v18 }
  0x28   : > { %6842 = vmatpush3.bf16.msra.mxu1 %v7533_v19  ;;  %6825 = vmatprep.mubr.msk.bf16.mxu1 %vm340_vm0, %v8035_v12 }
  0x29   : > { %6837 = vmatprep.mubr.msk.bf16.mxu0 %vm340_vm0, %v8035_v12  ;;  %6843 = vmatprep.subr.bf16.mxu1 %v7535_v20 }
  0x2a   : > { %6855 = vmatprep.subr.bf16.mxu0 %v7536_v21 }
  0x2b   : > { %6856 = vmatpush3.bf16.msra.mxu0 %v7536_v21 }
  0x2c   : > { %6844 = vmatpush3.bf16.msra.mxu1 %v7535_v20  ;;  %6877 = vmatprep.subr.bf16.mxu0 %v7538_v22 }
  0x2d   : > { %6865 = vmatprep.subr.bf16.mxu1 %v7537_v23 }
  0x2e   : > { %6838 = vmatmul.mubr.msk.bf16.gmra.mxu0 %vm340_vm0, %v8049_v16 }
  0x2f   : > { %6826 = vmatmul.mubr.msk.bf16.gmra.mxu1 %vm340_vm0, %v8049_v16  ;;  %6857 = vmatprep.mubr.msk.bf16.mxu0 %vm340_vm0, %v8025_v8 }
  0x30   : > { %6845 = vmatprep.mubr.msk.bf16.mxu1 %vm340_vm0, %v8025_v8 }
  0x36   : > { %6858 = vmatmul.mubr.msk.bf16.vlgmr.msra.gmra.mxu0 %vm340_vm0, %v8039_v13 }
  0x37   : > { %6846 = vmatmul.mubr.msk.bf16.vlgmr.msra.gmra.mxu1 %vm340_vm0, %v8039_v13  ;;  %6878 = vmatpush3.bf16.msra.mxu0 %v7538_v22 }
  0x38   : > { %6866 = vmatpush3.bf16.msra.mxu1 %v7537_v23  ;;  %6849 = vmatprep.mubr.msk.bf16.mxu1 %vm340_vm0, %v8035_v12 }
  0x39   : > { %6861 = vmatprep.mubr.msk.bf16.mxu0 %vm340_vm0, %v8035_v12  ;;  %6867 = vmatprep.subr.bf16.mxu1 %v7539_v24 }
  0x3a   : > { %6879 = vmatprep.subr.bf16.mxu0 %v7540_v25 }
  0x3b   : > { %6880 = vmatpush3.bf16.msra.mxu0 %v7540_v25 }
  0x3c   : > { %6868 = vmatpush3.bf16.msra.mxu1 %v7539_v24  ;;  %6901 = vmatprep.subr.bf16.mxu0 %v7542_v26 }
  0x3d   : > { %6889 = vmatprep.subr.bf16.mxu1 %v7541_v27 }
  0x3e   : > { %6862 = vmatmul.mubr.msk.bf16.gmra.mxu0 %vm340_vm0, %v8049_v16 }
  0x3f   : > { %6850 = vmatmul.mubr.msk.bf16.gmra.mxu1 %vm340_vm0, %v8049_v16  ;;  %6881 = vmatprep.mubr.msk.bf16.mxu0 %vm340_vm0, %v8025_v8 }
  0x40   : > { %6869 = vmatprep.mubr.msk.bf16.mxu1 %vm340_vm0, %v8025_v8 }
  0x46   : > { %6882 = vmatmul.mubr.msk.bf16.vlgmr.msra.gmra.mxu0 %vm340_vm0, %v8039_v13 }
  0x47   : > { %6870 = vmatmul.mubr.msk.bf16.vlgmr.msra.gmra.mxu1 %vm340_vm0, %v8039_v13  ;;  %6902 = vmatpush3.bf16.msra.mxu0 %v7542_v26 }
  0x48   : > { %6890 = vmatpush3.bf16.msra.mxu1 %v7541_v27  ;;  %6873 = vmatprep.mubr.msk.bf16.mxu1 %vm340_vm0, %v8035_v12 }
  0x49   : > { %6885 = vmatprep.mubr.msk.bf16.mxu0 %vm340_vm0, %v8035_v12  ;;  %6891 = vmatprep.subr.bf16.mxu1 %v7543_v28 }
  0x4a   : > { %6903 = vmatprep.subr.bf16.mxu0 %v7544_v29 }
  0x4b   : > { %6904 = vmatpush3.bf16.msra.mxu0 %v7544_v29 }
  0x4c   : > { %6892 = vmatpush3.bf16.msra.mxu1 %v7543_v28  ;;  %6925 = vmatprep.subr.bf16.mxu0 %v7547_v30 }
  0x4d   : > { %6913 = vmatprep.subr.bf16.mxu1 %v7545_v31 }
  0x4e   : > { %6886 = vmatmul.mubr.msk.bf16.gmra.mxu0 %vm340_vm0, %v8049_v16 }
  0x4f   : > { %6874 = vmatmul.mubr.msk.bf16.gmra.mxu1 %vm340_vm0, %v8049_v16  ;;  %6905 = vmatprep.mubr.msk.bf16.mxu0 %vm340_vm0, %v8025_v8 }
  0x50   : > { %6893 = vmatprep.mubr.msk.bf16.mxu1 %vm340_vm0, %v8025_v8 }
  0x56   : > { %6906 = vmatmul.mubr.msk.bf16.vlgmr.msra.gmra.mxu0 %vm340_vm0, %v8039_v13 }
  0x57   : > { %6894 = vmatmul.mubr.msk.bf16.vlgmr.msra.gmra.mxu1 %vm340_vm0, %v8039_v13  ;;  %6909 = vmatprep.mubr.msk.bf16.mxu0 %vm340_vm0, %v8035_v12 }
  0x58   : > { %6914 = vmatpush3.bf16.msra.mxu1 %v7545_v31  ;;  %6897 = vmatprep.mubr.msk.bf16.mxu1 %vm340_vm0, %v8035_v12 }
  0x59   : > { %6915 = vmatprep.subr.bf16.mxu1 %v7546_v32  ;;  %6926 = vmatpush3.bf16.msra.mxu0 %v7547_v30 }
  0x5a   : > { %6927 = vmatprep.subr.bf16.mxu0 %v7548_v33 }
  0x5c   : > { %6916 = vmatpush3.bf16.msra.mxu1 %v7546_v32 }
  0x5d   : > { %6928 = vmatpush3.bf16.msra.mxu0 %v7548_v33  ;;  %6937 = vmatprep.subr.bf16.mxu1 %v7549_v34 }
  0x5e   : > { %6910 = vmatmul.mubr.msk.bf16.gmra.mxu0 %vm340_vm0, %v8049_v16  ;;  %6949 = vmatprep.subr.bf16.mxu0 %v7551_v35 }
  0x5f   : > { %6898 = vmatmul.mubr.msk.bf16.gmra.mxu1 %vm340_vm0, %v8049_v16  ;;  %6929 = vmatprep.mubr.msk.bf16.mxu0 %vm340_vm0, %v8025_v8 }
  0x60   : > { %6917 = vmatprep.mubr.msk.bf16.mxu1 %vm340_vm0, %v8025_v8 }
  0x66   : > { %6930 = vmatmul.mubr.msk.bf16.vlgmr.msra.gmra.mxu0 %vm340_vm0, %v8039_v13 }
  0x67   : > { %6918 = vmatmul.mubr.msk.bf16.vlgmr.msra.gmra.mxu1 %vm340_vm0, %v8039_v13  ;;  %6933 = vmatprep.mubr.msk.bf16.mxu0 %vm340_vm0, %v8035_v12 }
  0x68   : > { %6921 = vmatprep.mubr.msk.bf16.mxu1 %vm340_vm0, %v8035_v12  ;;  %6938 = vmatpush3.bf16.msra.mxu1 %v7549_v34 }
  0x69   : > { %6939 = vmatprep.subr.bf16.mxu1 %v7550_v36  ;;  %6950 = vmatpush3.bf16.msra.mxu0 %v7551_v35 }
  0x6a   : > { %6951 = vmatprep.subr.bf16.mxu0 %v7552_v37 }
  0x6c   : > { %6940 = vmatpush3.bf16.msra.mxu1 %v7550_v36 }
  0x6d   : > { %6952 = vmatpush3.bf16.msra.mxu0 %v7552_v37  ;;  %6961 = vmatprep.subr.bf16.mxu1 %v7553_v38 }
  0x6e   : > { %6934 = vmatmul.mubr.msk.bf16.gmra.mxu0 %vm340_vm0, %v8049_v16  ;;  %6973 = vmatprep.subr.bf16.mxu0 %v7555_v39 }
  0x6f   : > { %6922 = vmatmul.mubr.msk.bf16.gmra.mxu1 %vm340_vm0, %v8049_v16  ;;  %6953 = vmatprep.mubr.msk.bf16.mxu0 %vm340_vm0, %v8025_v8 }
  0x70   : > { %6941 = vmatprep.mubr.msk.bf16.mxu1 %vm340_vm0, %v8025_v8 }
  0x76   : > { %6954 = vmatmul.mubr.msk.bf16.vlgmr.msra.gmra.mxu0 %vm340_vm0, %v8039_v13 }
  0x77   : > { %6942 = vmatmul.mubr.msk.bf16.vlgmr.msra.gmra.mxu1 %vm340_vm0, %v8039_v13  ;;  %6957 = vmatprep.mubr.msk.bf16.mxu0 %vm340_vm0, %v8035_v12 }
  0x78   : > { %6945 = vmatprep.mubr.msk.bf16.mxu1 %vm340_vm0, %v8035_v12  ;;  %6962 = vmatpush3.bf16.msra.mxu1 %v7553_v38 }
  0x79   : > { %6963 = vmatprep.subr.bf16.mxu1 %v7554_v40  ;;  %6974 = vmatpush3.bf16.msra.mxu0 %v7555_v39 }
  0x7a   : > { %6975 = vmatprep.subr.bf16.mxu0 %v7556_v41 }
  0x7c   : > { %6964 = vmatpush3.bf16.msra.mxu1 %v7554_v40 }
  0x7d   : > { %6976 = vmatpush3.bf16.msra.mxu0 %v7556_v41  ;;  %6985 = vmatprep.subr.bf16.mxu1 %v7557_v42 }
  0x7e   : > { %6958 = vmatmul.mubr.msk.bf16.gmra.mxu0 %vm340_vm0, %v8049_v16  ;;  %6997 = vmatprep.subr.bf16.mxu0 %v7559_v43 }
  0x7f   : > { %6946 = vmatmul.mubr.msk.bf16.gmra.mxu1 %vm340_vm0, %v8049_v16  ;;  %6977 = vmatprep.mubr.msk.bf16.mxu0 %vm340_vm0, %v8025_v8 }
  0x80   : > { %6965 = vmatprep.mubr.msk.bf16.mxu1 %vm340_vm0, %v8025_v8 }
  0x86   : > { %6978 = vmatmul.mubr.msk.bf16.vlgmr.msra.gmra.mxu0 %vm340_vm0, %v8039_v13 }
  0x87   : > { %6966 = vmatmul.mubr.msk.bf16.vlgmr.msra.gmra.mxu1 %vm340_vm0, %v8039_v13  ;;  %6981 = vmatprep.mubr.msk.bf16.mxu0 %vm340_vm0, %v8035_v12 }
  0x88   : > { %6969 = vmatprep.mubr.msk.bf16.mxu1 %vm340_vm0, %v8035_v12  ;;  %6986 = vmatpush3.bf16.msra.mxu1 %v7557_v42 }
  0x89   : > { %6987 = vmatprep.subr.bf16.mxu1 %v7558_v44  ;;  %6998 = vmatpush3.bf16.msra.mxu0 %v7559_v43 }
  0x8a   : > { %6999 = vmatprep.subr.bf16.mxu0 %v7560_v45 }
  0x8c   : > { %6988 = vmatpush3.bf16.msra.mxu1 %v7558_v44 }
  0x8d   : > { %7000 = vmatpush3.bf16.msra.mxu0 %v7560_v45  ;;  %7009 = vmatprep.subr.bf16.mxu1 %v7561_v46 }
  0x8e   : > { %6982 = vmatmul.mubr.msk.bf16.gmra.mxu0 %vm340_vm0, %v8049_v16  ;;  %7021 = vmatprep.subr.bf16.mxu0 %v7563_v47 }
  0x8f   : > { %6970 = vmatmul.mubr.msk.bf16.gmra.mxu1 %vm340_vm0, %v8049_v16  ;;  %7001 = vmatprep.mubr.msk.bf16.mxu0 %vm340_vm0, %v8025_v8 }
  0x90   : > { %6989 = vmatprep.mubr.msk.bf16.mxu1 %vm340_vm0, %v8025_v8 }
  0x96   : > { %7002 = vmatmul.mubr.msk.bf16.vlgmr.msra.gmra.mxu0 %vm340_vm0, %v8039_v13 }
  0x97   : > { %6990 = vmatmul.mubr.msk.bf16.vlgmr.msra.gmra.mxu1 %vm340_vm0, %v8039_v13  ;;  %7005 = vmatprep.mubr.msk.bf16.mxu0 %vm340_vm0, %v8035_v12 }
  0x98   : > { %6993 = vmatprep.mubr.msk.bf16.mxu1 %vm340_vm0, %v8035_v12  ;;  %7010 = vmatpush3.bf16.msra.mxu1 %v7561_v46 }
  0x99   : > { %7011 = vmatprep.subr.bf16.mxu1 %v7562_v48  ;;  %7022 = vmatpush3.bf16.msra.mxu0 %v7563_v47 }
  0x9a   : > { %7023 = vmatprep.subr.bf16.mxu0 %v7564_v49 }
  0x9c   : > { %7012 = vmatpush3.bf16.msra.mxu1 %v7562_v48 }
  0x9d   : > { %7024 = vmatpush3.bf16.msra.mxu0 %v7564_v49  ;;  %7033 = vmatprep.subr.bf16.mxu1 %v7565_v50 }
  0x9e   : > { %7006 = vmatmul.mubr.msk.bf16.gmra.mxu0 %vm340_vm0, %v8049_v16  ;;  %7045 = vmatprep.subr.bf16.mxu0 %v7567_v51 }
  0x9f   : > { %6994 = vmatmul.mubr.msk.bf16.gmra.mxu1 %vm340_vm0, %v8049_v16  ;;  %7025 = vmatprep.mubr.msk.bf16.mxu0 %vm340_vm0, %v8025_v8 }
  0xa0   : > { %7013 = vmatprep.mubr.msk.bf16.mxu1 %vm340_vm0, %v8025_v8 }
  0xa6   : > { %7026 = vmatmul.mubr.msk.bf16.vlgmr.msra.gmra.mxu0 %vm340_vm0, %v8039_v13 }
  0xa7   : > { %7014 = vmatmul.mubr.msk.bf16.vlgmr.msra.gmra.mxu1 %vm340_vm0, %v8039_v13  ;;  %7029 = vmatprep.mubr.msk.bf16.mxu0 %vm340_vm0, %v8035_v12 }
  0xa8   : > { %7017 = vmatprep.mubr.msk.bf16.mxu1 %vm340_vm0, %v8035_v12  ;;  %7034 = vmatpush3.bf16.msra.mxu1 %v7565_v50 }
  0xa9   : > { %7035 = vmatprep.subr.bf16.mxu1 %v7566_v52  ;;  %7046 = vmatpush3.bf16.msra.mxu0 %v7567_v51 }
  0xaa   : > { %7047 = vmatprep.subr.bf16.mxu0 %v7568_v53 }
  0xac   : > { %7036 = vmatpush3.bf16.msra.mxu1 %v7566_v52 }
  0xad   : > { %7048 = vmatpush3.bf16.msra.mxu0 %v7568_v53  ;;  %7057 = vmatprep.subr.bf16.mxu1 %v7569_v54 }
  0xae   : > { %7030 = vmatmul.mubr.msk.bf16.gmra.mxu0 %vm340_vm0, %v8049_v16  ;;  %7069 = vmatprep.subr.bf16.mxu0 %v7571_v55 }
  0xaf   : > { %7018 = vmatmul.mubr.msk.bf16.gmra.mxu1 %vm340_vm0, %v8049_v16  ;;  %7049 = vmatprep.mubr.msk.bf16.mxu0 %vm340_vm0, %v8025_v8 }
  0xb0   : > { %7037 = vmatprep.mubr.msk.bf16.mxu1 %vm340_vm0, %v8025_v8 }
  0xb6   : > { %7050 = vmatmul.mubr.msk.bf16.vlgmr.msra.gmra.mxu0 %vm340_vm0, %v8039_v13 }
  0xb7   : > { %7038 = vmatmul.mubr.msk.bf16.vlgmr.msra.gmra.mxu1 %vm340_vm0, %v8039_v13  ;;  %7053 = vmatprep.mubr.msk.bf16.mxu0 %vm340_vm0, %v8035_v12 }
  0xb8   : > { %7041 = vmatprep.mubr.msk.bf16.mxu1 %vm340_vm0, %v8035_v12  ;;  %7058 = vmatpush3.bf16.msra.mxu1 %v7569_v54 }
  0xb9   : > { %7059 = vmatprep.subr.bf16.mxu1 %v7570_v56  ;;  %7070 = vmatpush3.bf16.msra.mxu0 %v7571_v55 }
  0xba   : > { %7071 = vmatprep.subr.bf16.mxu0 %v7572_v57 }
  0xbc   : > { %7060 = vmatpush3.bf16.msra.mxu1 %v7570_v56 }
  0xbd   : > { %7072 = vmatpush3.bf16.msra.mxu0 %v7572_v57  ;;  %7081 = vmatprep.subr.bf16.mxu1 %v7573_v58 }
  0xbe   : > { %7054 = vmatmul.mubr.msk.bf16.gmra.mxu0 %vm340_vm0, %v8049_v16 }
  0xbf   : > { %7042 = vmatmul.mubr.msk.bf16.gmra.mxu1 %vm340_vm0, %v8049_v16  ;;  %7073 = vmatprep.mubr.msk.bf16.mxu0 %vm340_vm0, %v8025_v8 }
  0xc0   : > { %7061 = vmatprep.mubr.msk.bf16.mxu1 %vm340_vm0, %v8025_v8 }
  0xc6   : > { %7074 = vmatmul.mubr.msk.bf16.vlgmr.msra.gmra.mxu0 %vm340_vm0, %v8039_v13 }
  0xc7   : > { %7062 = vmatmul.mubr.msk.bf16.vlgmr.msra.gmra.mxu1 %vm340_vm0, %v8039_v13  ;;  %7077 = vmatprep.mubr.msk.bf16.mxu0 %vm340_vm0, %v8035_v12 }
  0xc8   : > { %7065 = vmatprep.mubr.msk.bf16.mxu1 %vm340_vm0, %v8035_v12  ;;  %7082 = vmatpush3.bf16.msra.mxu1 %v7573_v58 }
  0xc9   : > { %7083 = vmatprep.subr.bf16.mxu1 %v7574_v59 }
  0xcc   : > { %7084 = vmatpush3.bf16.msra.mxu1 %v7574_v59 }
  0xce   : > { %7078 = vmatmul.mubr.msk.bf16.gmra.mxu0 %vm340_vm0, %v8049_v16 }
  0xcf   : > { %7066 = vmatmul.mubr.msk.bf16.gmra.mxu1 %vm340_vm0, %v8049_v16 }
  0xd0   : > { %7085 = vmatprep.mubr.msk.bf16.mxu1 %vm340_vm0, %v8025_v8 }
  0xd7   : > { %7086 = vmatmul.mubr.msk.bf16.vlgmr.msra.gmra.mxu1 %vm340_vm0, %v8039_v13 }
  0xd8   : > { %7089 = vmatprep.mubr.msk.bf16.mxu1 %vm340_vm0, %v8035_v12 }
  0xde   : > { %v8368_v60 = vpop.f32.mrf.mxu0 }
  0xdf   : > { %v8370_v61 = vpop.f32.mrf.mxu1  ;;  %7090 = vmatmul.mubr.msk.bf16.gmra.mxu1 %vm340_vm0, %v8049_v16 }
  0xe0   : > { %v1191_v62 = vpop.f32.mrf.mxu0 }
  0xe1   : > { %v8374_v63 = vpop.f32.mrf.mxu1 }
  0xe2   : > { %v8376_v0 = vpop.f32.mrf.mxu0 }
  0xe3   : > { %v8380_v2 = vpop.f32.mrf.mxu1 }
  0xe4   : > { %v1194_v7 = vpop.f32.mrf.mxu0 }
  0xe5   : > { %v3057_v8 = vpack.c.bf16 %v1194_v7, %v1191_v62  ;;  %v8384_v12 = vpop.f32.mrf.mxu1 }
  0xe6   : > { %v8386_v13 = vpop.f32.mrf.mxu0 }
  0xe7   : > { %v8388_v16 = vpop.f32.mrf.mxu1  ;;  %7101 = vmatprep.mubr.msk.bf16.mxu0 %vm3121_vm1, %v3057_v8 }
  0xe8   : > { %v8391_v17 = vpop.f32.mrf.mxu0 }
  0xe9   : > { %v1268_v18 = vpop.f32.mrf.mxu1 }
  0xea   : > { %v8393_v19 = vpop.f32.mrf.mxu0 }
  0xeb   : > { %v8395_v20 = vpop.f32.mrf.mxu1 }
  0xec   : > { %v8401_v23 = vpop.f32.mrf.mxu0 }
  0xed   : > { %v1271_v24 = vpop.f32.mrf.mxu1 }
  0xee   : > { %v3061_v25 = vpack.c.bf16 %v1271_v24, %v1268_v18  ;;  %v8403_v26 = vpop.f32.mrf.mxu0 }
  0xef   : > { %v8405_v27 = vpop.f32.mrf.mxu1 }
  0xf0   : > { %7117 = vmatprep.mubr.msk.bf16.mxu1 %vm3121_vm1, %v3061_v25  ;;  %v8408_v28 = vpop.f32.mrf.mxu0 }
  0xf1   : > { %v8410_v29 = vpop.f32.mrf.mxu1 }
  0xf2   : > { %v8412_v30 = vpop.f32.mrf.mxu0 }
  0xf3   : > { %v8414_v31 = vpop.f32.mrf.mxu1 }
  0xf4   : > { %v8420_v34 = vpop.f32.mrf.mxu0 }
  0xf5   : > { %v8422_v35 = vpop.f32.mrf.mxu1 }
  0xf6   : > { %v8424_v36 = vpop.f32.mrf.mxu0 }
  0xf7   : > { %10818 = vst [vmem:[#allocation14_spill] sm:$0xff] %v8424_v36  ;;  %v8426_v37 = vpop.f32.mrf.mxu1 }
  0xf8   : > { %v8428_v38 = vpop.f32.mrf.mxu0 }
  0xf9   : > { %v8430_v39 = vpop.f32.mrf.mxu1 }
  0xfa   : > { %v8432_v40 = vpop.f32.mrf.mxu0 }
  0xfb   : > { %10819 = vst [vmem:[#allocation15_spill] sm:$0xff] %v8432_v40  ;;  %v8434_v41 = vpop.f32.mrf.mxu1 }
  0xfc   : > { %v8440_v44 = vpop.f32.mrf.mxu0 }
  0xfd   : > { %v8442_v45 = vpop.f32.mrf.mxu1 }
  0xfe   : > { %v8444_v46 = vpop.f32.mrf.mxu0 }
  0xff   : > { %10820 = vst [vmem:[#allocation16_spill] sm:$0xff] %v8444_v46  ;;  %v8446_v47 = vpop.f32.mrf.mxu1 }
 0x100   : > { %10821 = vst [vmem:[#allocation17_spill] sm:$0xff] %v8446_v47  ;;  %v8448_v48 = vpop.f32.mrf.mxu0 }
 0x101   : > { %10822 = vst [vmem:[#allocation18_spill] sm:$0xff] %v8448_v48  ;;  %v8450_v49 = vpop.f32.mrf.mxu1 }
 0x102   : > { %v8452_v50 = vpop.f32.mrf.mxu0 }
 0x103   : > { %10823 = vst [vmem:[#allocation19_spill] sm:$0xff] %v8452_v50  ;;  %v8454_v51 = vpop.f32.mrf.mxu1 }
 0x104   : > { %v8460_v54 = vpop.f32.mrf.mxu0 }
 0x105   : > { %10824 = vst [vmem:[#allocation20_spill] sm:$0xff] %v8460_v54  ;;  %v8462_v55 = vpop.f32.mrf.mxu1 }
 0x106   : > { %v8464_v56 = vpop.f32.mrf.mxu0 }
 0x107   : > { %10825 = vst [vmem:[#allocation21_spill] sm:$0xff] %v8464_v56  ;;  %v8466_v57 = vpop.f32.mrf.mxu1 }
 0x108   : > { %10826 = vst [vmem:[#allocation22_spill] sm:$0xff] %v8466_v57  ;;  %v8468_v58 = vpop.f32.mrf.mxu0 }
 0x109   : > { %10827 = vst [vmem:[#allocation23_spill] sm:$0xff] %v8468_v58  ;;  %v8470_v59 = vpop.f32.mrf.mxu1 }
 0x10a   : > { %v8472_v62 = vpop.f32.mrf.mxu0 }
 0x10b   : > { %10828 = vst [vmem:[#allocation24_spill] sm:$0xff] %v8472_v62  ;;  %v8474_v7 = vpop.f32.mrf.mxu1 }
 0x10c   : > { %10829 = vst [vmem:[#allocation25_spill] sm:$0xff] %v8474_v7  ;;  %v8480_v24 = vpop.f32.mrf.mxu0 }
 0x10d   : > { %10830 = vst [vmem:[#allocation26_spill] sm:$0xff] %v8480_v24  ;;  %v8482_v25 = vpop.f32.mrf.mxu1 }
 0x10e   : > { %v8484_v52 = vpop.f32.mrf.mxu0 }
 0x10f   : > { %10831 = vst [vmem:[#allocation27_spill] sm:$0xff] %v8484_v52  ;;  %v8486_v42 = vpop.f32.mrf.mxu1 }
 0x110   : > { %10832 = vst [vmem:[#allocation28_spill] sm:$0xff] %v8486_v42  ;;  %v8488_v53 = vpop.f32.mrf.mxu0 }
 0x111   : > { %10833 = vst [vmem:[#allocation29_spill] sm:$0xff] %v8488_v53  ;;  %v8490_v43 = vpop.f32.mrf.mxu1 }
 0x112   : > { %10834 = vst [vmem:[#allocation30_spill] sm:$0xff] %v8490_v43  ;;  %v8492_v32 = vpop.f32.mrf.mxu0 }
 0x113   : > { %10835 = vst [vmem:[#allocation31_spill] sm:$0xff] %v8492_v32  ;;  %v8494_v21 = vpop.f32.mrf.mxu1 }
 0x114   : > { %10836 = vst [vmem:[#allocation32_spill] sm:$0xff] %v8494_v21  ;;  %v8500_v33 = vpop.f32.mrf.mxu0 }
 0x115   : > { %10837 = vst [vmem:[#allocation33_spill] sm:$0xff] %v8500_v33  ;;  %v8502_v22 = vpop.f32.mrf.mxu1 }
 0x116   : > { %10838 = vst [vmem:[#allocation34_spill] sm:$0xff] %v8502_v22  ;;  %v6907_v3 = vpop.f32.mrf.mxu0 }
 0x117   : > { %v8504_v1 = vpop.f32.mrf.mxu1 }
 0x118   : > { %10839 = vst [vmem:[#allocation35_spill] sm:$0xff] %v8504_v1  ;;  %v1839_v15 = vpop.f32.mrf.mxu0 }
 0x119   : > { %v8506_v14 = vpop.f32.mrf.mxu1 }
 0x11a   : > { %10840 = vst [vmem:[#allocation36_spill] sm:$0xff] %v8506_v14  ;;  %v6908_v9 = vpop.f32.mrf.mxu0 }
 0x11b   : > { %v8508_v6 = vpop.f32.mrf.mxu1 }
 0x11c   : > { %10841 = vst [vmem:[#allocation37_spill] sm:$0xff] %v8508_v6  ;;  %v1842_v8 = vpop.f32.mrf.mxu0 }
 0x11d   : > { %v8512_v10 = vpop.f32.mrf.mxu1  ;;  %v3089_v46 = vpack.c.bf16 %v1842_v8, %v1839_v15 }
 0x11e   : > { %10842 = vst [vmem:[#allocation38_spill] sm:$0xff] %v8512_v10  ;;  %v6911_v18 = vpop.f32.mrf.mxu0 }
 0x11f   : > { %v8514_v5 = vpop.f32.mrf.mxu1 }
 0x120   : > { %10843 = vst [vmem:[#allocation39_spill] sm:$0xff] %v8514_v5  ;;  %v1855_v4 = vpop.f32.mrf.mxu0 }
 0x121   : > { %v8516_v52 = vpop.f32.mrf.mxu1 }
 0x122   : > { %10844 = vst [vmem:[#allocation40_spill] sm:$0xff] %v8516_v52  ;;  %v6912_v32 = vpop.f32.mrf.mxu0 }
 0x123   : > { %v8518_v56 = vpop.f32.mrf.mxu1  ;;  %v3092_v62 = vpack.c.bf16 %v6912_v32, %v6911_v18 }
 0x124   : > { %10845 = vst [vmem:[#allocation41_spill] sm:$0xff] %v8518_v56  ;;  %v1858_v53 = vpop.f32.mrf.mxu0  ;;  %v3090_v56 = vpack.c.bf16 %v6908_v9, %v6907_v3 }
 0x125   : > { %v3144_v42 = vsel %vm3121_vm1, %v3092_v62, 0  ;;  %v8523_v11 = vpop.f32.mrf.mxu1  ;;  %v3091_v1 = vpack.c.bf16 %v1858_v53, %v1855_v4  ;;  %7445 = vmatprep.subr.msk.bf16.mxu0 %vm3121_vm1, %v3092_v62 }
 0x126   : > { %10846 = vst [vmem:[#allocation42_spill] sm:$0xff] %v8523_v11  ;;  %7094 = vmatpush3.bf16.xpose.msra.mxu0 %v3144_v42  ;;  %v8526_v6 = vpop.f32.mrf.mxu0  ;;  %v3138_v43 = vsel %vm3121_vm1, %v3090_v56, 0 }
 0x127   : > { %v6919_v21 = vpop.f32.mrf.mxu1  ;;  %7446 = vmatprep.subr.msk.bf16.mxu0 %vm3121_vm1, %v3091_v1  ;;  %v3141_v4 = vsel %vm3121_vm1, %v3091_v1, 0 }
 0x128   : > { %v8529_v52 = vpop.f32.mrf.mxu0 }
 0x129   : > { %v1916_v32 = vpop.f32.mrf.mxu1 }
 0x12a   : > { %v8531_v18 = vpop.f32.mrf.mxu0 }
 0x12b   : > { %v6920_v33 = vpop.f32.mrf.mxu1 }
 0x12c   : > { %v8533_v5 = vpop.f32.mrf.mxu0 }
 0x12d   : > { %v1919_v10 = vpop.f32.mrf.mxu1 }
 0x12e   : > { %7096 = vmatpush3.bf16.xpose.msra.mxu0 %v3141_v4  ;;  %v6935_v53 = vpop.f32.mrf.mxu0  ;;  %v3093_v48 = vpack.c.bf16 %v1919_v10, %v1916_v32  ;;  %v3065_v10 = vpack.c.bf16 %v8401_v23, %v8391_v17 }
 0x12f   : > { %v6923_v42 = vpop.f32.mrf.mxu1  ;;  %7447 = vmatprep.subr.msk.bf16.mxu0 %vm3121_vm1, %v3090_v56 }
 0x130   : > { %v2009_v62 = vpop.f32.mrf.mxu0 }
 0x131   : > { %v1932_v11 = vpop.f32.mrf.mxu1 }
 0x132   : > { %v6936_v14 = vpop.f32.mrf.mxu0 }
 0x133   : > { %v6924_v57 = vpop.f32.mrf.mxu1  ;;  %v3100_v8 = vpack.c.bf16 %v6936_v14, %v6935_v53 }
 0x134   : > { %v3096_v7 = vpack.c.bf16 %v6924_v57, %v6923_v42  ;;  %v2012_v22 = vpop.f32.mrf.mxu0  ;;  %v3094_v42 = vpack.c.bf16 %v6920_v33, %v6919_v21 }
 0x135   : > { %v1935_v50 = vpop.f32.mrf.mxu1  ;;  %v3322_v33 = vsel %vm3121_vm1, %v3100_v8, 0 }
 0x136   : > { %v3233_v9 = vsel %vm3121_vm1, %v3096_v7, 0  ;;  %v3095_v3 = vpack.c.bf16 %v1935_v50, %v1932_v11  ;;  %7449 = vmatprep.subr.msk.bf16.mxu1 %vm3121_vm1, %v3096_v7  ;;  %7098 = vmatpush3.bf16.xpose.msra.mxu0 %v3138_v43  ;;  %v8540_v1 = vpop.f32.mrf.mxu0  ;;  %v3135_v43 = vsel %vm3121_vm1, %v3089_v46, 0  ;;  %v3227_v54 = vsel %vm3121_vm1, %v3094_v42, 0 }
 0x137   : > { %7110 = vmatpush3.bf16.xpose.msra.mxu1 %v3233_v9  ;;  %7448 = vmatprep.subr.msk.bf16.mxu0 %vm3121_vm1, %v3089_v46  ;;  %v8543_v4 = vpop.f32.mrf.mxu1  ;;  %v3059_v46 = vpack.c.bf16 %v8384_v12, %v8374_v63 }
 0x138   : > { %7450 = vmatprep.subr.msk.bf16.mxu1 %vm3121_vm1, %v3095_v3  ;;  %v8546_v57 = vpop.f32.mrf.mxu0  ;;  %v3230_v9 = vsel %vm3121_vm1, %v3095_v3, 0  ;;  %v3099_v3 = vpack.c.bf16 %v2012_v22, %v2009_v62 }
 0x139   : > { %v8548_v56 = vpop.f32.mrf.mxu1 }
 0x13a   : > { %v8550_v15 = vpop.f32.mrf.mxu0 }
 0x13b   : > { %v8552_v11 = vpop.f32.mrf.mxu1 }
 0x13c   : > { %v8554_v50 = vpop.f32.mrf.mxu0 }
 0x13d   : > { %v8557_v7 = vpop.f32.mrf.mxu1 }
 0x13e   : > { %7100 = vmatpush3.bf16.xpose.msra.mxu0 %v3135_v43  ;;  %v8560_v24 = vpop.f32.mrf.mxu0  ;;  %v10847_v43 = vpack.c.bf16 %v8376_v0, %v8368_v60 }
 0x13f   : > { %7112 = vmatpush3.bf16.xpose.msra.mxu1 %v3230_v9  ;;  %7453 = vmatprep.subr.msk.bf16.mxu0 %vm3121_vm1, %v3100_v8  ;;  %v6947_v58 = vpop.f32.mrf.mxu1  ;;  %v10848_v8 = vpack.c.bf16 %v8380_v2, %v8370_v61 }
 0x140   : > { %7451 = vmatprep.subr.msk.bf16.mxu1 %vm3121_vm1, %v3094_v42  ;;  %v8564_v14 = vpop.f32.mrf.mxu0  ;;  %v3319_v42 = vsel %vm3121_vm1, %v3099_v3, 0 }
 0x141   : > { %v2086_v53 = vpop.f32.mrf.mxu1 }
 0x142   : > { %v6960_v36 = vpop.f32.mrf.mxu0 }
 0x143   : > { %v6948_v40 = vpop.f32.mrf.mxu1 }
 0x144   : > { %v8568_v21 = vpop.f32.mrf.mxu0  ;;  %v3104_v32 = vpack.c.bf16 %v6948_v40, %v6947_v58  ;;  %v3063_v58 = vpack.c.bf16 %v8422_v35, %v8410_v29 }
 0x145   : > { %7102 = vmatmul.mubr.msk.bf16.vlgmr.msra.gmra.mxu0 %vm3121_vm1, %v10847_v43  ;;  %v2089_v9 = vpop.f32.mrf.mxu1  ;;  %v3097_v43 = vpack.c.bf16 %v8533_v5, %v8529_v52 }
 0x146   : > { %7105 = vmatprep.mubr.msk.bf16.mxu0 %vm3121_vm1, %v3059_v46  ;;  %7126 = vmatpush3.bf16.xpose.msra.mxu0 %v3322_v33  ;;  %v8577_v47 = vpop.f32.mrf.mxu0  ;;  %v3224_v33 = vsel %vm3121_vm1, %v3093_v48, 0 }
 0x147   : > { %7114 = vmatpush3.bf16.xpose.msra.mxu1 %v3227_v54  ;;  %7454 = vmatprep.subr.msk.bf16.mxu0 %vm3121_vm1, %v3099_v3  ;;  %v8580_v63 = vpop.f32.mrf.mxu1  ;;  %v3098_v54 = vpack.c.bf16 %v8531_v18, %v8526_v6 }
 0x148   : > { %7452 = vmatprep.subr.msk.bf16.mxu1 %vm3121_vm1, %v3093_v48  ;;  %v8583_v12 = vpop.f32.mrf.mxu0 }
 0x149   : > { %v8585_v60 = vpop.f32.mrf.mxu1  ;;  %v3316_v18 = vsel %vm3121_vm1, %v3098_v54, 0 }
 0x14a   : > { %v8587_v0 = vpop.f32.mrf.mxu0 }
 0x14b   : > { %v8589_v22 = vpop.f32.mrf.mxu1 }
 0x14c   : > { %v8593_v62 = vpop.f32.mrf.mxu0 }
 0x14d   : > { %7106 = vmatmul.mubr.msk.bf16.gmra.mxu0 %vm3121_vm1, %v10848_v8  ;;  %v8602_v46 = vpop.f32.mrf.mxu1  ;;  %v3103_v8 = vpack.c.bf16 %v2089_v9, %v2086_v53  ;;  %v3069_v9 = vpack.c.bf16 %v8442_v45, %v8430_v39 }
 0x14e   : > { %7128 = vmatpush3.bf16.xpose.msra.mxu0 %v3319_v42  ;;  %7133 = vmatprep.mubr.msk.bf16.mxu0 %vm3121_vm1, %v3065_v10  ;;  %v8606_v17 = vpop.f32.mrf.mxu0  ;;  %v3411_v10 = vsel %vm3121_vm1, %v3104_v32, 0  ;;  %v10849_v42 = vpack.c.bf16 %v8395_v20, %v8388_v16  ;;  %v3108_v20 = vpack.c.bf16 %v6960_v36, %v8560_v24 }
 0x14f   : > { %7116 = vmatpush3.bf16.xpose.msra.mxu1 %v3224_v33  ;;  %7455 = vmatprep.subr.msk.bf16.mxu0 %vm3121_vm1, %v3098_v54  ;;  %v8609_v6 = vpop.f32.mrf.mxu1  ;;  %v3408_v36 = vsel %vm3121_vm1, %v3103_v8, 0 }
 0x150   : > { %7457 = vmatprep.subr.msk.bf16.mxu1 %vm3121_vm1, %v3104_v32  ;;  %v8612_v61 = vpop.f32.mrf.mxu0  ;;  %v3313_v32 = vsel %vm3121_vm1, %v3097_v43, 0 }
 0x151   : > { %v8614_v2 = vpop.f32.mrf.mxu1 }
 0x152   : > { %v8616_v23 = vpop.f32.mrf.mxu0 }
 0x153   : > { %v6972_v40 = vpop.f32.mrf.mxu1 }
 0x154   : > { %v8618_v48 = vpop.f32.mrf.mxu0 }
 0x155   : > { %v8623_v3 = vpop.f32.mrf.mxu1 }
 0x156   : > { %7118 = vmatmul.mubr.msk.bf16.vlgmr.msra.gmra.mxu1 %vm3121_vm1, %v10849_v42  ;;  %7130 = vmatpush3.bf16.xpose.msra.mxu0 %v3316_v18  ;;  %v8632_v33 = vpop.f32.mrf.mxu0  ;;  %v10850_v18 = vpack.c.bf16 %v8414_v31, %v8405_v27  ;;  %v10851_v42 = vpack.c.bf16 %v8393_v19, %v8386_v13 }
 0x157   : > { %7121 = vmatprep.mubr.msk.bf16.mxu1 %vm3121_vm1, %v3063_v58  ;;  %7142 = vmatpush3.bf16.xpose.msra.mxu1 %v3411_v10  ;;  %v8635_v29 = vpop.f32.mrf.mxu1  ;;  %v3102_v58 = vpack.c.bf16 %v8552_v11, %v8543_v4  ;;  %v3067_v11 = vpack.c.bf16 %v8420_v34, %v8408_v28  ;;  %v3500_v10 = vsel %vm3121_vm1, %v3108_v20, 0 }
 0x158   : > { %7456 = vmatprep.subr.msk.bf16.mxu0 %vm3121_vm1, %v3097_v43  ;;  %7458 = vmatprep.subr.msk.bf16.mxu1 %vm3121_vm1, %v3103_v8  ;;  %v8639_v5 = vpop.f32.mrf.mxu0  ;;  %v3107_v8 = vpack.c.bf16 %v8568_v21, %v8564_v14 }
 0x159   : > { %v8641_v35 = vpop.f32.mrf.mxu1 }
 0x15a   : > { %v8643_v52 = vpop.f32.mrf.mxu0 }
 0x15b   : > { %v8645_v16 = vpop.f32.mrf.mxu1 }
 0x15c   : > { %v8648_v53 = vpop.f32.mrf.mxu0 }
 0x15d   : > { %v8653_v54 = vpop.f32.mrf.mxu1 }
 0x15e   : > { %7122 = vmatmul.mubr.msk.bf16.gmra.mxu1 %vm3121_vm1, %v10850_v18  ;;  %7132 = vmatpush3.bf16.xpose.msra.mxu0 %v3313_v32  ;;  %v8662_v24 = vpop.f32.mrf.mxu0  ;;  %v3405_v32 = vsel %vm3121_vm1, %v3102_v58, 0  ;;  %v3101_v18 = vpack.c.bf16 %v8557_v7, %v8548_v56  ;;  %v3073_v56 = vpack.c.bf16 %v8440_v44, %v8428_v38  ;;  %v3112_v7 = vpack.c.bf16 %v6972_v40, %v8609_v6 }
 0x15f   : > { %7144 = vmatpush3.bf16.xpose.msra.mxu1 %v3408_v36  ;;  %7149 = vmatprep.mubr.msk.bf16.mxu1 %vm3121_vm1, %v3069_v9  ;;  %v8665_v39 = vpop.f32.mrf.mxu1  ;;  %v3106_v36 = vpack.c.bf16 %v8550_v15, %v8540_v1  ;;  %v3071_v40 = vpack.c.bf16 %v8462_v55, %v8450_v49 }
 0x160   : > { %7459 = vmatprep.subr.msk.bf16.mxu1 %vm3121_vm1, %v3102_v58  ;;  %7461 = vmatprep.subr.msk.bf16.mxu0 %vm3121_vm1, %v3108_v20  ;;  %v8669_v45 = vpop.f32.mrf.mxu0 }
 0x161   : > { %v8671_v4 = vpop.f32.mrf.mxu1 }
 0x162   : > { %v8673_v27 = vpop.f32.mrf.mxu0 }
 0x163   : > { %v8675_v31 = vpop.f32.mrf.mxu1 }
 0x164   : > { %v8679_v43 = vpop.f32.mrf.mxu0 }
 0x165   : > { %7134 = vmatmul.mubr.msk.bf16.vlgmr.msra.gmra.mxu0 %vm3121_vm1, %v10851_v42  ;;  %v8688_v9 = vpop.f32.mrf.mxu1 }
 0x166   : > { %7137 = vmatprep.mubr.msk.bf16.mxu0 %vm3121_vm1, %v3067_v11  ;;  %7158 = vmatpush3.bf16.xpose.msra.mxu0 %v3500_v10  ;;  %v7027_v28 = vpop.f32.mrf.mxu0  ;;  %v10855_v11 = vpack.c.bf16 %v8412_v30, %v8403_v26  ;;  %v3497_v10 = vsel %vm3121_vm1, %v3107_v8, 0 }
 0x167   : > { %7146 = vmatpush3.bf16.xpose.msra.mxu1 %v3405_v32  ;;  %7462 = vmatprep.subr.msk.bf16.mxu0 %vm3121_vm1, %v3107_v8  ;;  %v8695_v34 = vpop.f32.mrf.mxu1  ;;  %v3402_v32 = vsel %vm3121_vm1, %v3101_v18, 0  ;;  %v3494_v8 = vsel %vm3121_vm1, %v3106_v36, 0 }
 0x168   : > { %7460 = vmatprep.subr.msk.bf16.mxu1 %vm3121_vm1, %v3101_v18  ;;  %v8698_v13 = vpop.f32.mrf.mxu0 }
 0x169   : > { %10852 = vst [vmem:[#allocation43_spill] sm:$0xff] %v8698_v13  ;;  %v8700_v19 = vpop.f32.mrf.mxu1 }
 0x16a   : > { %v7028_v14 = vpop.f32.mrf.mxu0 }
 0x16b   : > { %v8702_v21 = vpop.f32.mrf.mxu1  ;;  %v8704_v20 = vpack.c.bf16 %v7028_v14, %v7027_v28  ;;  %v3105_v28 = vpack.c.bf16 %v8554_v50, %v8546_v57  ;;  %v3589_v14 = vsel %vm3121_vm1, %v3112_v7, 0 }
 0x16c   : > { %v8709_v58 = vpop.f32.mrf.mxu0 }
 0x16d   : > { %10853 = vst [vmem:[#allocation44_spill] sm:$0xff] %v8704_v20  ;;  %10854 = vst [vmem:[#allocation45_spill] sm:$0xff] %v8709_v58  ;;  %7138 = vmatmul.mubr.msk.bf16.gmra.mxu0 %vm3121_vm1, %v10855_v11  ;;  %v8718_v42 = vpop.f32.mrf.mxu1  ;;  %v10858_v11 = vpack.c.bf16 %v8434_v41, %v8426_v37  ;;  %v3116_v37 = vpack.c.bf16 %v8616_v23, %v8606_v17 }
 0x16e   : > { %7160 = vmatpush3.bf16.xpose.msra.mxu0 %v3497_v10  ;;  %7165 = vmatprep.mubr.msk.bf16.mxu0 %vm3121_vm1, %v3073_v56  ;;  %v8722_v38 = vpop.f32.mrf.mxu0  ;;  %v3111_v56 = vpack.c.bf16 %v8623_v3, %v8614_v2 }
 0x16f   : > { %7148 = vmatpush3.bf16.xpose.msra.mxu1 %v3402_v32  ;;  %7463 = vmatprep.subr.msk.bf16.mxu0 %vm3121_vm1, %v3106_v36  ;;  %v8725_v44 = vpop.f32.mrf.mxu1  ;;  %v3077_v36 = vpack.c.bf16 %v8482_v25, %v8470_v59  ;;  %v3491_v32 = vsel %vm3121_vm1, %v3105_v28, 0 }
 0x170   : > { %7465 = vmatprep.subr.msk.bf16.mxu1 %vm3121_vm1, %v3112_v7  ;;  %v8728_v26 = vpop.f32.mrf.mxu0  ;;  %v3586_v17 = vsel %vm3121_vm1, %v3111_v56, 0 }
 0x171   : > { %10856 = vst [vmem:[#allocation46_spill] sm:$0xff] %v8728_v26  ;;  %v8730_v30 = vpop.f32.mrf.mxu1 }
 0x172   : > { %v8732_v1 = vpop.f32.mrf.mxu0 }
 0x173   : > { %v8734_v15 = vpop.f32.mrf.mxu1 }
 0x174   : > { %v8736_v6 = vpop.f32.mrf.mxu0 }
 0x175   : > { %10857 = vst [vmem:[#allocation47_spill] sm:$0xff] %v8736_v6  ;;  %v8741_v18 = vpop.f32.mrf.mxu1 }
 0x176   : > { %7150 = vmatmul.mubr.msk.bf16.vlgmr.msra.gmra.mxu1 %vm3121_vm1, %v10858_v11  ;;  %7162 = vmatpush3.bf16.xpose.msra.mxu0 %v3494_v8  ;;  %v7051_v10 = vpop.f32.mrf.mxu0  ;;  %v3110_v8 = vpack.c.bf16 %v8589_v22, %v8580_v63 }
 0x177   : > { %7153 = vmatprep.mubr.msk.bf16.mxu1 %vm3121_vm1, %v3071_v40  ;;  %7174 = vmatpush3.bf16.xpose.msra.mxu1 %v3589_v14  ;;  %v7039_v49 = vpop.f32.mrf.mxu1  ;;  %v10865_v14 = vld [vmem:[#allocation17_spill] sm:$0xff] }
 0x178   : > { %7464 = vmatprep.subr.msk.bf16.mxu0 %vm3121_vm1, %v3105_v28  ;;  %7466 = vmatprep.subr.msk.bf16.mxu1 %vm3121_vm1, %v3111_v56  ;;  %v8755_v55 = vpop.f32.mrf.mxu0  ;;  %v10866_v11 = vpack.c.bf16 %v8454_v51, %v10865_v14  ;;  %v10870_v56 = vld [vmem:[#allocation18_spill] sm:$0xff] }
 0x179   : > { %10859 = vst [vmem:[#allocation48_spill] sm:$0xff] %v8755_v55  ;;  %v8757_v57 = vpop.f32.mrf.mxu1  ;;  %v10874_v14 = vld [vmem:[#allocation14_spill] sm:$0xff]  ;;  %v10882_v55 = vld [vmem:[#allocation16_spill] sm:$0xff] }
 0x17a   : > { %10860 = vst [vmem:[#allocation49_spill] sm:$0xff] %v8757_v57  ;;  %v7052_v50 = vpop.f32.mrf.mxu0 }
 0x17b   : > { %v7040_v2 = vpop.f32.mrf.mxu1  ;;  %v8759_v3 = vpack.c.bf16 %v7052_v50, %v7051_v10  ;;  %v10871_v10 = vld [vmem:[#allocation20_spill] sm:$0xff] }
 0x17c   : > { %v8763_v41 = vpack.c.bf16 %v7040_v2, %v7039_v49  ;;  %v8765_v7 = vpop.f32.mrf.mxu0  ;;  %v3075_v49 = vpack.c.bf16 %v10871_v10, %v10870_v56  ;;  %v3678_v2 = vsel %vm3121_vm1, %v3116_v37, 0 }
 0x17d   : > { %10861 = vst [vmem:[#allocation50_spill] sm:$0xff] %v8759_v3  ;;  %10863 = vst [vmem:[#allocation52_spill] sm:$0xff] %v8765_v7  ;;  %v8770_v40 = vpop.f32.mrf.mxu1 }
 0x17e   : > { %10862 = vst [vmem:[#allocation51_spill] sm:$0xff] %v8763_v41  ;;  %10864 = vst [vmem:[#allocation53_spill] sm:$0xff] %v8770_v40  ;;  %7154 = vmatmul.mubr.msk.bf16.gmra.mxu1 %vm3121_vm1, %v10866_v11  ;;  %7164 = vmatpush3.bf16.xpose.msra.mxu0 %v3491_v32  ;;  %v7055_v23 = vpop.f32.mrf.mxu0  ;;  %v10873_v32 = vld [vmem:[#allocation15_spill] sm:$0xff] }
 0x17f   : > { %7176 = vmatpush3.bf16.xpose.msra.mxu1 %v3586_v17  ;;  %7181 = vmatprep.mubr.msk.bf16.mxu1 %vm3121_vm1, %v3077_v36  ;;  %v8780_v59 = vpop.f32.mrf.mxu1  ;;  %v3115_v36 = vpack.c.bf16 %v8618_v48, %v8612_v61  ;;  %v10875_v11 = vpack.c.bf16 %v10873_v32, %v10874_v14 }
 0x180   : > { %7467 = vmatprep.subr.msk.bf16.mxu1 %vm3121_vm1, %v3110_v8  ;;  %7469 = vmatprep.subr.msk.bf16.mxu0 %vm3121_vm1, %v3116_v37  ;;  %v8784_v25 = vpop.f32.mrf.mxu0 }
 0x181   : > { %10867 = vst [vmem:[#allocation17_spill] sm:$0xff] %v8784_v25  ;;  %v8786_v63 = vpop.f32.mrf.mxu1 }
 0x182   : > { %10868 = vst [vmem:[#allocation54_spill] sm:$0xff] %v8786_v63  ;;  %v7056_v51 = vpop.f32.mrf.mxu0 }
 0x183   : > { %v8788_v22 = vpop.f32.mrf.mxu1  ;;  %v8790_v28 = vpack.c.bf16 %v7056_v51, %v7055_v23  ;;  %v3583_v23 = vsel %vm3121_vm1, %v3110_v8, 0  ;;  %v3109_v51 = vpack.c.bf16 %v8602_v46, %v8585_v60  ;;  %v10878_v8 = vld [vmem:[#allocation23_spill] sm:$0xff]  ;;  %v3120_v60 = vpack.c.bf16 %v8675_v31, %v8665_v39 }
 0x184   : > { %v8794_v50 = vpop.f32.mrf.mxu0 }
 0x185   : > { %10869 = vst [vmem:[#allocation55_spill] sm:$0xff] %v8790_v28  ;;  %10872 = vst [vmem:[#allocation18_spill] sm:$0xff] %v8794_v50  ;;  %7166 = vmatmul.mubr.msk.bf16.vlgmr.msra.gmra.mxu0 %vm3121_vm1, %v10875_v11  ;;  %v8803_v17 = vpop.f32.mrf.mxu1  ;;  %v10879_v11 = vld [vmem:[#allocation26_spill] sm:$0xff] }
 0x186   : > { %10876 = vst [vmem:[#allocation20_spill] sm:$0xff] %v8803_v17  ;;  %7169 = vmatprep.mubr.msk.bf16.mxu0 %vm3121_vm1, %v3075_v49  ;;  %7190 = vmatpush3.bf16.xpose.msra.mxu0 %v3678_v2  ;;  %v7075_v56 = vpop.f32.mrf.mxu0  ;;  %v3081_v7 = vpack.c.bf16 %v10879_v11, %v10878_v8  ;;  %v3114_v2 = vpack.c.bf16 %v8587_v0, %v8577_v47  ;;  %v3580_v8 = vsel %vm3121_vm1, %v3109_v51, 0 }
 0x187   : > { %7178 = vmatpush3.bf16.xpose.msra.mxu1 %v3583_v23  ;;  %7470 = vmatprep.subr.msk.bf16.mxu0 %vm3121_vm1, %v3115_v36  ;;  %v7063_v61 = vpop.f32.mrf.mxu1  ;;  %v10881_v23 = vld [vmem:[#allocation19_spill] sm:$0xff] }
 0x188   : > { %7468 = vmatprep.subr.msk.bf16.mxu1 %vm3121_vm1, %v3109_v51  ;;  %v2949_v48 = vpop.f32.mrf.mxu0  ;;  %v10883_v3 = vpack.c.bf16 %v10881_v23, %v10882_v55  ;;  %v3767_v23 = vsel %vm3121_vm1, %v3120_v60, 0 }
 0x189   : > { %v2872_v37 = vpop.f32.mrf.mxu1 }
 0x18a   : > { %v7076_v10 = vpop.f32.mrf.mxu0 }
 0x18b   : > { %v7064_v32 = vpop.f32.mrf.mxu1  ;;  %v8811_v14 = vpack.c.bf16 %v7076_v10, %v7075_v56  ;;  %v3675_v56 = vsel %vm3121_vm1, %v3115_v36, 0 }
 0x18c   : > { %v8817_v46 = vpack.c.bf16 %v7064_v32, %v7063_v61  ;;  %v2952_v49 = vpop.f32.mrf.mxu0  ;;  %v3672_v32 = vsel %vm3121_vm1, %v3114_v2, 0 }
 0x18d   : > { %10877 = vst [vmem:[#allocation15_spill] sm:$0xff] %v8811_v14  ;;  %7170 = vmatmul.mubr.msk.bf16.gmra.mxu0 %vm3121_vm1, %v10883_v3  ;;  %v2875_v10 = vpop.f32.mrf.mxu1  ;;  %v8826_v14 = vpack.c.bf16 %v2952_v49, %v2949_v48  ;;  %v10889_v48 = vld [vmem:[#allocation30_spill] sm:$0xff]  ;;  %v3113_v49 = vpack.c.bf16 %v8593_v62, %v8583_v12 }
 0x18e   : > { %10880 = vst [vmem:[#allocation14_spill] sm:$0xff] %v8817_v46  ;;  %7192 = vmatpush3.bf16.xpose.msra.mxu0 %v3675_v56  ;;  %7197 = vmatprep.mubr.msk.bf16.mxu0 %vm3121_vm1, %v3081_v7  ;;  %v8830_v39 = vpack.c.bf16 %v2875_v10, %v2872_v37  ;;  %v7079_v31 = vpop.f32.mrf.mxu0  ;;  %v10890_v7 = vld [vmem:[#allocation34_spill] sm:$0xff]  ;;  %v3119_v56 = vpack.c.bf16 %v8688_v9, %v8671_v4  ;;  %v10891_v10 = vld [vmem:[#allocation25_spill] sm:$0xff] }
 0x18f   : > { %10884 = vst [vmem:[#allocation23_spill] sm:$0xff] %v8826_v14  ;;  %7180 = vmatpush3.bf16.xpose.msra.mxu1 %v3580_v8  ;;  %7471 = vmatprep.subr.msk.bf16.mxu0 %vm3121_vm1, %v3114_v2  ;;  %v7067_v47 = vpop.f32.mrf.mxu1  ;;  %v3079_v37 = vpack.c.bf16 %v10890_v7, %v10889_v48  ;;  %v10892_v8 = vld [vmem:[#allocation22_spill] sm:$0xff]  ;;  %v4574_v4 = vpack.c.bf16 %v8673_v27, %v8662_v24 }
 0x190   : > { %10885 = vst [vmem:[#allocation26_spill] sm:$0xff] %v8830_v39  ;;  %7473 = vmatprep.subr.msk.bf16.mxu1 %vm3121_vm1, %v3120_v60  ;;  %v8834_v0 = vpop.f32.mrf.mxu0  ;;  %v10896_v60 = vld [vmem:[#allocation36_spill] sm:$0xff]  ;;  %v3118_v7 = vpack.c.bf16 %v8645_v16, %v8635_v29  ;;  %v4573_v29 = vpack.c.bf16 %v8679_v43, %v8669_v45  ;;  %v4572_v45 = vpack.c.bf16 %v8643_v52, %v8632_v33 }
 0x191   : > { %10886 = vst [vmem:[#allocation19_spill] sm:$0xff] %v8834_v0  ;;  %v2888_v55 = vpop.f32.mrf.mxu1  ;;  %v4571_v43 = vpack.c.bf16 %v8648_v53, %v8639_v5  ;;  %v8905_v33 = vpack.c.bf16 %v8732_v1, %v8722_v38  ;;  %v4577_v5 = vpack.c.bf16 %v8741_v18, %v8730_v30  ;;  %v10913_v52 = vld [vmem:[#allocation40_spill] sm:$0xff]  ;;  %v10914_v53 = vld [vmem:[#allocation42_spill] sm:$0xff]  ;;  %v4576_v38 = vpack.c.bf16 %v8702_v21, %v8695_v34  ;;  %v10918_v30 = vld [vmem:[#allocation41_spill] sm:$0xff] }
 0x192   : > { %v7080_v3 = vpop.f32.mrf.mxu0  ;;  %v4575_v1 = vpack.c.bf16 %v8718_v42, %v8700_v19  ;;  %v10919_v18 = vld [vmem:[#allocation39_spill] sm:$0xff] }
 0x193   : > { %v7068_v36 = vpop.f32.mrf.mxu1  ;;  %v8836_v61 = vpack.c.bf16 %v7080_v3, %v7079_v31  ;;  %v10893_v31 = vpack.c.bf16 %v10891_v10, %v10892_v8  ;;  %v10897_v3 = vld [vmem:[#allocation38_spill] sm:$0xff]  ;;  %v10903_v10 = vld [vmem:[#allocation29_spill] sm:$0xff] }
 0x194   : > { %v8838_v51 = vpack.c.bf16 %v7068_v36, %v7067_v47  ;;  %v3085_v36 = vpack.c.bf16 %v10897_v3, %v10896_v60  ;;  %v10904_v8 = vld [vmem:[#allocation33_spill] sm:$0xff]  ;;  %v3761_v60 = vsel %vm3121_vm1, %v3118_v7, 0  ;;  %v3117_v3 = vpack.c.bf16 %v8653_v54, %v8641_v35  ;;  %v10910_v35 = vld [vmem:[#allocation27_spill] sm:$0xff]  ;;  %10912 = vst [vmem:[#allocation38_spill] sm:$0xff] %v8905_v33  ;;  %v8930_v34 = vpop.f32.mrf.mxu0 }
 0x195   : > { %10887 = vst [vmem:[#allocation16_spill] sm:$0xff] %v8836_v61  ;;  %v2891_v11 = vpop.f32.mrf.mxu1 }
 0x196   : > { %10888 = vst [vmem:[#allocation56_spill] sm:$0xff] %v8838_v51  ;;  %7182 = vmatmul.mubr.msk.bf16.vlgmr.msra.gmra.mxu1 %vm3121_vm1, %v10893_v31  ;;  %7194 = vmatpush3.bf16.xpose.msra.mxu0 %v3672_v32  ;;  %v8852_v47 = vpack.c.bf16 %v2891_v11, %v2888_v55  ;;  %v3669_v55 = vsel %vm3121_vm1, %v3113_v49, 0  ;;  %v10899_v32 = vld [vmem:[#allocation28_spill] sm:$0xff]  ;;  %v3083_v31 = vpack.c.bf16 %v10904_v8, %v10903_v10 }
 0x197   : > { %7185 = vmatprep.mubr.msk.bf16.mxu1 %vm3121_vm1, %v3079_v37  ;;  %7206 = vmatpush3.bf16.xpose.msra.mxu1 %v3767_v23  ;;  %v7087_v2 = vpop.f32.mrf.mxu1  ;;  %v10898_v37 = vld [vmem:[#allocation32_spill] sm:$0xff]  ;;  %v3764_v23 = vsel %vm3121_vm1, %v3119_v56, 0  ;;  %10922 = vst [vmem:[#allocation28_spill] sm:$0xff] %v8930_v34 }
 0x198   : > { %10894 = vst [vmem:[#allocation30_spill] sm:$0xff] %v8852_v47  ;;  %7472 = vmatprep.subr.msk.bf16.mxu0 %vm3121_vm1, %v3113_v49  ;;  %7474 = vmatprep.subr.msk.bf16.mxu1 %vm3121_vm1, %v3119_v56  ;;  %v10900_v11 = vpack.c.bf16 %v10898_v37, %v10899_v32  ;;  %v10906_v56 = vld [vmem:[#allocation24_spill] sm:$0xff]  ;;  %v10920_v37 = vpack.c.bf16 %v10918_v30, %v10919_v18 }
 0x199   : > { %v3026_v12 = vpop.f32.mrf.mxu1  ;;  %v8927_v32 = vpack.c.bf16 %v8788_v22, %v8780_v59 }
 0x19b   : > { %v7088_v62 = vpop.f32.mrf.mxu1  ;;  %10921 = vst [vmem:[#allocation32_spill] sm:$0xff] %v8927_v32 }
 0x19c   : > { %v8859_v9 = vpack.c.bf16 %v7088_v62, %v7087_v2 }
 0x19d   : > { %v3029_v48 = vpop.f32.mrf.mxu1 }
 0x19e   : > { %10895 = vst [vmem:[#allocation34_spill] sm:$0xff] %v8859_v9  ;;  %7186 = vmatmul.mubr.msk.bf16.gmra.mxu1 %vm3121_vm1, %v10900_v11  ;;  %7196 = vmatpush3.bf16.xpose.msra.mxu0 %v3669_v55  ;;  %v8871_v24 = vpack.c.bf16 %v3029_v48, %v3026_v12  ;;  %v10907_v12 = vld [vmem:[#allocation21_spill] sm:$0xff]  ;;  %v10909_v55 = vld [vmem:[#allocation31_spill] sm:$0xff] }
 0x19f   : > { %7208 = vmatpush3.bf16.xpose.msra.mxu1 %v3764_v23  ;;  %7213 = vmatprep.mubr.msk.bf16.mxu1 %vm3121_vm1, %v3085_v36  ;;  %v7091_v27 = vpop.f32.mrf.mxu1  ;;  %v10908_v62 = vpack.c.bf16 %v10906_v56, %v10907_v12  ;;  %v4578_v36 = vpack.c.bf16 %v8734_v15, %v8725_v44  ;;  %v10911_v54 = vpack.c.bf16 %v10909_v55, %v10910_v35  ;;  %v10915_v15 = vld [vmem:[#allocation37_spill] sm:$0xff]  ;;  %v10916_v48 = vld [vmem:[#allocation35_spill] sm:$0xff] }
 0x1a0   : > { %10901 = vst [vmem:[#allocation25_spill] sm:$0xff] %v8871_v24  ;;  %7475 = vmatprep.subr.msk.bf16.mxu1 %vm3121_vm1, %v3118_v7  ;;  %7221 = vmatprep.subr.bf16.mxu0 %v4574_v4  ;;  %v3087_v44 = vpack.c.bf16 %v10914_v53, %v10913_v52  ;;  %v10917_v7 = vpack.c.bf16 %v10915_v15, %v10916_v48 }
 0x1a1   : > { %v8875_v49 = vpop.f32.mrf.mxu1 }
 0x1a2   : > { %10902 = vst [vmem:[#allocation22_spill] sm:$0xff] %v8875_v49 }
 0x1a3   : > { %v7092_v16 = vpop.f32.mrf.mxu1 }
 0x1a4   : > { %v8881_v2 = vpack.c.bf16 %v7092_v16, %v7091_v27 }
 0x1a5   : > { %7198 = vmatmul.mubr.msk.bf16.vlgmr.msra.gmra.mxu0 %vm3121_vm1, %v10908_v62  ;;  %v8960_v12 = vpop.f32.mrf.mxu1 }
 0x1a6   : > { %10905 = vst [vmem:[#allocation36_spill] sm:$0xff] %v8881_v2  ;;  %7201 = vmatprep.mubr.msk.bf16.mxu0 %vm3121_vm1, %v3083_v31  ;;  %7222 = vmatpush3.bf16.msra.mxu0 %v4574_v4  ;;  %v3758_v4 = vsel %vm3121_vm1, %v3117_v3, 0  ;;  %10923 = vst [vmem:[#allocation29_spill] sm:$0xff] %v8960_v12 }
 0x1a7   : > { %7210 = vmatpush3.bf16.xpose.msra.mxu1 %v3761_v60  ;;  %7223 = vmatprep.subr.bf16.mxu0 %v4573_v29 }
 0x1a8   : > { %7476 = vmatprep.subr.msk.bf16.mxu1 %vm3121_vm1, %v3117_v3 }
 0x1aa   : > { %7224 = vmatpush3.bf16.msra.mxu0 %v4573_v29 }
 0x1ab   : > { %7225 = vmatprep.subr.bf16.mxu0 %v4572_v45 }
 0x1ad   : > { %7202 = vmatmul.mubr.msk.bf16.gmra.mxu0 %vm3121_vm1, %v10911_v54 }
 0x1ae   : > { %7226 = vmatpush3.bf16.msra.mxu0 %v4572_v45 }
 0x1af   : > { %7212 = vmatpush3.bf16.xpose.msra.mxu1 %v3758_v4  ;;  %7227 = vmatprep.subr.bf16.mxu0 %v4571_v43 }
 0x1b0   : > { %7237 = vmatprep.subr.bf16.mxu1 %v4578_v36 }
 0x1b2   : > { %7228 = vmatpush3.bf16.msra.mxu0 %v4571_v43 }
 0x1b3   : > { %7253 = vmatprep.subr.bf16.mxu0 %v8905_v33 }
 0x1b6   : > { %7214 = vmatmul.mubr.msk.bf16.vlgmr.msra.gmra.mxu1 %vm3121_vm1, %v10917_v7 }
 0x1b7   : > { %7217 = vmatprep.mubr.msk.bf16.mxu1 %vm3121_vm1, %v3087_v44  ;;  %7238 = vmatpush3.bf16.msra.mxu1 %v4578_v36 }
 0x1b8   : > { %7239 = vmatprep.subr.bf16.mxu1 %v4577_v5 }
 0x1bb   : > { %7240 = vmatpush3.bf16.msra.mxu1 %v4577_v5 }
 0x1bc   : > { %7241 = vmatprep.subr.bf16.mxu1 %v4576_v38 }
 0x1be   : > { %7218 = vmatmul.mubr.msk.bf16.gmra.mxu1 %vm3121_vm1, %v10920_v37 }
 0x1bf   : > { %7242 = vmatpush3.bf16.msra.mxu1 %v4576_v38 }
 0x1c0   : > { %7243 = vmatprep.subr.bf16.mxu1 %v4575_v1 }
 0x1c3   : > { %7244 = vmatpush3.bf16.msra.mxu1 %v4575_v1 }
 0x1c4   : > { %7269 = vmatprep.subr.bf16.mxu1 %v8927_v32 }
 0x205   : > { %v8932_v21 = vpop.f32.mrf.mxu0 }
 0x206   : > { %v3841_v19 = vsel %vm3834_vm2, %v8932_v21, -inf }
 0x207   : > { %3842 = vmax.xlane.f32.xlu1 %v3841_v19  ;;  %v8936_v42 = vpop.f32.mrf.mxu0 }
 0x208   : > { %v3835_v11 = vsel %vm3834_vm2, %v8936_v42, -inf }
 0x209   : > { %3836 = vmax.xlane.f32.xlu0 %v3835_v11  ;;  %v8940_v59 = vpop.f32.mrf.mxu0 }
 0x20a   : > { %v3844_v22 = vsel %vm3834_vm2, %v8940_v59, -inf }
 0x20b   : > { %3845 = vmax.xlane.f32.xlu1 %v3844_v22  ;;  %v8944_v23 = vpop.f32.mrf.mxu0 }
 0x20c   : > { %v3838_v27 = vsel %vm3834_vm2, %v8944_v23, -inf }
 0x20d   : > { %3839 = vmax.xlane.f32.xlu0 %v3838_v27  ;;  %v8948_v29 = vpop.f32.mrf.mxu0 }
 0x20e   : > { %v3853_v10 = vsel %vm3834_vm2, %v8948_v29, -inf }
 0x20f   : > { %v8950_v16 = vpop.f32.mrf.mxu0 }
 0x210   : > { %v3847_v62 = vsel %vm3834_vm2, %v8950_v16, -inf }
 0x211   : > { %3854 = vmax.xlane.f32.xlu0 %v3853_v10  ;;  %v8954_v8 = vpop.f32.mrf.mxu0 }
 0x212   : > { %v3856_v31 = vsel %vm3834_vm2, %v8954_v8, -inf }
 0x213   : > { %3857 = vmax.xlane.f32.xlu1 %v3856_v31  ;;  %v8958_v56 = vpop.f32.mrf.mxu0 }
 0x214   : > { %v3850_v3 = vsel %vm3834_vm2, %v8958_v56, -inf }
 0x215   : > { %3848 = vmax.xlane.f32.xlu0 %v3847_v62 }
 0x216   : > { %v8964_v60 = vpop.f32.mrf.mxu1 }
 0x217   : > { %3851 = vmax.xlane.f32.xlu1 %v3850_v3  ;;  %v3865_v43 = vsel %vm3834_vm2, %v8964_v60, -inf }
 0x218   : > { %v8968_v45 = vpop.f32.mrf.mxu1 }
 0x219   : > { %3866 = vmax.xlane.f32.xlu0 %v3865_v43  ;;  %v3859_v54 = vsel %vm3834_vm2, %v8968_v45, -inf }
 0x21a   : > { %v8972_v36 = vpop.f32.mrf.mxu1 }
 0x21b   : > { %v3868_v55 = vsel %vm3834_vm2, %v8972_v36, -inf }
 0x21c   : > { %v8976_v35 = vpop.f32.mrf.mxu1  ;;  %3869 = vmax.xlane.f32.xlu1 %v3868_v55 }
 0x21d   : > { %3860 = vmax.xlane.f32.xlu0 %v3859_v54  ;;  %v3862_v5 = vsel %vm3834_vm2, %v8976_v35, -inf }
 0x21e   : > { %v8980_v4 = vpop.f32.mrf.mxu1 }
 0x21f   : > { %v3877_v53 = vsel %vm3834_vm2, %v8980_v4, -inf }
 0x220   : > { %v8984_v52 = vpop.f32.mrf.mxu1  ;;  %3863 = vmax.xlane.f32.xlu1 %v3862_v5 }
 0x221   : > { %3878 = vmax.xlane.f32.xlu0 %v3877_v53  ;;  %v3871_v7 = vsel %vm3834_vm2, %v8984_v52, -inf }
 0x222   : > { %v8988_v44 = vpop.f32.mrf.mxu1 }
 0x223   : > { %v3880_v15 = vsel %vm3834_vm2, %v8988_v44, -inf }
 0x224   : > { %v8992_v48 = vpop.f32.mrf.mxu1  ;;  %3881 = vmax.xlane.f32.xlu1 %v3880_v15 }
 0x225   : > { %3872 = vmax.xlane.f32.xlu0 %v3871_v7  ;;  %v8996_v38 = vpop.f32.mrf.mxu0  ;;  %v3874_v1 = vsel %vm3834_vm2, %v8992_v48, -inf }
 0x226   : > { %v3889_v18 = vsel %vm3834_vm2, %v8996_v38, -inf }
 0x227   : > { %v9000_v30 = vpop.f32.mrf.mxu0 }
 0x228   : > { %3875 = vmax.xlane.f32.xlu1 %v3874_v1  ;;  %v3883_v22 = vsel %vm3834_vm2, %v9000_v30, -inf }
 0x229   : > { %3890 = vmax.xlane.f32.xlu0 %v3889_v18  ;;  %v9004_v37 = vpop.f32.mrf.mxu0 }
 0x22a   : > { %v3892_v19 = vsel %vm3834_vm2, %v9004_v37, -inf }
 0x22b   : > { %v9008_v11 = vpop.f32.mrf.mxu0 }
 0x22c   : > { %3893 = vmax.xlane.f32.xlu1 %v3892_v19  ;;  %v3886_v10 = vsel %vm3834_vm2, %v9008_v11, -inf }
 0x22d   : > { %3884 = vmax.xlane.f32.xlu0 %v3883_v22  ;;  %v9012_v27 = vpop.f32.mrf.mxu0 }
 0x22e   : > { %v3901_v62 = vsel %vm3834_vm2, %v9012_v27, -inf }
 0x22f   : > { %v9016_v31 = vpop.f32.mrf.mxu0 }
 0x230   : > { %3887 = vmax.xlane.f32.xlu1 %v3886_v10  ;;  %v3895_v54 = vsel %vm3834_vm2, %v9016_v31, -inf }
 0x231   : > { %3902 = vmax.xlane.f32.xlu0 %v3901_v62  ;;  %v9020_v3 = vpop.f32.mrf.mxu0 }
 0x232   : > { %v3904_v43 = vsel %vm3834_vm2, %v9020_v3, -inf }
 0x233   : > { %v9024_v55 = vpop.f32.mrf.mxu0 }
 0x234   : > { %3905 = vmax.xlane.f32.xlu1 %v3904_v43  ;;  %v3898_v53 = vsel %vm3834_vm2, %v9024_v55, -inf }
 0x235   : > { %3896 = vmax.xlane.f32.xlu0 %v3895_v54 }
 0x236   : > { %v9028_v5 = vpop.f32.mrf.mxu1 }
 0x237   : > { %v3913_v7 = vsel %vm3834_vm2, %v9028_v5, -inf }
 0x238   : > { %v9032_v15 = vpop.f32.mrf.mxu1  ;;  %3899 = vmax.xlane.f32.xlu1 %v3898_v53 }
 0x239   : > { %3914 = vmax.xlane.f32.xlu0 %v3913_v7  ;;  %v3907_v22 = vsel %vm3834_vm2, %v9032_v15, -inf }
 0x23a   : > { %v9036_v1 = vpop.f32.mrf.mxu1 }
 0x23b   : > { %v3916_v18 = vsel %vm3834_vm2, %v9036_v1, -inf }
 0x23c   : > { %v9040_v19 = vpop.f32.mrf.mxu1  ;;  %3917 = vmax.xlane.f32.xlu1 %v3916_v18 }
 0x23d   : > { %3908 = vmax.xlane.f32.xlu0 %v3907_v22  ;;  %v3910_v62 = vsel %vm3834_vm2, %v9040_v19, -inf }
 0x23e   : > { %v9044_v10 = vpop.f32.mrf.mxu1 }
 0x23f   : > { %v3925_v54 = vsel %vm3834_vm2, %v9044_v10, -inf }
 0x240   : > { %v9048_v43 = vpop.f32.mrf.mxu1  ;;  %3911 = vmax.xlane.f32.xlu1 %v3910_v62 }
 0x241   : > { %3926 = vmax.xlane.f32.xlu0 %v3925_v54  ;;  %v3919_v22 = vsel %vm3834_vm2, %v9048_v43, -inf }
 0x242   : > { %v9052_v53 = vpop.f32.mrf.mxu1 }
 0x243   : > { %v3928_v7 = vsel %vm3834_vm2, %v9052_v53, -inf }
 0x244   : > { %v9056_v18 = vpop.f32.mrf.mxu1  ;;  %3929 = vmax.xlane.f32.xlu1 %v3928_v7 }
 0x245   : > { %3920 = vmax.xlane.f32.xlu0 %v3919_v22  ;;  %v9060_v24 = vpop.f32.mrf.mxu0  ;;  %v3922_v62 = vsel %vm3834_vm2, %v9056_v18, -inf }
 0x246   : > { %v3937_v54 = vsel %vm3834_vm2, %v9060_v24, -inf }
 0x247   : > { %v9064_v9 = vpop.f32.mrf.mxu0 }
 0x248   : > { %3923 = vmax.xlane.f32.xlu1 %v3922_v62  ;;  %v3931_v22 = vsel %vm3834_vm2, %v9064_v9, -inf }
 0x249   : > { %3938 = vmax.xlane.f32.xlu0 %v3937_v54  ;;  %v9068_v12 = vpop.f32.mrf.mxu0 }
 0x24a   : > { %v3940_v7 = vsel %vm3834_vm2, %v9068_v12, -inf }
 0x24b   : > { %v9072_v49 = vpop.f32.mrf.mxu0 }
 0x24c   : > { %3941 = vmax.xlane.f32.xlu1 %v3940_v7  ;;  %v3934_v62 = vsel %vm3834_vm2, %v9072_v49, -inf }
 0x24d   : > { %3932 = vmax.xlane.f32.xlu0 %v3931_v22  ;;  %v9076_v14 = vpop.f32.mrf.mxu0 }
 0x24e   : > { %v3949_v54 = vsel %vm3834_vm2, %v9076_v14, -inf }
 0x24f   : > { %v9080_v34 = vpop.f32.mrf.mxu0 }
 0x250   : > { %3935 = vmax.xlane.f32.xlu1 %v3934_v62  ;;  %v3943_v22 = vsel %vm3834_vm2, %v9080_v34, -inf }
 0x251   : > { %3950 = vmax.xlane.f32.xlu0 %v3949_v54  ;;  %v9084_v0 = vpop.f32.mrf.mxu0 }
 0x252   : > { %v3952_v7 = vsel %vm3834_vm2, %v9084_v0, -inf }
 0x253   : > { %v9088_v2 = vpop.f32.mrf.mxu0 }
 0x254   : > { %3953 = vmax.xlane.f32.xlu1 %v3952_v7  ;;  %v3946_v62 = vsel %vm3834_vm2, %v9088_v2, -inf }
 0x255   : > { %3944 = vmax.xlane.f32.xlu0 %v3943_v22 }
 0x256   : > { %v9092_v39 = vpop.f32.mrf.mxu1 }
 0x257   : > { %v3961_v54 = vsel %vm3834_vm2, %v9092_v39, -inf }
 0x258   : > { %v9096_v46 = vpop.f32.mrf.mxu1  ;;  %3947 = vmax.xlane.f32.xlu1 %v3946_v62 }
 0x259   : > { %3962 = vmax.xlane.f32.xlu0 %v3961_v54  ;;  %v3955_v22 = vsel %vm3834_vm2, %v9096_v46, -inf }
 0x25a   : > { %v9100_v47 = vpop.f32.mrf.mxu1 }
 0x25b   : > { %v3964_v7 = vsel %vm3834_vm2, %v9100_v47, -inf }
 0x25c   : > { %v9104_v61 = vpop.f32.mrf.mxu1  ;;  %3965 = vmax.xlane.f32.xlu1 %v3964_v7 }
 0x25d   : > { %3956 = vmax.xlane.f32.xlu0 %v3955_v22  ;;  %v3958_v62 = vsel %vm3834_vm2, %v9104_v61, -inf }
 0x25e   : > { %v9108_v50 = vpop.f32.mrf.mxu1 }
 0x25f   : > { %v3973_v54 = vsel %vm3834_vm2, %v9108_v50, -inf }
 0x260   : > { %v9112_v25 = vpop.f32.mrf.mxu1  ;;  %3959 = vmax.xlane.f32.xlu1 %v3958_v62 }
 0x261   : > { %3974 = vmax.xlane.f32.xlu0 %v3973_v54  ;;  %v3967_v22 = vsel %vm3834_vm2, %v9112_v25, -inf }
 0x262   : > { %v9116_v51 = vpop.f32.mrf.mxu1 }
 0x263   : > { %v3976_v7 = vsel %vm3834_vm2, %v9116_v51, -inf }
 0x264   : > { %v9120_v40 = vpop.f32.mrf.mxu1  ;;  %3977 = vmax.xlane.f32.xlu1 %v3976_v7 }
 0x265   : > { %3968 = vmax.xlane.f32.xlu0 %v3967_v22  ;;  %v9124_v57 = vpop.f32.mrf.mxu0  ;;  %v3970_v62 = vsel %vm3834_vm2, %v9120_v40, -inf }
 0x266   : > { %v3985_v54 = vsel %vm3834_vm2, %v9124_v57, -inf }
 0x267   : > { %v9128_v41 = vpop.f32.mrf.mxu0 }
 0x268   : > { %3971 = vmax.xlane.f32.xlu1 %v3970_v62  ;;  %v3979_v22 = vsel %vm3834_vm2, %v9128_v41, -inf }
 0x269   : > { %3986 = vmax.xlane.f32.xlu0 %v3985_v54  ;;  %v9132_v32 = vpop.f32.mrf.mxu0 }
 0x26a   : > { %v3988_v7 = vsel %vm3834_vm2, %v9132_v32, -inf }
 0x26b   : > { %v9136_v17 = vpop.f32.mrf.mxu0 }
 0x26c   : > { %10924 = vst [vmem:[#allocation33_spill] sm:$0xff] %v9136_v17  ;;  %3989 = vmax.xlane.f32.xlu1 %v3988_v7  ;;  %v3982_v62 = vsel %vm3834_vm2, %v9136_v17, -inf }
 0x26d   : > { %3980 = vmax.xlane.f32.xlu0 %v3979_v22  ;;  %v9140_v63 = vpop.f32.mrf.mxu0 }
 0x26e   : > { %10925 = vst [vmem:[#allocation24_spill] sm:$0xff] %v9140_v63  ;;  %v3997_v54 = vsel %vm3834_vm2, %v9140_v63, -inf }
 0x26f   : > { %v9144_v28 = vpop.f32.mrf.mxu0 }
 0x270   : > { %10926 = vst [vmem:[#allocation21_spill] sm:$0xff] %v9144_v28  ;;  %3983 = vmax.xlane.f32.xlu1 %v3982_v62  ;;  %v3991_v22 = vsel %vm3834_vm2, %v9144_v28, -inf }
 0x271   : > { %3998 = vmax.xlane.f32.xlu0 %v3997_v54  ;;  %v9148_v58 = vpop.f32.mrf.mxu0 }
 0x272   : > { %10927 = vst [vmem:[#allocation31_spill] sm:$0xff] %v9148_v58  ;;  %v4000_v7 = vsel %vm3834_vm2, %v9148_v58, -inf }
 0x273   : > { %v9152_v13 = vpop.f32.mrf.mxu0 }
 0x274   : > { %4001 = vmax.xlane.f32.xlu1 %v4000_v7  ;;  %10928 = vst [vmem:[#allocation27_spill] sm:$0xff] %v9152_v13  ;;  %v3994_v62 = vsel %vm3834_vm2, %v9152_v13, -inf }
 0x275   : > { %3992 = vmax.xlane.f32.xlu0 %v3991_v22 }
 0x276   : > { %v9156_v20 = vpop.f32.mrf.mxu1 }
 0x277   : > { %10929 = vst [vmem:[#allocation40_spill] sm:$0xff] %v9156_v20  ;;  %v4009_v54 = vsel %vm3834_vm2, %v9156_v20, -inf }
 0x278   : > { %v9160_v33 = vpop.f32.mrf.mxu1  ;;  %3995 = vmax.xlane.f32.xlu1 %v3994_v62 }
 0x279   : > { %10930 = vst [vmem:[#allocation42_spill] sm:$0xff] %v9160_v33  ;;  %4010 = vmax.xlane.f32.xlu0 %v4009_v54  ;;  %v4003_v22 = vsel %vm3834_vm2, %v9160_v33, -inf }
 0x27a   : > { %v9164_v6 = vpop.f32.mrf.mxu1 }
 0x27b   : > { %10931 = vst [vmem:[#allocation37_spill] sm:$0xff] %v9164_v6  ;;  %v4012_v7 = vsel %vm3834_vm2, %v9164_v6, -inf }
 0x27c   : > { %v9168_v26 = vpop.f32.mrf.mxu1  ;;  %4013 = vmax.xlane.f32.xlu1 %v4012_v7 }
 0x27d   : > { %10932 = vst [vmem:[#allocation35_spill] sm:$0xff] %v9168_v26  ;;  %4004 = vmax.xlane.f32.xlu0 %v4003_v22  ;;  %v4006_v62 = vsel %vm3834_vm2, %v9168_v26, -inf }
 0x27e   : > { %v9172_v13 = vpop.f32.mrf.mxu1 }
 0x27f   : > { %10933 = vst [vmem:[#allocation41_spill] sm:$0xff] %v9172_v13  ;;  %v4021_v54 = vsel %vm3834_vm2, %v9172_v13, -inf }
 0x280   : > { %v9176_v28 = vpop.f32.mrf.mxu1  ;;  %4007 = vmax.xlane.f32.xlu1 %v4006_v62 }
 0x281   : > { %10934 = vst [vmem:[#allocation39_spill] sm:$0xff] %v9176_v28  ;;  %4022 = vmax.xlane.f32.xlu0 %v4021_v54  ;;  %v4015_v22 = vsel %vm3834_vm2, %v9176_v28, -inf }
 0x282   : > { %v9180_v6 = vpop.f32.mrf.mxu1 }
 0x283   : > { %10935 = vst [vmem:[#allocation57_spill] sm:$0xff] %v9180_v6  ;;  %v4024_v7 = vsel %vm3834_vm2, %v9180_v6, -inf }
 0x284   : > { %v9184_v20 = vpop.f32.mrf.mxu1  ;;  %4025 = vmax.xlane.f32.xlu1 %v4024_v7 }
 0x285   : > { %10936 = vst [vmem:[#allocation58_spill] sm:$0xff] %v9184_v20  ;;  %4016 = vmax.xlane.f32.xlu0 %v4015_v22  ;;  %v4018_v26 = vsel %vm3834_vm2, %v9184_v20, -inf }
 0x288   : > { %4019 = vmax.xlane.f32.xlu1 %v4018_v26 }
 0x290   : > { %v3843_v62 = vpop.xlane.xlu1 %3842 }
 0x291   : > { %v4029_v13 = vsub.f32 %v8932_v21, %v3843_v62 }
 0x292   : > { %v3837_v54 = vpop.xlane.xlu0 %3836 }
 0x293   : > { %v4095_v33 = vmul.f32 1.442695, %v4029_v13  ;;  %v4027_v58 = vsub.f32 %v8936_v42, %v3837_v54 }
 0x294   : > { %v3846_v63 = vpop.xlane.xlu1 %3845 }
 0x295   : > { %7577 = vpow2.f32 %v4095_v33  ;;  %v4091_v6 = vmul.f32 1.442695, %v4027_v58  ;;  %v4030_v7 = vsub.f32 %v8940_v59, %v3846_v63 }
 0x296   : > { %v3840_v17 = vpop.xlane.xlu0 %3839 }
 0x297   : > { %7579 = vpow2.f32 %v4091_v6  ;;  %v4097_v28 = vmul.f32 1.442695, %v4030_v7  ;;  %v4028_v22 = vsub.f32 %v8944_v23, %v3840_v17 }
 0x299   : > { %7581 = vpow2.f32 %v4097_v28  ;;  %v4093_v20 = vmul.f32 1.442695, %v4028_v22 }
 0x29a   : > { %v3855_v26 = vpop.xlane.xlu0 %3854 }
 0x29b   : > { %7583 = vpow2.f32 %v4093_v20  ;;  %v4033_v21 = vsub.f32 %v8948_v29, %v3855_v26 }
 0x29c   : > { %v3858_v62 = vpop.xlane.xlu1 %3857 }
 0x29d   : > { %v4103_v13 = vmul.f32 1.442695, %v4033_v21  ;;  %v4034_v42 = vsub.f32 %v8954_v8, %v3858_v62 }
 0x29e   : > { %v3849_v54 = vpop.xlane.xlu0 %3848 }
 0x29f   : > { %7585 = vpow2.f32 %v4103_v13  ;;  %v4105_v58 = vmul.f32 1.442695, %v4034_v42  ;;  %v4031_v63 = vsub.f32 %v8950_v16, %v3849_v54 }
 0x2a0   : > { %v3852_v33 = vpop.xlane.xlu1 %3851 }
 0x2a1   : > { %7587 = vpow2.f32 %v4105_v58  ;;  %v4099_v6 = vmul.f32 1.442695, %v4031_v63  ;;  %v4032_v17 = vsub.f32 %v8958_v56, %v3852_v33 }
 0x2a2   : > { %v9198_v28 = vpop.eup %7577  ;;  %v3867_v59 = vpop.xlane.xlu0 %3866 }
 0x2a3   : > { %7589 = vpow2.f32 %v4099_v6  ;;  %v4101_v20 = vmul.f32 1.442695, %v4032_v17  ;;  %v4037_v23 = vsub.f32 %v8964_v60, %v3867_v59  ;;  %v4225_v29 = vsel %vm3834_vm2, %v9198_v28, 0.0 }
 0x2a4   : > { %v9203_v8 = vpop.eup %7579  ;;  %4226 = vadd.xlane.f32.xlu0 %v4225_v29 }
 0x2a5   : > { %7591 = vpow2.f32 %v4101_v20  ;;  %v4111_v16 = vmul.f32 1.442695, %v4037_v23  ;;  %v3870_v7 = vpop.xlane.xlu1 %3869  ;;  %v4219_v60 = vsel %vm3834_vm2, %v9203_v8, 0.0 }
 0x2a6   : > { %v9205_v22 = vpop.eup %7581  ;;  %v4038_v56 = vsub.f32 %v8972_v36, %v3870_v7  ;;  %v3861_v26 = vpop.xlane.xlu0 %3860 }
 0x2a7   : > { %7593 = vpow2.f32 %v4111_v16  ;;  %v4035_v21 = vsub.f32 %v8968_v45, %v3861_v26  ;;  %v4228_v62 = vsel %vm3834_vm2, %v9205_v22, 0.0 }
 0x2a8   : > { %v9213_v13 = vpop.eup %7583  ;;  %v4113_v42 = vmul.f32 1.442695, %v4038_v56  ;;  %4220 = vadd.xlane.f32.xlu0 %v4219_v60  ;;  %4229 = vadd.xlane.f32.xlu1 %v4228_v62 }
 0x2a9   : > { %v4107_v54 = vmul.f32 1.442695, %v4035_v21  ;;  %v3864_v58 = vpop.xlane.xlu1 %3863  ;;  %v4222_v33 = vsel %vm3834_vm2, %v9213_v13, 0.0 }
 0x2aa   : > { %7595 = vpow2.f32 %v4113_v42  ;;  %v4036_v36 = vsub.f32 %v8976_v35, %v3864_v58  ;;  %v3879_v63 = vpop.xlane.xlu0 %3878 }
 0x2ab   : > { %7597 = vpow2.f32 %v4107_v54  ;;  %v4041_v45 = vsub.f32 %v8980_v4, %v3879_v63 }
 0x2ac   : > { %v9219_v6 = vpop.eup %7585  ;;  %v4109_v17 = vmul.f32 1.442695, %v4036_v36  ;;  %4223 = vadd.xlane.f32.xlu1 %v4222_v33 }
 0x2ad   : > { %v4119_v59 = vmul.f32 1.442695, %v4041_v45  ;;  %v3882_v20 = vpop.xlane.xlu1 %3881  ;;  %v4237_v23 = vsel %vm3834_vm2, %v9219_v6, 0.0 }
 0x2ae   : > { %v9223_v29 = vpop.eup %7587  ;;  %7599 = vpow2.f32 %v4109_v17  ;;  %v4042_v35 = vsub.f32 %v8988_v44, %v3882_v20  ;;  %v3873_v16 = vpop.xlane.xlu0 %3872  ;;  %4238 = vadd.xlane.f32.xlu0 %v4237_v23 }
 0x2af   : > { %7601 = vpow2.f32 %v4119_v59  ;;  %v4039_v4 = vsub.f32 %v8984_v52, %v3873_v16  ;;  %v4240_v7 = vsel %vm3834_vm2, %v9223_v29, 0.0 }
 0x2b0   : > { %v9229_v56 = vpop.eup %7589  ;;  %v4121_v26 = vmul.f32 1.442695, %v4042_v35  ;;  %4241 = vadd.xlane.f32.xlu1 %v4240_v7 }
 0x2b1   : > { %v4115_v21 = vmul.f32 1.442695, %v4039_v4  ;;  %v3876_v60 = vpop.xlane.xlu1 %3875  ;;  %v4231_v62 = vsel %vm3834_vm2, %v9229_v56, 0.0 }
 0x2b2   : > { %v9233_v42 = vpop.eup %7591  ;;  %7603 = vpow2.f32 %v4121_v26  ;;  %v4040_v44 = vsub.f32 %v8992_v48, %v3876_v60  ;;  %v3891_v54 = vpop.xlane.xlu0 %3890  ;;  %4232 = vadd.xlane.f32.xlu0 %v4231_v62 }
 0x2b3   : > { %7605 = vpow2.f32 %v4115_v21  ;;  %v4045_v52 = vsub.f32 %v8996_v38, %v3891_v54  ;;  %v4234_v58 = vsel %vm3834_vm2, %v9233_v42, 0.0 }
 0x2b4   : > { %v9239_v36 = vpop.eup %7593  ;;  %v4117_v63 = vmul.f32 1.442695, %v4040_v44  ;;  %4235 = vadd.xlane.f32.xlu1 %v4234_v58 }
 0x2b5   : > { %v4127_v45 = vmul.f32 1.442695, %v4045_v52  ;;  %v3894_v33 = vpop.xlane.xlu1 %3893  ;;  %v4249_v17 = vsel %vm3834_vm2, %v9239_v36, 0.0 }
 0x2b6   : > { %7607 = vpow2.f32 %v4117_v63  ;;  %v4046_v48 = vsub.f32 %v9004_v37, %v3894_v33  ;;  %v3885_v59 = vpop.xlane.xlu0 %3884  ;;  %4250 = vadd.xlane.f32.xlu0 %v4249_v17 }
 0x2b7   : > { %v9244_v20 = vpop.eup %7595  ;;  %7609 = vpow2.f32 %v4127_v45  ;;  %v4043_v38 = vsub.f32 %v9000_v30, %v3885_v59 }
 0x2b8   : > { %v9247_v23 = vpop.eup %7597  ;;  %v4129_v35 = vmul.f32 1.442695, %v4046_v48  ;;  %v4252_v16 = vsel %vm3834_vm2, %v9244_v20, 0.0 }
 0x2b9   : > { %v4123_v4 = vmul.f32 1.442695, %v4043_v38  ;;  %v3888_v7 = vpop.xlane.xlu1 %3887  ;;  %4253 = vadd.xlane.f32.xlu1 %v4252_v16  ;;  %v4243_v26 = vsel %vm3834_vm2, %v9247_v23, 0.0 }
 0x2ba   : > { %7611 = vpow2.f32 %v4129_v35  ;;  %v4044_v37 = vsub.f32 %v9008_v11, %v3888_v7  ;;  %v3903_v21 = vpop.xlane.xlu0 %3902  ;;  %4244 = vadd.xlane.f32.xlu0 %v4243_v26 }
 0x2bb   : > { %v9254_v60 = vpop.eup %7599  ;;  %7613 = vpow2.f32 %v4123_v4  ;;  %v4049_v30 = vsub.f32 %v9012_v27, %v3903_v21 }
 0x2bc   : > { %v9257_v62 = vpop.eup %7601  ;;  %v4125_v44 = vmul.f32 1.442695, %v4044_v37  ;;  %v4246_v54 = vsel %vm3834_vm2, %v9254_v60, 0.0 }
 0x2bd   : > { %v4135_v52 = vmul.f32 1.442695, %v4049_v30  ;;  %v3906_v58 = vpop.xlane.xlu1 %3905  ;;  %4247 = vadd.xlane.f32.xlu1 %v4246_v54  ;;  %v4261_v63 = vsel %vm3834_vm2, %v9257_v62, 0.0 }
 0x2be   : > { %7615 = vpow2.f32 %v4125_v44  ;;  %v4050_v11 = vsub.f32 %v9020_v3, %v3906_v58  ;;  %v3897_v45 = vpop.xlane.xlu0 %3896  ;;  %4262 = vadd.xlane.f32.xlu0 %v4261_v63 }
 0x2bf   : > { %v9264_v33 = vpop.eup %7603  ;;  %7617 = vpow2.f32 %v4135_v52  ;;  %v4047_v27 = vsub.f32 %v9016_v31, %v3897_v45 }
 0x2c0   : > { %v9267_v17 = vpop.eup %7605  ;;  %v4137_v48 = vmul.f32 1.442695, %v4050_v11  ;;  %v4264_v59 = vsel %vm3834_vm2, %v9264_v33, 0.0 }
 0x2c1   : > { %v4131_v38 = vmul.f32 1.442695, %v4047_v27  ;;  %v3900_v35 = vpop.xlane.xlu1 %3899  ;;  %4265 = vadd.xlane.f32.xlu1 %v4264_v59  ;;  %v4255_v16 = vsel %vm3834_vm2, %v9267_v17, 0.0 }
 0x2c2   : > { %7619 = vpow2.f32 %v4137_v48  ;;  %v4048_v3 = vsub.f32 %v9024_v55, %v3900_v35  ;;  %v3915_v4 = vpop.xlane.xlu0 %3914  ;;  %4256 = vadd.xlane.f32.xlu0 %v4255_v16 }
 0x2c3   : > { %v9274_v7 = vpop.eup %7607  ;;  %7621 = vpow2.f32 %v4131_v38  ;;  %v4053_v31 = vsub.f32 %v9028_v5, %v3915_v4 }
 0x2c4   : > { %v9277_v26 = vpop.eup %7609  ;;  %v4133_v37 = vmul.f32 1.442695, %v4048_v3  ;;  %v4258_v21 = vsel %vm3834_vm2, %v9274_v7, 0.0 }
 0x2c5   : > { %v4143_v30 = vmul.f32 1.442695, %v4053_v31  ;;  %v3918_v44 = vpop.xlane.xlu1 %3917  ;;  %4259 = vadd.xlane.f32.xlu1 %v4258_v21  ;;  %v4273_v54 = vsel %vm3834_vm2, %v9277_v26, 0.0 }
 0x2c6   : > { %7623 = vpow2.f32 %v4133_v37  ;;  %v4054_v55 = vsub.f32 %v9036_v1, %v3918_v44  ;;  %v3909_v52 = vpop.xlane.xlu0 %3908  ;;  %4274 = vadd.xlane.f32.xlu0 %v4273_v54 }
 0x2c7   : > { %v9284_v58 = vpop.eup %7611  ;;  %7625 = vpow2.f32 %v4143_v30  ;;  %v4051_v5 = vsub.f32 %v9032_v15, %v3909_v52 }
 0x2c8   : > { %v9287_v63 = vpop.eup %7613  ;;  %v4145_v11 = vmul.f32 1.442695, %v4054_v55  ;;  %v4276_v45 = vsel %vm3834_vm2, %v9284_v58, 0.0 }
 0x2c9   : > { %v4139_v27 = vmul.f32 1.442695, %v4051_v5  ;;  %v3912_v48 = vpop.xlane.xlu1 %3911  ;;  %4277 = vadd.xlane.f32.xlu1 %v4276_v45  ;;  %v4267_v59 = vsel %vm3834_vm2, %v9287_v63, 0.0 }
 0x2ca   : > { %7627 = vpow2.f32 %v4145_v11  ;;  %v4052_v1 = vsub.f32 %v9040_v19, %v3912_v48  ;;  %v3927_v38 = vpop.xlane.xlu0 %3926  ;;  %4268 = vadd.xlane.f32.xlu0 %v4267_v59 }
 0x2cb   : > { %v9294_v35 = vpop.eup %7615  ;;  %7629 = vpow2.f32 %v4139_v27  ;;  %v4057_v15 = vsub.f32 %v9044_v10, %v3927_v38 }
 0x2cc   : > { %v9297_v16 = vpop.eup %7617  ;;  %v4141_v3 = vmul.f32 1.442695, %v4052_v1  ;;  %v4270_v4 = vsel %vm3834_vm2, %v9294_v35, 0.0 }
 0x2cd   : > { %v4151_v31 = vmul.f32 1.442695, %v4057_v15  ;;  %v3930_v37 = vpop.xlane.xlu1 %3929  ;;  %4271 = vadd.xlane.f32.xlu1 %v4270_v4  ;;  %v4285_v21 = vsel %vm3834_vm2, %v9297_v16, 0.0 }
 0x2ce   : > { %7631 = vpow2.f32 %v4141_v3  ;;  %v4058_v19 = vsub.f32 %v9052_v53, %v3930_v37  ;;  %v3921_v30 = vpop.xlane.xlu0 %3920  ;;  %4286 = vadd.xlane.f32.xlu0 %v4285_v21 }
 0x2cf   : > { %v9304_v44 = vpop.eup %7619  ;;  %7633 = vpow2.f32 %v4151_v31  ;;  %v4055_v10 = vsub.f32 %v9048_v43, %v3921_v30 }
 0x2d0   : > { %v9307_v54 = vpop.eup %7621  ;;  %v4153_v55 = vmul.f32 1.442695, %v4058_v19  ;;  %v4288_v52 = vsel %vm3834_vm2, %v9304_v44, 0.0 }
 0x2d1   : > { %v4147_v5 = vmul.f32 1.442695, %v4055_v10  ;;  %v3924_v11 = vpop.xlane.xlu1 %3923  ;;  %4289 = vadd.xlane.f32.xlu1 %v4288_v52  ;;  %v4279_v45 = vsel %vm3834_vm2, %v9307_v54, 0.0 }
 0x2d2   : > { %7635 = vpow2.f32 %v4153_v55  ;;  %v4056_v53 = vsub.f32 %v9056_v18, %v3924_v11  ;;  %v3939_v27 = vpop.xlane.xlu0 %3938  ;;  %4280 = vadd.xlane.f32.xlu0 %v4279_v45 }
 0x2d3   : > { %v9314_v48 = vpop.eup %7623  ;;  %7637 = vpow2.f32 %v4147_v5  ;;  %v4061_v43 = vsub.f32 %v9060_v24, %v3939_v27 }
 0x2d4   : > { %v9317_v59 = vpop.eup %7625  ;;  %v4149_v1 = vmul.f32 1.442695, %v4056_v53  ;;  %v4282_v38 = vsel %vm3834_vm2, %v9314_v48, 0.0 }
 0x2d5   : > { %v4159_v15 = vmul.f32 1.442695, %v4061_v43  ;;  %v3942_v3 = vpop.xlane.xlu1 %3941  ;;  %4283 = vadd.xlane.f32.xlu1 %v4282_v38  ;;  %v4297_v4 = vsel %vm3834_vm2, %v9317_v59, 0.0 }
 0x2d6   : > { %7639 = vpow2.f32 %v4149_v1  ;;  %v4062_v18 = vsub.f32 %v9068_v12, %v3942_v3  ;;  %v3933_v31 = vpop.xlane.xlu0 %3932  ;;  %4298 = vadd.xlane.f32.xlu0 %v4297_v4 }
 0x2d7   : > { %v9324_v37 = vpop.eup %7627  ;;  %7641 = vpow2.f32 %v4159_v15  ;;  %v4059_v24 = vsub.f32 %v9064_v9, %v3933_v31 }
 0x2d8   : > { %v9327_v21 = vpop.eup %7629  ;;  %v4161_v19 = vmul.f32 1.442695, %v4062_v18  ;;  %v4300_v30 = vsel %vm3834_vm2, %v9324_v37, 0.0 }
 0x2d9   : > { %v4155_v10 = vmul.f32 1.442695, %v4059_v24  ;;  %v3936_v55 = vpop.xlane.xlu1 %3935  ;;  %4301 = vadd.xlane.f32.xlu1 %v4300_v30  ;;  %v4291_v52 = vsel %vm3834_vm2, %v9327_v21, 0.0 }
 0x2da   : > { %7643 = vpow2.f32 %v4161_v19  ;;  %v4060_v12 = vsub.f32 %v9072_v49, %v3936_v55  ;;  %v3951_v5 = vpop.xlane.xlu0 %3950  ;;  %4292 = vadd.xlane.f32.xlu0 %v4291_v52 }
 0x2db   : > { %v9334_v11 = vpop.eup %7631  ;;  %7645 = vpow2.f32 %v4155_v10  ;;  %v4065_v9 = vsub.f32 %v9076_v14, %v3951_v5 }
 0x2dc   : > { %v9337_v45 = vpop.eup %7633  ;;  %v4157_v53 = vmul.f32 1.442695, %v4060_v12  ;;  %v4294_v27 = vsel %vm3834_vm2, %v9334_v11, 0.0 }
 0x2dd   : > { %v4167_v43 = vmul.f32 1.442695, %v4065_v9  ;;  %v3954_v1 = vpop.xlane.xlu1 %3953  ;;  %4295 = vadd.xlane.f32.xlu1 %v4294_v27  ;;  %v4309_v38 = vsel %vm3834_vm2, %v9337_v45, 0.0 }
 0x2de   : > { %7647 = vpow2.f32 %v4157_v53  ;;  %v4066_v49 = vsub.f32 %v9084_v0, %v3954_v1  ;;  %v3945_v15 = vpop.xlane.xlu0 %3944  ;;  %4310 = vadd.xlane.f32.xlu0 %v4309_v38 }
 0x2df   : > { %v9344_v3 = vpop.eup %7635  ;;  %7649 = vpow2.f32 %v4167_v43  ;;  %v4063_v14 = vsub.f32 %v9080_v34, %v3945_v15 }
 0x2e0   : > { %v9347_v4 = vpop.eup %7637  ;;  %v4169_v18 = vmul.f32 1.442695, %v4066_v49  ;;  %v4312_v31 = vsel %vm3834_vm2, %v9344_v3, 0.0 }
 0x2e1   : > { %v4163_v24 = vmul.f32 1.442695, %v4063_v14  ;;  %v3948_v19 = vpop.xlane.xlu1 %3947  ;;  %4313 = vadd.xlane.f32.xlu1 %v4312_v31  ;;  %v4303_v30 = vsel %vm3834_vm2, %v9347_v4, 0.0 }
 0x2e2   : > { %7651 = vpow2.f32 %v4169_v18  ;;  %v4064_v0 = vsub.f32 %v9088_v2, %v3948_v19  ;;  %v3963_v10 = vpop.xlane.xlu0 %3962  ;;  %4304 = vadd.xlane.f32.xlu0 %v4303_v30 }
 0x2e3   : > { %v9354_v55 = vpop.eup %7639  ;;  %7653 = vpow2.f32 %v4163_v24  ;;  %v4069_v34 = vsub.f32 %v9092_v39, %v3963_v10 }
 0x2e4   : > { %v9357_v52 = vpop.eup %7641  ;;  %v4165_v12 = vmul.f32 1.442695, %v4064_v0  ;;  %v4306_v5 = vsel %vm3834_vm2, %v9354_v55, 0.0 }
 0x2e5   : > { %v4175_v9 = vmul.f32 1.442695, %v4069_v34  ;;  %v3966_v53 = vpop.xlane.xlu1 %3965  ;;  %4307 = vadd.xlane.f32.xlu1 %v4306_v5  ;;  %v4321_v27 = vsel %vm3834_vm2, %v9357_v52, 0.0 }
 0x2e6   : > { %7655 = vpow2.f32 %v4165_v12  ;;  %v4070_v2 = vsub.f32 %v9100_v47, %v3966_v53  ;;  %v3957_v43 = vpop.xlane.xlu0 %3956  ;;  %4322 = vadd.xlane.f32.xlu0 %v4321_v27 }
 0x2e7   : > { %v9364_v1 = vpop.eup %7643  ;;  %7657 = vpow2.f32 %v4175_v9  ;;  %v4067_v39 = vsub.f32 %v9096_v46, %v3957_v43 }
 0x2e8   : > { %v9367_v38 = vpop.eup %7645  ;;  %v4177_v49 = vmul.f32 1.442695, %v4070_v2  ;;  %v4324_v15 = vsel %vm3834_vm2, %v9364_v1, 0.0 }
 0x2e9   : > { %v4171_v14 = vmul.f32 1.442695, %v4067_v39  ;;  %v3960_v18 = vpop.xlane.xlu1 %3959  ;;  %4325 = vadd.xlane.f32.xlu1 %v4324_v15  ;;  %v4315_v31 = vsel %vm3834_vm2, %v9367_v38, 0.0 }
 0x2ea   : > { %7659 = vpow2.f32 %v4177_v49  ;;  %v4068_v47 = vsub.f32 %v9104_v61, %v3960_v18  ;;  %v3975_v24 = vpop.xlane.xlu0 %3974  ;;  %4316 = vadd.xlane.f32.xlu0 %v4315_v31 }
 0x2eb   : > { %v9374_v19 = vpop.eup %7647  ;;  %7661 = vpow2.f32 %v4171_v14  ;;  %v4073_v46 = vsub.f32 %v9108_v50, %v3975_v24 }
 0x2ec   : > { %v9377_v30 = vpop.eup %7649  ;;  %v4173_v0 = vmul.f32 1.442695, %v4068_v47  ;;  %v4318_v10 = vsel %vm3834_vm2, %v9374_v19, 0.0 }
 0x2ed   : > { %v4183_v34 = vmul.f32 1.442695, %v4073_v46  ;;  %v3978_v12 = vpop.xlane.xlu1 %3977  ;;  %4319 = vadd.xlane.f32.xlu1 %v4318_v10  ;;  %v4333_v5 = vsel %vm3834_vm2, %v9377_v30, 0.0 }
 0x2ee   : > { %7663 = vpow2.f32 %v4173_v0  ;;  %v4074_v61 = vsub.f32 %v9116_v51, %v3978_v12  ;;  %v3969_v9 = vpop.xlane.xlu0 %3968  ;;  %4334 = vadd.xlane.f32.xlu0 %v4333_v5 }
 0x2ef   : > { %v9384_v53 = vpop.eup %7651  ;;  %7665 = vpow2.f32 %v4183_v34  ;;  %v4071_v50 = vsub.f32 %v9112_v25, %v3969_v9 }
 0x2f0   : > { %v9387_v27 = vpop.eup %7653  ;;  %v4185_v2 = vmul.f32 1.442695, %v4074_v61  ;;  %v4336_v43 = vsel %vm3834_vm2, %v9384_v53, 0.0 }
 0x2f1   : > { %v4179_v39 = vmul.f32 1.442695, %v4071_v50  ;;  %v3972_v49 = vpop.xlane.xlu1 %3971  ;;  %4337 = vadd.xlane.f32.xlu1 %v4336_v43  ;;  %v4327_v15 = vsel %vm3834_vm2, %v9387_v27, 0.0 }
 0x2f2   : > { %7667 = vpow2.f32 %v4185_v2  ;;  %v4072_v51 = vsub.f32 %v9120_v40, %v3972_v49  ;;  %v3987_v14 = vpop.xlane.xlu0 %3986  ;;  %4328 = vadd.xlane.f32.xlu0 %v4327_v15 }
 0x2f3   : > { %v9394_v18 = vpop.eup %7655  ;;  %7669 = vpow2.f32 %v4179_v39  ;;  %v4077_v25 = vsub.f32 %v9124_v57, %v3987_v14 }
 0x2f4   : > { %v9397_v31 = vpop.eup %7657  ;;  %v4181_v47 = vmul.f32 1.442695, %v4072_v51  ;;  %v4330_v24 = vsel %vm3834_vm2, %v9394_v18, 0.0 }
 0x2f5   : > { %v4191_v46 = vmul.f32 1.442695, %v4077_v25  ;;  %v3990_v0 = vpop.xlane.xlu1 %3989  ;;  %4331 = vadd.xlane.f32.xlu1 %v4330_v24  ;;  %v4345_v10 = vsel %vm3834_vm2, %v9397_v31, 0.0 }
 0x2f6   : > { %7671 = vpow2.f32 %v4181_v47  ;;  %v4078_v40 = vsub.f32 %v9132_v32, %v3990_v0  ;;  %v3981_v34 = vpop.xlane.xlu0 %3980  ;;  %4346 = vadd.xlane.f32.xlu0 %v4345_v10  ;;  %v10937_v32 = vld [vmem:[#allocation33_spill] sm:$0xff]  ;;  %v10940_v10 = vld [vmem:[#allocation31_spill] sm:$0xff] }
 0x2f7   : > { %v9404_v12 = vpop.eup %7659  ;;  %7673 = vpow2.f32 %v4191_v46  ;;  %v4075_v57 = vsub.f32 %v9128_v41, %v3981_v34  ;;  %v10938_v41 = vld [vmem:[#allocation24_spill] sm:$0xff] }
 0x2f8   : > { %v9407_v5 = vpop.eup %7661  ;;  %v4193_v61 = vmul.f32 1.442695, %v4078_v40  ;;  %v4348_v9 = vsel %vm3834_vm2, %v9404_v12, 0.0 }
 0x2f9   : > { %v4187_v50 = vmul.f32 1.442695, %v4075_v57  ;;  %v3984_v2 = vpop.xlane.xlu1 %3983  ;;  %4349 = vadd.xlane.f32.xlu1 %v4348_v9  ;;  %v4339_v43 = vsel %vm3834_vm2, %v9407_v5, 0.0 }
 0x2fa   : > { %7675 = vpow2.f32 %v4193_v61  ;;  %v4076_v39 = vsub.f32 %v10937_v32, %v3984_v2  ;;  %v3999_v49 = vpop.xlane.xlu0 %3998  ;;  %4340 = vadd.xlane.f32.xlu0 %v4339_v43  ;;  %v10941_v61 = vld [vmem:[#allocation21_spill] sm:$0xff] }
 0x2fb   : > { %v9414_v15 = vpop.eup %7663  ;;  %7677 = vpow2.f32 %v4187_v50  ;;  %v4081_v51 = vsub.f32 %v10938_v41, %v3999_v49  ;;  %v10942_v41 = vld [vmem:[#allocation27_spill] sm:$0xff] }
 0x2fc   : > { %v9417_v14 = vpop.eup %7665  ;;  %v4189_v25 = vmul.f32 1.442695, %v4076_v39  ;;  %v4342_v47 = vsel %vm3834_vm2, %v9414_v15, 0.0 }
 0x2fd   : > { %10939 = vst [vmem:[#allocation33_spill] sm:$0xff] %v9417_v14  ;;  %v4199_v24 = vmul.f32 1.442695, %v4081_v51  ;;  %v4002_v46 = vpop.xlane.xlu1 %4001  ;;  %4343 = vadd.xlane.f32.xlu1 %v4342_v47  ;;  %v4357_v0 = vsel %vm3834_vm2, %v9417_v14, 0.0 }
 0x2fe   : > { %7679 = vpow2.f32 %v4189_v25  ;;  %v4082_v40 = vsub.f32 %v10940_v10, %v4002_v46  ;;  %4358 = vadd.xlane.f32.xlu0 %v4357_v0  ;;  %v3993_v34 = vpop.xlane.xlu0 %3992  ;;  %v10945_v10 = vld [vmem:[#allocation40_spill] sm:$0xff] }
 0x2ff   : > { %v9424_v57 = vpop.eup %7667  ;;  %7681 = vpow2.f32 %v4199_v24  ;;  %v4079_v9 = vsub.f32 %v10941_v61, %v3993_v34 }
 0x300   : > { %v9427_v50 = vpop.eup %7669  ;;  %v4201_v2 = vmul.f32 1.442695, %v4082_v40  ;;  %v4360_v43 = vsel %vm3834_vm2, %v9424_v57, 0.0 }
 0x301   : > { %v4195_v32 = vmul.f32 1.442695, %v4079_v9  ;;  %4361 = vadd.xlane.f32.xlu1 %v4360_v43  ;;  %v3996_v39 = vpop.xlane.xlu1 %3995  ;;  %v4351_v49 = vsel %vm3834_vm2, %v9427_v50, 0.0  ;;  %v10947_v43 = vld [vmem:[#allocation42_spill] sm:$0xff] }
 0x302   : > { %7683 = vpow2.f32 %v4201_v2  ;;  %v4080_v51 = vsub.f32 %v10942_v41, %v3996_v39  ;;  %4352 = vadd.xlane.f32.xlu0 %v4351_v49  ;;  %v4011_v25 = vpop.xlane.xlu0 %4010  ;;  %v10949_v49 = vld [vmem:[#allocation37_spill] sm:$0xff] }
 0x303   : > { %v9434_v47 = vpop.eup %7671  ;;  %7685 = vpow2.f32 %v4195_v32  ;;  %v4085_v40 = vsub.f32 %v10945_v10, %v4011_v25 }
 0x304   : > { %10943 = vst [vmem:[#allocation24_spill] sm:$0xff] %v9434_v47  ;;  %v9436_v24 = vpop.eup %7673  ;;  %v4197_v46 = vmul.f32 1.442695, %v4080_v51  ;;  %v4354_v0 = vsel %vm3834_vm2, %v9434_v47, 0.0 }
 0x305   : > { %10944 = vst [vmem:[#allocation31_spill] sm:$0xff] %v9436_v24  ;;  %4355 = vadd.xlane.f32.xlu1 %v4354_v0  ;;  %v4014_v34 = vpop.xlane.xlu1 %4013  ;;  %v4369_v61 = vsel %vm3834_vm2, %v9436_v24, 0.0  ;;  %v4207_v25 = vmul.f32 1.442695, %v4085_v40 }
 0x306   : > { %7687 = vpow2.f32 %v4197_v46  ;;  %4370 = vadd.xlane.f32.xlu0 %v4369_v61  ;;  %v4005_v9 = vpop.xlane.xlu0 %4004  ;;  %v4086_v41 = vsub.f32 %v10949_v49, %v4014_v34  ;;  %v10950_v61 = vld [vmem:[#allocation35_spill] sm:$0xff] }
 0x307   : > { %v9443_v2 = vpop.eup %7675  ;;  %v4083_v32 = vsub.f32 %v10947_v43, %v4005_v9 }
 0x308   : > { %10946 = vst [vmem:[#allocation21_spill] sm:$0xff] %v9443_v2  ;;  %v9446_v39 = vpop.eup %7677  ;;  %v4372_v51 = vsel %vm3834_vm2, %v9443_v2, 0.0  ;;  %v4209_v34 = vmul.f32 1.442695, %v4086_v41 }
 0x309   : > { %10948 = vst [vmem:[#allocation27_spill] sm:$0xff] %v9446_v39  ;;  %v4203_v0 = vmul.f32 1.442695, %v4083_v32  ;;  %4373 = vadd.xlane.f32.xlu1 %v4372_v51  ;;  %v4008_v10 = vpop.xlane.xlu1 %4007  ;;  %v4363_v46 = vsel %vm3834_vm2, %v9446_v39, 0.0  ;;  %v10953_v32 = vld [vmem:[#allocation41_spill] sm:$0xff] }
 0x30a   : > { %v4084_v24 = vsub.f32 %v10950_v61, %v4008_v10  ;;  %4364 = vadd.xlane.f32.xlu0 %v4363_v46  ;;  %v4023_v14 = vpop.xlane.xlu0 %4022 }
 0x30b   : > { %v9454_v47 = vpop.eup %7679  ;;  %7689 = vpow2.f32 %v4203_v0  ;;  %v4089_v49 = vsub.f32 %v10953_v32, %v4023_v14  ;;  %v10954_v0 = vld [vmem:[#allocation39_spill] sm:$0xff] }
 0x30c   : > { %10951 = vst [vmem:[#allocation40_spill] sm:$0xff] %v9454_v47  ;;  %v9456_v9 = vpop.eup %7681  ;;  %v4205_v43 = vmul.f32 1.442695, %v4084_v24  ;;  %v4366_v40 = vsel %vm3834_vm2, %v9454_v47, 0.0  ;;  %7691 = vpow2.f32 %v4207_v25  ;;  %v10956_v24 = vld [vmem:[#allocation57_spill] sm:$0xff] }
 0x30d   : > { %10952 = vst [vmem:[#allocation42_spill] sm:$0xff] %v9456_v9  ;;  %4367 = vadd.xlane.f32.xlu1 %v4366_v40  ;;  %v4026_v51 = vpop.xlane.xlu1 %4025  ;;  %v4381_v10 = vsel %vm3834_vm2, %v9456_v9, 0.0  ;;  %v4215_v25 = vmul.f32 1.442695, %v4089_v49 }
 0x30e   : > { %7693 = vpow2.f32 %v4205_v43  ;;  %4382 = vadd.xlane.f32.xlu0 %v4381_v10  ;;  %v4017_v46 = vpop.xlane.xlu0 %4016  ;;  %v4090_v47 = vsub.f32 %v10956_v24, %v4026_v51  ;;  %v10957_v10 = vld [vmem:[#allocation58_spill] sm:$0xff] }
 0x30f   : > { %v9463_v61 = vpop.eup %7683  ;;  %v4087_v39 = vsub.f32 %v10954_v0, %v4017_v46  ;;  %7695 = vpow2.f32 %v4209_v34 }
 0x310   : > { %v9466_v41 = vpop.eup %7685  ;;  %v4384_v14 = vsel %vm3834_vm2, %v9463_v61, 0.0  ;;  %v4217_v46 = vmul.f32 1.442695, %v4090_v47 }
 0x311   : > { %10955 = vst [vmem:[#allocation37_spill] sm:$0xff] %v9466_v41  ;;  %v4211_v40 = vmul.f32 1.442695, %v4087_v39  ;;  %4385 = vadd.xlane.f32.xlu1 %v4384_v14  ;;  %v4020_v32 = vpop.xlane.xlu1 %4019  ;;  %v4375_v43 = vsel %vm3834_vm2, %v9466_v41, 0.0 }
 0x312   : > { %v4088_v9 = vsub.f32 %v10957_v10, %v4020_v32  ;;  %4376 = vadd.xlane.f32.xlu0 %v4375_v43 }
 0x313   : > { %v9474_v2 = vpop.eup %7687  ;;  %7697 = vpow2.f32 %v4211_v40 }
 0x314   : > { %10958 = vst [vmem:[#allocation35_spill] sm:$0xff] %v9474_v2  ;;  %v4213_v34 = vmul.f32 1.442695, %v4088_v9  ;;  %v4378_v51 = vsel %vm3834_vm2, %v9474_v2, 0.0  ;;  %7699 = vpow2.f32 %v4215_v25 }
 0x315   : > { %4379 = vadd.xlane.f32.xlu1 %v4378_v51 }
 0x316   : > { %7701 = vpow2.f32 %v4213_v34 }
 0x317   : > { %7703 = vpow2.f32 %v4217_v46 }
 0x318   : > { %v9478_v39 = vpop.eup %7689 }
 0x319   : > { %10959 = vst [vmem:[#allocation41_spill] sm:$0xff] %v9478_v39  ;;  %v4387_v49 = vsel %vm3834_vm2, %v9478_v39, 0.0  ;;  %v9482_v0 = vpop.eup %7691 }
 0x31a   : > { %10960 = vst [vmem:[#allocation39_spill] sm:$0xff] %v9482_v0  ;;  %4388 = vadd.xlane.f32.xlu0 %v4387_v49  ;;  %v4393_v14 = vsel %vm3834_vm2, %v9482_v0, 0.0 }
 0x31b   : > { %v9484_v24 = vpop.eup %7693 }
 0x31c   : > { %10961 = vst [vmem:[#allocation57_spill] sm:$0xff] %v9484_v24  ;;  %v4390_v47 = vsel %vm3834_vm2, %v9484_v24, 0.0  ;;  %v9488_v9 = vpop.eup %7695 }
 0x31d   : > { %10962 = vst [vmem:[#allocation58_spill] sm:$0xff] %v9488_v9  ;;  %4391 = vadd.xlane.f32.xlu1 %v4390_v47  ;;  %v4396_v40 = vsel %vm3834_vm2, %v9488_v9, 0.0 }
 0x31e   : > { %4394 = vadd.xlane.f32.xlu0 %v4393_v14 }
 0x320   : > { %v9492_v25 = vpop.eup %7697 }
 0x321   : > { %10963 = vst [vmem:[#allocation59_spill] sm:$0xff] %v9492_v25  ;;  %4397 = vadd.xlane.f32.xlu1 %v4396_v40  ;;  %v4399_v32 = vsel %vm3834_vm2, %v9492_v25, 0.0  ;;  %v9498_v43 = vpop.eup %7699 }
 0x322   : > { %10964 = vst [vmem:[#allocation60_spill] sm:$0xff] %v9498_v43  ;;  %4400 = vadd.xlane.f32.xlu0 %v4399_v32  ;;  %v4405_v51 = vsel %vm3834_vm2, %v9498_v43, 0.0 }
 0x323   : > { %v9500_v10 = vpop.eup %7701 }
 0x324   : > { %10965 = vst [vmem:[#allocation61_spill] sm:$0xff] %v9500_v10  ;;  %v4402_v46 = vsel %vm3834_vm2, %v9500_v10, 0.0  ;;  %v9504_v34 = vpop.eup %7703 }
 0x325   : > { %10966 = vst [vmem:[#allocation62_spill] sm:$0xff] %v9504_v34  ;;  %4403 = vadd.xlane.f32.xlu1 %v4402_v46  ;;  %v4408_v49 = vsel %vm3834_vm2, %v9504_v34, 0.0 }
 0x326   : > { %4406 = vadd.xlane.f32.xlu0 %v4405_v51 }
 0x329   : > { %4409 = vadd.xlane.f32.xlu1 %v4408_v49 }
 0x32d   : > { %v4227_v47 = vpop.xlane.xlu0 %4226 }
 0x331   : > { %v4221_v14 = vpop.xlane.xlu0 %4220  ;;  %v4230_v40 = vpop.xlane.xlu1 %4229 }
 0x332   : > { %7705 = vrcp.f32 %v4230_v40 }
 0x333   : > { %7707 = vrcp.f32 %v4221_v14 }
 0x334   : > { %7709 = vrcp.f32 %v4227_v47 }
 0x335   : > { %v4224_v32 = vpop.xlane.xlu1 %4223 }
 0x336   : > { %7711 = vrcp.f32 %v4224_v32 }
 0x337   : > { %v4239_v10 = vpop.xlane.xlu0 %4238 }
 0x339   : > { %v4242_v25 = vpop.xlane.xlu1 %4241 }
 0x33a   : > { %7713 = vrcp.f32 %v4242_v25 }
 0x33b   : > { %v4233_v46 = vpop.xlane.xlu0 %4232 }
 0x33c   : > { %7715 = vrcp.f32 %v4233_v46 }
 0x33d   : > { %7717 = vrcp.f32 %v4239_v10  ;;  %v4236_v43 = vpop.xlane.xlu1 %4235 }
 0x33e   : > { %7719 = vrcp.f32 %v4236_v43 }
 0x33f   : > { %v4251_v51 = vpop.xlane.xlu0 %4250  ;;  %v7706_v9 = vpop.eup %7705 }
 0x340   : > { %v7708_v34 = vpop.eup %7707  ;;  %v4478_v40 = vmul.f32 %v7706_v9, %v9205_v22  ;;  %v10967_v22 = vld [vmem:[#allocation46_spill] sm:$0xff]  ;;  %v10968_v9 = vld [vmem:[#allocation47_spill] sm:$0xff] }
 0x341   : > { %v7710_v49 = vpop.eup %7709  ;;  %v4475_v47 = vmul.f32 %v7708_v34, %v9203_v8 }
 0x342   : > { %v4254_v0 = vpop.xlane.xlu1 %4253  ;;  %v4477_v25 = vmul.f32 %v7710_v49, %v9198_v28 }
 0x343   : > { %v7712_v24 = vpop.eup %7711  ;;  %v4245_v14 = vpop.xlane.xlu0 %4244  ;;  %7721 = vrcp.f32 %v4254_v0  ;;  %v4581_v0 = vpack.c.bf16 %v10968_v9, %v10967_v22 }
 0x344   : > { %v4476_v32 = vmul.f32 %v7712_v24, %v9213_v13  ;;  %7723 = vrcp.f32 %v4245_v14  ;;  %v4540_v46 = vpack.c.bf16 %v4478_v40, %v4477_v25  ;;  %v10969_v13 = vld [vmem:[#allocation38_spill] sm:$0xff]  ;;  %v10970_v25 = vld [vmem:[#allocation44_spill] sm:$0xff] }
 0x345   : > { %7725 = vrcp.f32 %v4251_v51 }
 0x346   : > { %v4248_v10 = vpop.xlane.xlu1 %4247  ;;  %v4539_v43 = vpack.c.bf16 %v4476_v32, %v4475_v47 }
 0x347   : > { %7727 = vrcp.f32 %v4248_v10  ;;  %v4263_v39 = vpop.xlane.xlu0 %4262  ;;  %v7714_v2 = vpop.eup %7713 }
 0x348   : > { %7229 = vmatprep.mubr.msk.bf16.mxu0 %vm3834_vm2, %v4539_v43  ;;  %v4482_v51 = vmul.f32 %v7714_v2, %v9223_v29  ;;  %v10971_v2 = vld [vmem:[#allocation43_spill] sm:$0xff] }
 0x349   : > { %v7716_v41 = vpop.eup %7715  ;;  %7230 = vmatmul.mubr.msk.bf16.vlgmr.msra.gmra.mxu0 %vm3834_vm2, %v4540_v46  ;;  %v10972_v46 = vld [vmem:[#allocation45_spill] sm:$0xff] }
 0x34a   : > { %v7718_v8 = vpop.eup %7717  ;;  %7254 = vmatpush3.bf16.msra.mxu0 %v10969_v13  ;;  %v4266_v28 = vpop.xlane.xlu1 %4265  ;;  %v4479_v49 = vmul.f32 %v7716_v41, %v9229_v56  ;;  %v4579_v56 = vpack.c.bf16 %v10972_v46, %v10971_v2 }
 0x34b   : > { %v7720_v24 = vpop.eup %7719  ;;  %7255 = vmatprep.subr.bf16.mxu0 %v4581_v0  ;;  %v4257_v34 = vpop.xlane.xlu0 %4256  ;;  %7729 = vrcp.f32 %v4266_v28  ;;  %v4481_v14 = vmul.f32 %v7718_v8, %v9219_v6 }
 0x34c   : > { %v4480_v40 = vmul.f32 %v7720_v24, %v9233_v42  ;;  %7731 = vrcp.f32 %v4257_v34  ;;  %v10973_v24 = vld [vmem:[#allocation55_spill] sm:$0xff] }
 0x34d   : > { %7733 = vrcp.f32 %v4263_v39  ;;  %v4542_v43 = vpack.c.bf16 %v4482_v51, %v4481_v14  ;;  %v10974_v14 = vld [vmem:[#allocation54_spill] sm:$0xff] }
 0x34e   : > { %7256 = vmatpush3.bf16.msra.mxu0 %v4581_v0  ;;  %v4260_v47 = vpop.xlane.xlu1 %4259  ;;  %v4541_v32 = vpack.c.bf16 %v4480_v40, %v4479_v49 }
 0x34f   : > { %7735 = vrcp.f32 %v4260_v47  ;;  %7257 = vmatprep.subr.bf16.mxu0 %v10970_v25  ;;  %v4275_v10 = vpop.xlane.xlu0 %4274  ;;  %v10975_v47 = vld [vmem:[#allocation20_spill] sm:$0xff] }
 0x350   : > { %7233 = vmatprep.mubr.msk.bf16.mxu0 %vm3834_vm2, %v4541_v32  ;;  %v7722_v29 = vpop.eup %7721  ;;  %v10976_v32 = vld [vmem:[#allocation32_spill] sm:$0xff] }
 0x351   : > { %7234 = vmatmul.mubr.msk.bf16.gmra.mxu0 %vm3834_vm2, %v4542_v43  ;;  %v7724_v42 = vpop.eup %7723  ;;  %v4486_v9 = vmul.f32 %v7722_v29, %v9244_v20 }
 0x352   : > { %7258 = vmatpush3.bf16.msra.mxu0 %v10970_v25  ;;  %v4278_v6 = vpop.xlane.xlu1 %4277  ;;  %v7726_v41 = vpop.eup %7725  ;;  %v4483_v0 = vmul.f32 %v7724_v42, %v9247_v23  ;;  %v4585_v23 = vpack.c.bf16 %v10975_v47, %v10974_v14 }
 0x353   : > { %7259 = vmatprep.subr.bf16.mxu0 %v4579_v56  ;;  %v4269_v39 = vpop.xlane.xlu0 %4268  ;;  %7737 = vrcp.f32 %v4278_v6  ;;  %v4485_v13 = vmul.f32 %v7726_v41, %v9239_v36  ;;  %v10977_v41 = vld [vmem:[#allocation51_spill] sm:$0xff] }
 0x354   : > { %v7728_v22 = vpop.eup %7727  ;;  %7739 = vrcp.f32 %v4269_v39 }
 0x355   : > { %v4484_v8 = vmul.f32 %v7728_v22, %v9254_v60  ;;  %7741 = vrcp.f32 %v4275_v10  ;;  %v4544_v49 = vpack.c.bf16 %v4486_v9, %v4485_v13  ;;  %v10978_v9 = vld [vmem:[#allocation49_spill] sm:$0xff] }
 0x356   : > { %7260 = vmatpush3.bf16.msra.mxu0 %v4579_v56  ;;  %v4272_v28 = vpop.xlane.xlu1 %4271 }
 0x357   : > { %7743 = vrcp.f32 %v4272_v28  ;;  %7285 = vmatprep.subr.bf16.mxu0 %v10973_v24  ;;  %v4287_v34 = vpop.xlane.xlu0 %4286  ;;  %v4543_v51 = vpack.c.bf16 %v4484_v8, %v4483_v0  ;;  %v10979_v0 = vld [vmem:[#allocation53_spill] sm:$0xff] }
 0x358   : > { %v7730_v40 = vpop.eup %7729 }
 0x359   : > { %7245 = vmatprep.mubr.msk.bf16.mxu1 %vm3834_vm2, %v4543_v51  ;;  %v7732_v20 = vpop.eup %7731  ;;  %v4490_v43 = vmul.f32 %v7730_v40, %v9264_v33 }
 0x35a   : > { %7246 = vmatmul.mubr.msk.bf16.vlgmr.msra.gmra.mxu1 %vm3834_vm2, %v4544_v49  ;;  %v4290_v60 = vpop.xlane.xlu1 %4289  ;;  %v7734_v36 = vpop.eup %7733  ;;  %v4487_v29 = vmul.f32 %v7732_v20, %v9267_v17  ;;  %v4583_v17 = vpack.c.bf16 %v10979_v0, %v10978_v9 }
 0x35b   : > { %7270 = vmatpush3.bf16.msra.mxu1 %v10976_v32  ;;  %v4281_v25 = vpop.xlane.xlu0 %4280  ;;  %7745 = vrcp.f32 %v4290_v60  ;;  %v4489_v56 = vmul.f32 %v7734_v36, %v9257_v62  ;;  %v10981_v36 = vld [vmem:[#allocation17_spill] sm:$0xff]  ;;  %v10982_v32 = vld [vmem:[#allocation18_spill] sm:$0xff] }
 0x35c   : > { %v7736_v10 = vpop.eup %7735  ;;  %7271 = vmatprep.subr.bf16.mxu1 %v4585_v23  ;;  %7747 = vrcp.f32 %v4281_v25 }
 0x35d   : > { %v4488_v2 = vmul.f32 %v7736_v10, %v9274_v7  ;;  %7749 = vrcp.f32 %v4287_v34  ;;  %v4546_v39 = vpack.c.bf16 %v4490_v43, %v4489_v56 }
 0x35e   : > { %v4284_v46 = vpop.xlane.xlu1 %4283 }
 0x35f   : > { %7272 = vmatpush3.bf16.msra.mxu1 %v4585_v23  ;;  %7751 = vrcp.f32 %v4284_v46  ;;  %v4299_v42 = vpop.xlane.xlu0 %4298  ;;  %v4545_v6 = vpack.c.bf16 %v4488_v2, %v4487_v29  ;;  %v10980_v23 = vld [vmem:[#allocation56_spill] sm:$0xff] }
 0x360   : > { %7273 = vmatprep.subr.bf16.mxu1 %v10977_v41  ;;  %v7738_v22 = vpop.eup %7737 }
 0x361   : > { %7249 = vmatprep.mubr.msk.bf16.mxu1 %vm3834_vm2, %v4545_v6  ;;  %v7740_v33 = vpop.eup %7739  ;;  %v4494_v28 = vmul.f32 %v7738_v22, %v9284_v58  ;;  %v10984_v22 = vld [vmem:[#allocation48_spill] sm:$0xff] }
 0x362   : > { %7250 = vmatmul.mubr.msk.bf16.gmra.mxu1 %vm3834_vm2, %v4546_v39  ;;  %v4302_v7 = vpop.xlane.xlu1 %4301  ;;  %v7742_v8 = vpop.eup %7741  ;;  %v4491_v34 = vmul.f32 %v7740_v33, %v9287_v63  ;;  %v4589_v63 = vpack.c.bf16 %v10982_v32, %v10981_v36  ;;  %v10985_v33 = vld [vmem:[#allocation52_spill] sm:$0xff] }
 0x363   : > { %7274 = vmatpush3.bf16.msra.mxu1 %v10977_v41  ;;  %v4293_v62 = vpop.xlane.xlu0 %4292  ;;  %7753 = vrcp.f32 %v4302_v7  ;;  %v4493_v49 = vmul.f32 %v7742_v8, %v9277_v26 }
 0x364   : > { %v7744_v13 = vpop.eup %7743  ;;  %7275 = vmatprep.subr.bf16.mxu1 %v4583_v17  ;;  %7755 = vrcp.f32 %v4293_v62 }
 0x365   : > { %v4492_v51 = vmul.f32 %v7744_v13, %v9294_v35  ;;  %7757 = vrcp.f32 %v4299_v42  ;;  %v4548_v47 = vpack.c.bf16 %v4494_v28, %v4493_v49  ;;  %v10986_v49 = vld [vmem:[#allocation16_spill] sm:$0xff] }
 0x366   : > { %v4296_v40 = vpop.xlane.xlu1 %4295 }
 0x367   : > { %7276 = vmatpush3.bf16.msra.mxu1 %v4583_v17  ;;  %7759 = vrcp.f32 %v4296_v40  ;;  %v4311_v20 = vpop.xlane.xlu0 %4310  ;;  %v4547_v14 = vpack.c.bf16 %v4492_v51, %v4491_v34 }
 0x368   : > { %7301 = vmatprep.subr.bf16.mxu1 %v10980_v23  ;;  %v7746_v60 = vpop.eup %7745 }
 0x369   : > { %7261 = vmatprep.mubr.msk.bf16.mxu0 %vm3834_vm2, %v4547_v14  ;;  %v7748_v58 = vpop.eup %7747  ;;  %v4498_v43 = vmul.f32 %v7746_v60, %v9304_v44  ;;  %v10987_v14 = vld [vmem:[#allocation30_spill] sm:$0xff] }
 0x36a   : > { %7262 = vmatmul.mubr.msk.bf16.vlgmr.msra.gmra.mxu0 %vm3834_vm2, %v4548_v47  ;;  %v4314_v35 = vpop.xlane.xlu1 %4313  ;;  %v7750_v26 = vpop.eup %7749  ;;  %v4495_v29 = vmul.f32 %v7748_v58, %v9307_v54  ;;  %v4587_v54 = vpack.c.bf16 %v10985_v33, %v10984_v22  ;;  %v10991_v22 = vld [vmem:[#allocation19_spill] sm:$0xff] }
 0x36b   : > { %7286 = vmatpush3.bf16.msra.mxu0 %v10973_v24  ;;  %v4305_v25 = vpop.xlane.xlu0 %4304  ;;  %7761 = vrcp.f32 %v4314_v35  ;;  %v4497_v56 = vmul.f32 %v7750_v26, %v9297_v16  ;;  %v10983_v24 = vld [vmem:[#allocation50_spill] sm:$0xff] }
 0x36c   : > { %v7752_v10 = vpop.eup %7751  ;;  %7287 = vmatprep.subr.bf16.mxu0 %v4589_v63  ;;  %7763 = vrcp.f32 %v4305_v25  ;;  %v10988_v35 = vld [vmem:[#allocation14_spill] sm:$0xff] }
 0x36d   : > { %v4496_v2 = vmul.f32 %v7752_v10, %v9314_v48  ;;  %7765 = vrcp.f32 %v4311_v20  ;;  %v4550_v41 = vpack.c.bf16 %v4498_v43, %v4497_v56 }
 0x36e   : > { %v4308_v46 = vpop.xlane.xlu1 %4307 }
 0x36f   : > { %7288 = vmatpush3.bf16.msra.mxu0 %v4589_v63  ;;  %7767 = vrcp.f32 %v4308_v46  ;;  %v4323_v42 = vpop.xlane.xlu0 %4322  ;;  %v4549_v6 = vpack.c.bf16 %v4496_v2, %v4495_v29  ;;  %v10989_v29 = vld [vmem:[#allocation26_spill] sm:$0xff] }
 0x370   : > { %7289 = vmatprep.subr.bf16.mxu0 %v10983_v24  ;;  %v7754_v39 = vpop.eup %7753 }
 0x371   : > { %7265 = vmatprep.mubr.msk.bf16.mxu0 %vm3834_vm2, %v4549_v6  ;;  %v7756_v44 = vpop.eup %7755  ;;  %v4502_v17 = vmul.f32 %v7754_v39, %v9324_v37  ;;  %v10990_v39 = vld [vmem:[#allocation36_spill] sm:$0xff] }
 0x372   : > { %7266 = vmatmul.mubr.msk.bf16.gmra.mxu0 %vm3834_vm2, %v4550_v41  ;;  %v4326_v48 = vpop.xlane.xlu1 %4325  ;;  %v7758_v9 = vpop.eup %7757  ;;  %v4499_v7 = vmul.f32 %v7756_v44, %v9327_v21 }
 0x373   : > { %7290 = vmatpush3.bf16.msra.mxu0 %v10983_v24  ;;  %v4317_v16 = vpop.xlane.xlu0 %4316  ;;  %7769 = vrcp.f32 %v4326_v48  ;;  %v4501_v62 = vmul.f32 %v7758_v9, %v9317_v59 }
 0x374   : > { %v7760_v0 = vpop.eup %7759  ;;  %7291 = vmatprep.subr.bf16.mxu0 %v4587_v54  ;;  %7771 = vrcp.f32 %v4317_v16 }
 0x375   : > { %v4500_v8 = vmul.f32 %v7760_v0, %v9334_v11  ;;  %7773 = vrcp.f32 %v4323_v42  ;;  %v4552_v51 = vpack.c.bf16 %v4502_v17, %v4501_v62 }
 0x376   : > { %v4320_v13 = vpop.xlane.xlu1 %4319 }
 0x377   : > { %7292 = vmatpush3.bf16.msra.mxu0 %v4587_v54  ;;  %7775 = vrcp.f32 %v4320_v13  ;;  %v4335_v28 = vpop.xlane.xlu0 %4334  ;;  %v4551_v34 = vpack.c.bf16 %v4500_v8, %v4499_v7  ;;  %v10993_v13 = vld [vmem:[#allocation15_spill] sm:$0xff] }
 0x378   : > { %7317 = vmatprep.subr.bf16.mxu0 %v10986_v49  ;;  %v7762_v40 = vpop.eup %7761 }
 0x379   : > { %7277 = vmatprep.mubr.msk.bf16.mxu1 %vm3834_vm2, %v4551_v34  ;;  %v7764_v37 = vpop.eup %7763  ;;  %v4506_v47 = vmul.f32 %v7762_v40, %v9344_v3  ;;  %v10994_v40 = vld [vmem:[#allocation23_spill] sm:$0xff] }
 0x37a   : > { %7278 = vmatmul.mubr.msk.bf16.vlgmr.msra.gmra.mxu1 %vm3834_vm2, %v4552_v51  ;;  %v4338_v21 = vpop.xlane.xlu1 %4337  ;;  %v7766_v20 = vpop.eup %7765  ;;  %v4503_v60 = vmul.f32 %v7764_v37, %v9347_v4 }
 0x37b   : > { %7302 = vmatpush3.bf16.msra.mxu1 %v10980_v23  ;;  %v4329_v59 = vpop.xlane.xlu0 %4328  ;;  %7777 = vrcp.f32 %v4338_v21  ;;  %v4505_v32 = vmul.f32 %v7766_v20, %v9337_v45  ;;  %v5251_v20 = vld [vmem:[%s10684_s6] sm:$0x3] }
 0x37c   : > { %v7768_v11 = vpop.eup %7767  ;;  %7303 = vmatprep.subr.bf16.mxu1 %v10987_v14  ;;  %7779 = vrcp.f32 %v4329_v59 }
 0x37d   : > { %v4504_v58 = vmul.f32 %v7768_v11, %v9354_v55  ;;  %7781 = vrcp.f32 %v4335_v28  ;;  %v4554_v26 = vpack.c.bf16 %v4506_v47, %v4505_v32 }
 0x37e   : > { %v4332_v36 = vpop.xlane.xlu1 %4331 }
 0x37f   : > { %7304 = vmatpush3.bf16.msra.mxu1 %v10987_v14  ;;  %7783 = vrcp.f32 %v4332_v36  ;;  %v4347_v23 = vpop.xlane.xlu0 %4346  ;;  %v4553_v63 = vpack.c.bf16 %v4504_v58, %v4503_v60  ;;  %v10995_v60 = vld [vmem:[#allocation22_spill] sm:$0xff]  ;;  %v10996_v58 = vld [vmem:[#allocation29_spill] sm:$0xff] }
 0x380   : > { %7305 = vmatprep.subr.bf16.mxu1 %v10988_v35  ;;  %v7770_v25 = vpop.eup %7769  ;;  %v4601_v36 = vpack.c.bf16 %v10996_v58, %v10995_v60  ;;  %v11010_v58 = vld [vmem:[#allocation39_spill] sm:$0xff] }
 0x381   : > { %7281 = vmatprep.mubr.msk.bf16.mxu1 %vm3834_vm2, %v4553_v63  ;;  %v7772_v3 = vpop.eup %7771  ;;  %v4510_v43 = vmul.f32 %v7770_v25, %v9364_v1  ;;  %v10997_v25 = vld [vmem:[#allocation24_spill] sm:$0xff] }
 0x382   : > { %7282 = vmatmul.mubr.msk.bf16.gmra.mxu1 %vm3834_vm2, %v4554_v26  ;;  %v4350_v4 = vpop.xlane.xlu1 %4349  ;;  %v7774_v55 = vpop.eup %7773  ;;  %v4507_v2 = vmul.f32 %v7772_v3, %v9367_v38  ;;  %v10992_v38 = vld [vmem:[#allocation28_spill] sm:$0xff] }
 0x383   : > { %7306 = vmatpush3.bf16.msra.mxu1 %v10988_v35  ;;  %v4341_v10 = vpop.xlane.xlu0 %4340  ;;  %7785 = vrcp.f32 %v4350_v4  ;;  %v4509_v56 = vmul.f32 %v7774_v55, %v9357_v52  ;;  %v4597_v33 = vpack.c.bf16 %v10992_v38, %v10991_v22  ;;  %v10998_v55 = vld [vmem:[#allocation33_spill] sm:$0xff]  ;;  %v5252_v22 = vld [vmem:[%s10684_s6 + $0x2] sm:$0x3]  ;;  %v11004_v38 = vld [vmem:[#allocation31_spill] sm:$0xff] }
 0x384   : > { %v7776_v45 = vpop.eup %7775  ;;  %7307 = vmatprep.subr.bf16.mxu1 %v10989_v29  ;;  %7787 = vrcp.f32 %v4341_v10 }
 0x385   : > { %v4508_v46 = vmul.f32 %v7776_v45, %v9374_v19  ;;  %7789 = vrcp.f32 %v4347_v23  ;;  %v4556_v41 = vpack.c.bf16 %v4510_v43, %v4509_v56  ;;  %v10999_v43 = vld [vmem:[#allocation34_spill] sm:$0xff] }
 0x386   : > { %v4344_v42 = vpop.xlane.xlu1 %4343 }
 0x387   : > { %7308 = vmatpush3.bf16.msra.mxu1 %v10989_v29  ;;  %7791 = vrcp.f32 %v4344_v42  ;;  %v4359_v6 = vpop.xlane.xlu0 %4358  ;;  %v4555_v24 = vpack.c.bf16 %v4508_v46, %v4507_v2  ;;  %v11000_v42 = vld [vmem:[#allocation21_spill] sm:$0xff] }
 0x388   : > { %7333 = vmatprep.subr.bf16.mxu1 %v10990_v39  ;;  %v7778_v1 = vpop.eup %7777 }
 0x389   : > { %7293 = vmatprep.mubr.msk.bf16.mxu0 %vm3834_vm2, %v4555_v24  ;;  %v7780_v44 = vpop.eup %7779  ;;  %v4514_v9 = vmul.f32 %v7778_v1, %v9384_v53  ;;  %v11001_v24 = vld [vmem:[#allocation25_spill] sm:$0xff]  ;;  %v11003_v1 = vld [vmem:[#allocation40_spill] sm:$0xff] }
 0x38a   : > { %7294 = vmatmul.mubr.msk.bf16.vlgmr.msra.gmra.mxu0 %vm3834_vm2, %v4556_v41  ;;  %v4362_v52 = vpop.xlane.xlu1 %4361  ;;  %v7782_v19 = vpop.eup %7781  ;;  %v4511_v16 = vmul.f32 %v7780_v44, %v9387_v27  ;;  %v11002_v41 = vld [vmem:[#allocation27_spill] sm:$0xff] }
 0x38b   : > { %7318 = vmatpush3.bf16.msra.mxu0 %v10986_v49  ;;  %v4353_v54 = vpop.xlane.xlu0 %4352  ;;  %7793 = vrcp.f32 %v4362_v52  ;;  %v4513_v7 = vmul.f32 %v7782_v19, %v9377_v30 }
 0x38c   : > { %v7784_v48 = vpop.eup %7783  ;;  %7319 = vmatprep.subr.bf16.mxu0 %v4597_v33  ;;  %7795 = vrcp.f32 %v4353_v54 }
 0x38d   : > { %v4512_v0 = vmul.f32 %v7784_v48, %v9394_v18  ;;  %7797 = vrcp.f32 %v4359_v6  ;;  %v4558_v28 = vpack.c.bf16 %v4514_v9, %v4513_v7  ;;  %v5273_v9 = vsel %vm5271_vm3, %v5251_v20, 0 }
 0x38e   : > { %v4356_v17 = vpop.xlane.xlu1 %4355 }
 0x38f   : > { %7320 = vmatpush3.bf16.msra.mxu0 %v4597_v33  ;;  %7799 = vrcp.f32 %v4356_v17  ;;  %v4371_v8 = vpop.xlane.xlu0 %4370  ;;  %v4557_v62 = vpack.c.bf16 %v4512_v0, %v4511_v16 }
 0x390   : > { %7321 = vmatprep.subr.bf16.mxu0 %v10993_v13  ;;  %v7786_v34 = vpop.eup %7785 }
 0x391   : > { %7297 = vmatprep.mubr.msk.bf16.mxu0 %vm3834_vm2, %v4557_v62  ;;  %v7788_v53 = vpop.eup %7787  ;;  %v4518_v30 = vmul.f32 %v7786_v34, %v9404_v12 }
 0x392   : > { %7298 = vmatmul.mubr.msk.bf16.gmra.mxu0 %vm3834_vm2, %v4558_v28  ;;  %v4374_v27 = vpop.xlane.xlu1 %4373  ;;  %v7790_v51 = vpop.eup %7789  ;;  %v4515_v37 = vmul.f32 %v7788_v53, %v9407_v5  ;;  %v11005_v28 = vld [vmem:[#allocation37_spill] sm:$0xff]  ;;  %v11006_v53 = vld [vmem:[#allocation35_spill] sm:$0xff] }
 0x393   : > { %7322 = vmatpush3.bf16.msra.mxu0 %v10993_v13  ;;  %v4365_v18 = vpop.xlane.xlu0 %4364  ;;  %7801 = vrcp.f32 %v4374_v27  ;;  %v4517_v59 = vmul.f32 %v7790_v51, %v9397_v31 }
 0x394   : > { %v7792_v49 = vpop.eup %7791  ;;  %7323 = vmatprep.subr.bf16.mxu0 %v10994_v40  ;;  %7803 = vrcp.f32 %v4365_v18  ;;  %v11007_v18 = vld [vmem:[#allocation42_spill] sm:$0xff] }
 0x395   : > { %v4516_v21 = vmul.f32 %v7792_v49, %v9414_v15  ;;  %7805 = vrcp.f32 %v4371_v8  ;;  %v4560_v47 = vpack.c.bf16 %v4518_v30, %v4517_v59 }
 0x396   : > { %v4368_v11 = vpop.xlane.xlu1 %4367 }
 0x397   : > { %7324 = vmatpush3.bf16.msra.mxu0 %v10994_v40  ;;  %7807 = vrcp.f32 %v4368_v11  ;;  %v4383_v12 = vpop.xlane.xlu0 %4382  ;;  %v4559_v14 = vpack.c.bf16 %v4516_v21, %v4515_v37  ;;  %v9650_v21 = vld [vmem:[%s10684_s6 + $0x4] sm:$0x3]  ;;  %v11008_v11 = vld [vmem:[#allocation41_spill] sm:$0xff] }
 0x398   : > { %7477 = vmatprep.subr.msk.bf16.mxu0 %vm5271_vm3, %v5251_v20  ;;  %v7794_v5 = vpop.eup %7793 }
 0x399   : > { %7309 = vmatprep.mubr.msk.bf16.mxu1 %vm3834_vm2, %v4559_v14  ;;  %v7796_v15 = vpop.eup %7795  ;;  %v4522_v35 = vmul.f32 %v7794_v5, %v9424_v57  ;;  %v11009_v14 = vld [vmem:[#allocation57_spill] sm:$0xff] }
 0x39a   : > { %7310 = vmatmul.mubr.msk.bf16.vlgmr.msra.gmra.mxu1 %vm3834_vm2, %v4560_v47  ;;  %v4386_v31 = vpop.xlane.xlu1 %4385  ;;  %v7798_v32 = vpop.eup %7797  ;;  %v4519_v26 = vmul.f32 %v7796_v15, %v9427_v50 }
 0x39b   : > { %7334 = vmatpush3.bf16.msra.mxu1 %v10990_v39  ;;  %v4377_v23 = vpop.xlane.xlu0 %4376  ;;  %7809 = vrcp.f32 %v4386_v31  ;;  %v4521_v10 = vmul.f32 %v7798_v32, %v10998_v55  ;;  %v11011_v31 = vld [vmem:[#allocation58_spill] sm:$0xff] }
 0x39c   : > { %v7800_v63 = vpop.eup %7799  ;;  %7335 = vmatprep.subr.bf16.mxu1 %v4601_v36  ;;  %7811 = vrcp.f32 %v4377_v23 }
 0x39d   : > { %v4520_v3 = vmul.f32 %v7800_v63, %v10997_v25  ;;  %7813 = vrcp.f32 %v4383_v12  ;;  %v4562_v29 = vpack.c.bf16 %v4522_v35, %v4521_v10  ;;  %v5353_v35 = vsel %vm5271_vm3, %v5252_v22, 0  ;;  %v11012_v25 = vld [vmem:[#allocation59_spill] sm:$0xff] }
 0x39e   : > { %v4380_v4 = vpop.xlane.xlu1 %4379 }
 0x39f   : > { %7336 = vmatpush3.bf16.msra.mxu1 %v4601_v36  ;;  %7815 = vrcp.f32 %v4380_v4  ;;  %v4561_v45 = vpack.c.bf16 %v4520_v3, %v4519_v26  ;;  %v11013_v4 = vld [vmem:[#allocation61_spill] sm:$0xff] }
 0x3a0   : > { %7337 = vmatprep.subr.bf16.mxu1 %v10999_v43  ;;  %v7802_v2 = vpop.eup %7801 }
 0x3a1   : > { %7313 = vmatprep.mubr.msk.bf16.mxu1 %vm3834_vm2, %v4561_v45  ;;  %v7804_v46 = vpop.eup %7803  ;;  %v4526_v6 = vmul.f32 %v7802_v2, %v11000_v42  ;;  %v11014_v2 = vld [vmem:[#allocation60_spill] sm:$0xff]  ;;  %v7895_v42 = vmov 0.0  }
 0x3a2   : > { %7314 = vmatmul.mubr.msk.bf16.gmra.mxu1 %vm3834_vm2, %v4562_v29  ;;  %v7806_v57 = vpop.eup %7805  ;;  %v4523_v39 = vmul.f32 %v7804_v46, %v11002_v41  ;;  %v9668_v29 = vld [vmem:[%s10684_s6 + $0x6] sm:$0x3]  ;;  %341 = vst.msk [vmem:[#allocation2] sm:$0xff] %vm340_vm0, %v7895_v42  ;;  %344 = vst.msk [vmem:[#allocation2 + $0x10] sm:$0xff] %vm340_vm0, %v7895_v42 }
 0x3a3   : > { %7338 = vmatpush3.bf16.msra.mxu1 %v10999_v43  ;;  %v4389_v50 = vpop.xlane.xlu0 %4388  ;;  %v4525_v33 = vmul.f32 %v7806_v57, %v11004_v38  ;;  %v11015_v57 = vld [vmem:[#allocation62_spill] sm:$0xff]  ;;  %343 = vst.msk [vmem:[#allocation2 + $0x8] sm:$0xf] %vm342_vm4, %v7895_v42  ;;  %345 = vst.msk [vmem:[#allocation2 + $0x18] sm:$0xf] %vm342_vm4, %v7895_v42  ;;  %v11023_v38 = vld [vmem:[#allocation13_spill] sm:$0xff] }
 0x3a4   : > { %v7808_v56 = vpop.eup %7807  ;;  %7339 = vmatprep.subr.bf16.mxu1 %v11001_v24  ;;  %7817 = vrcp.f32 %v4389_v50  ;;  %346 = vst.msk [vmem:[#allocation2 + $0x20] sm:$0xff] %vm340_vm0, %v7895_v42  ;;  %348 = vst.msk [vmem:[#allocation2 + $0x30] sm:$0xff] %vm340_vm0, %v7895_v42  ;;  %v11018_v41 = vld [vmem:[#allocation10_spill] sm:$0xff] }
 0x3a5   : > { %v4524_v44 = vmul.f32 %v7808_v56, %v11003_v1  ;;  %v4564_v48 = vpack.c.bf16 %v4526_v6, %v4525_v33  ;;  %347 = vst.msk [vmem:[#allocation2 + $0x28] sm:$0xf] %vm342_vm4, %v7895_v42  ;;  %349 = vst.msk [vmem:[#allocation2 + $0x38] sm:$0xf] %vm342_vm4, %v7895_v42  ;;  %v11016_v6 = vld [vmem:[#allocation6_spill] sm:$0xff]  ;;  %v11020_v1 = vld [vmem:[#allocation8_spill] sm:$0xff]  ;;  %v387_v33 = vlaneseq }
 0x3a6   : > { %v4392_v52 = vpop.xlane.xlu1 %4391  ;;  %350 = vst.msk [vmem:[#allocation2 + $0x40] sm:$0xff] %vm340_vm0, %v7895_v42  ;;  %352 = vst.msk [vmem:[#allocation2 + $0x50] sm:$0xff] %vm340_vm0, %v7895_v42 }
 0x3a7   : > { %7340 = vmatpush3.bf16.msra.mxu1 %v11001_v24  ;;  %7819 = vrcp.f32 %v4392_v52  ;;  %v4395_v19 = vpop.xlane.xlu0 %4394  ;;  %v4563_v54 = vpack.c.bf16 %v4524_v44, %v4523_v39  ;;  %351 = vst.msk [vmem:[#allocation2 + $0x48] sm:$0xf] %vm342_vm4, %v7895_v42  ;;  %353 = vst.msk [vmem:[#allocation2 + $0x58] sm:$0xf] %vm342_vm4, %v7895_v42  ;;  %v11017_v24 = vld [vmem:[#allocation7_spill] sm:$0xff]  ;;  %v11021_v44 = vld [vmem:[#allocation9_spill] sm:$0xff] }
 0x3a8   : > { %7478 = vmatprep.subr.msk.bf16.mxu1 %vm5271_vm3, %v5252_v22  ;;  %v7810_v16 = vpop.eup %7809  ;;  %7821 = vrcp.f32 %v4395_v19  ;;  %354 = vst.msk [vmem:[#allocation2 + $0x60] sm:$0xff] %vm340_vm0, %v7895_v42  ;;  %356 = vst.msk [vmem:[#allocation2 + $0x70] sm:$0xff] %vm340_vm0, %v7895_v42  ;;  %v11019_v39 = vld [vmem:[#allocation11_spill] sm:$0xff]  ;;  %v11022_v22 = vld [vmem:[#allocation12_spill] sm:$0xff]  ;;  %v388_v52 = vshrl.u32 %v387_v33, 7 }
 0x3a9   : > { %7325 = vmatprep.mubr.msk.bf16.mxu0 %vm3834_vm2, %v4563_v54  ;;  %v7812_v0 = vpop.eup %7811  ;;  %v4530_v13 = vmul.f32 %v7810_v16, %v9463_v61  ;;  %355 = vst.msk [vmem:[#allocation2 + $0x68] sm:$0xf] %vm342_vm4, %v7895_v42  ;;  %357 = vst.msk [vmem:[#allocation2 + $0x78] sm:$0xf] %vm342_vm4, %v7895_v42 }
 0x3aa   : > { %7326 = vmatmul.mubr.msk.bf16.vlgmr.msra.gmra.mxu0 %vm3834_vm2, %v4564_v48  ;;  %v4398_v17 = vpop.xlane.xlu1 %4397  ;;  %v7814_v7 = vpop.eup %7813  ;;  %v4527_v34 = vmul.f32 %v7812_v0, %v11005_v28  ;;  %358 = vst.msk [vmem:[#allocation2 + $0x80] sm:$0xff] %vm340_vm0, %v7895_v42  ;;  %360 = vst.msk [vmem:[#allocation2 + $0x90] sm:$0xff] %vm340_vm0, %v7895_v42  ;;  %v9716_v19 = vsub.s32 0, %v388_v52  ;;  %v9718_v54 = vsub.s32 1, %v388_v52  ;;  %v9723_v48 = vld [vmem:[%s10682_s4] sm:$0xff]  ;;  %v9733_v0 = vsub.s32 2, %v388_v52 }
 0x3ab   : > { %7823 = vrcp.f32 %v4398_v17  ;;  %v4401_v8 = vpop.xlane.xlu0 %4400  ;;  %7350 = vmatpush3.bf16.msra.mxu0 %v5273_v9  ;;  %v4529_v49 = vmul.f32 %v7814_v7, %v11007_v18  ;;  %359 = vst.msk [vmem:[#allocation2 + $0x88] sm:$0xf] %vm342_vm4, %v7895_v42  ;;  %361 = vst.msk [vmem:[#allocation2 + $0x98] sm:$0xf] %vm342_vm4, %v7895_v42  ;;  %v379_v17 = vld [vmem:[#allocation2] sm:$0xff]  ;;  %v9743_v18 = vsub.s32 3, %v388_v52 }
 0x3ac   : > { %v7816_v62 = vpop.eup %7815  ;;  %7825 = vrcp.f32 %v4401_v8  ;;  %7479 = vmatprep.subr.msk.bf16.mxu0 %vm5271_vm3, %v9650_v21  ;;  %362 = vst.msk [vmem:[#allocation2 + $0xa0] sm:$0xff] %vm340_vm0, %v7895_v42  ;;  %364 = vst.msk [vmem:[#allocation2 + $0xb0] sm:$0xff] %vm340_vm0, %v7895_v42  ;;  %v9727_v9 = vrot.slane %v9723_v48, %v9716_v19  ;;  %v9731_v16 = vrot.slane %v9723_v48, %v9718_v54  ;;  %v407_v7 = vld [vmem:[#allocation2 + $0x1] sm:$0xff]  ;;  %v380_v8 = vld [vmem:[#allocation2 + $0x10] sm:$0xff] }
 0x3ad   : > { %v4528_v27 = vmul.f32 %v7816_v62, %v11006_v53  ;;  %v4566_v37 = vpack.c.bf16 %v4530_v13, %v4529_v49  ;;  %363 = vst.msk [vmem:[#allocation2 + $0xa8] sm:$0xf] %vm342_vm4, %v7895_v42  ;;  %365 = vst.msk [vmem:[#allocation2 + $0xb8] sm:$0xf] %vm342_vm4, %v7895_v42  ;;  %v408_v62 = vld [vmem:[#allocation2 + $0x11] sm:$0xff] }
 0x3ae   : > { %v4404_v51 = vpop.xlane.xlu1 %4403  ;;  %367 = vst.msk [vmem:[#allocation2 + $0x22] sm:$0xff] %vm340_vm0, %v11016_v6  ;;  %368 = vst.msk [vmem:[#allocation2 + $0x32] sm:$0xff] %vm340_vm0, %v11017_v24  ;;  %v391_v13 = vmul.f32 %v9727_v9, %v379_v17  ;;  %v419_v28 = vmul.f32 %v9731_v16, %v407_v7  ;;  %v392_v53 = vmul.f32 %v9727_v9, %v380_v8  ;;  %v9745_v49 = vld [vmem:[#allocation2 + $0x12] sm:$0xff]  ;;  %v9799_v24 = vsub.s32 7, %v388_v52 }
 0x3af   : > { %7827 = vrcp.f32 %v4404_v51  ;;  %v4407_v30 = vpop.xlane.xlu0 %4406  ;;  %v4565_v40 = vpack.c.bf16 %v4528_v27, %v4527_v34  ;;  %369 = vst.msk [vmem:[#allocation2 + $0x42] sm:$0xff] %vm340_vm0, %v11018_v41  ;;  %370 = vst.msk [vmem:[#allocation2 + $0x52] sm:$0xff] %vm340_vm0, %v11019_v39  ;;  %v9739_v34 = vrot.slane %v9723_v48, %v9733_v0  ;;  %v420_v27 = vmul.f32 %v9731_v16, %v408_v62  ;;  %v435_v51 = vld [vmem:[#allocation2 + $0x2] sm:$0xff] }
 0x3b0   : > { %7829 = vrcp.f32 %v4407_v30  ;;  %371 = vst.msk [vmem:[#allocation2 + $0x62] sm:$0xff] %vm340_vm0, %v11020_v1  ;;  %372 = vst.msk [vmem:[#allocation2 + $0x72] sm:$0xff] %vm340_vm0, %v11021_v44  ;;  %v427_v30 = vadd.f32 %v419_v28, %v391_v13 }
 0x3b1   : > { %7329 = vmatprep.mubr.msk.bf16.mxu0 %vm3834_vm2, %v4565_v40  ;;  %v7818_v61 = vpop.eup %7817  ;;  %373 = vst.msk [vmem:[#allocation2 + $0x82] sm:$0xff] %vm340_vm0, %v11022_v22  ;;  %374 = vst.msk [vmem:[#allocation2 + $0x92] sm:$0xff] %vm340_vm0, %v11023_v38  ;;  %v447_v40 = vmul.f32 %v9739_v34, %v435_v51 }
 0x3b2   : > { %7330 = vmatmul.mubr.msk.bf16.gmra.mxu0 %vm3834_vm2, %v4566_v37  ;;  %v4410_v20 = vpop.xlane.xlu1 %4409  ;;  %v4531_v12 = vmul.f32 %v7818_v61, %v11008_v11  ;;  %11024 = vst [vmem:[#allocation46_spill] sm:$0xff] %v9716_v19  ;;  %11025 = vst [vmem:[#allocation47_spill] sm:$0xff] %v9718_v54  ;;  %v428_v37 = vadd.f32 %v420_v27, %v392_v53  ;;  %v448_v61 = vmul.f32 %v9739_v34, %v9745_v49  ;;  %v463_v11 = vld [vmem:[#allocation2 + $0x3] sm:$0xff] }
 0x3b3   : > { %7831 = vrcp.f32 %v4410_v20  ;;  %11026 = vst [vmem:[#allocation38_spill] sm:$0xff] %v9733_v0  ;;  %11027 = vst [vmem:[#allocation44_spill] sm:$0xff] %v9743_v18  ;;  %v9752_v20 = vrot.slane %v9723_v48, %v9743_v18  ;;  %v9821_v53 = vrot.slane %v9723_v48, %v9799_v24 }
 0x3b4   : > { %v7820_v59 = vpop.eup %7819  ;;  %11032 = vst [vmem:[#allocation20_spill] sm:$0xff] %v9799_v24 }
 0x3b5   : > { %v4532_v47 = vmul.f32 %v7820_v59, %v11009_v14  ;;  %v7822_v5 = vpop.eup %7821  ;;  %v9754_v59 = vsub.s32 4, %v388_v52  ;;  %v455_v14 = vadd.f32 %v447_v40, %v427_v30  ;;  %v9807_v38 = vld [vmem:[#allocation2 + $0x23] sm:$0xff]  ;;  %v9809_v33 = vld [vmem:[#allocation2 + $0x32] sm:$0xff] }
 0x3b6   : > { %v4533_v36 = vmul.f32 %v7822_v5, %v11010_v58  ;;  %v456_v5 = vadd.f32 %v448_v61, %v428_v37  ;;  %v450_v30 = vmul.f32 %v9809_v33, %v9739_v34  ;;  %v477_v40 = vmul.f32 %v9807_v38, %v9752_v20  ;;  %v9827_v61 = vld [vmem:[#allocation2 + $0x24] sm:$0xff] }
 0x3b7   : > { %v4567_v15 = vpack.c.bf16 %v4532_v47, %v4531_v12  ;;  %11028 = vst [vmem:[#allocation43_spill] sm:$0xff] %v9754_v59  ;;  %v9756_v12 = vld [vmem:[#allocation2 + $0x13] sm:$0xff]  ;;  %v9758_v47 = vsub.s32 5, %v388_v52  ;;  %v9765_v58 = vrot.slane %v9723_v48, %v9754_v59 }
 0x3b8   : > { %v7824_v60 = vpop.eup %7823 }
 0x3b9   : > { %v4534_v32 = vmul.f32 %v7824_v60, %v11011_v31  ;;  %7341 = vmatprep.mubr.msk.bf16.mxu1 %vm3834_vm2, %v4567_v15  ;;  %v7826_v23 = vpop.eup %7825  ;;  %11029 = vst [vmem:[#allocation45_spill] sm:$0xff] %v9758_v47  ;;  %v475_v15 = vmul.f32 %v9752_v20, %v463_v11  ;;  %v476_v60 = vmul.f32 %v9752_v20, %v9756_v12  ;;  %v9767_v31 = vld [vmem:[#allocation2 + $0x14] sm:$0xff] }
 0x3ba   : > { %v4535_v3 = vmul.f32 %v7826_v23, %v11012_v25  ;;  %v9771_v23 = vld [vmem:[#allocation2 + $0x21] sm:$0xff]  ;;  %v9829_v11 = vld [vmem:[#allocation2 + $0x33] sm:$0xff] }
 0x3bb   : > { %v4568_v63 = vpack.c.bf16 %v4534_v32, %v4533_v36  ;;  %v491_v36 = vld [vmem:[#allocation2 + $0x4] sm:$0xff]  ;;  %v484_v25 = vadd.f32 %v476_v60, %v456_v5 }
 0x3bc   : > { %v7828_v26 = vpop.eup %7827  ;;  %v9769_v32 = vld [vmem:[#allocation2 + $0x20] sm:$0xff]  ;;  %v5255_v60 = vld [vmem:[%s10684_s6 + $0x8] sm:$0x3] }
 0x3bd   : > { %7342 = vmatmul.mubr.msk.bf16.vlgmr.msra.gmra.mxu1 %vm3834_vm2, %v4568_v63  ;;  %v4536_v55 = vmul.f32 %v7828_v26, %v11013_v4  ;;  %v7830_v10 = vpop.eup %7829  ;;  %v9775_v63 = vrot.slane %v9723_v48, %v9758_v47  ;;  %v483_v26 = vadd.f32 %v475_v15, %v455_v14  ;;  %v504_v4 = vmul.f32 %v9765_v58, %v9767_v31 }
 0x3be   : > { %7360 = vmatpush3.bf16.msra.mxu1 %v5353_v35  ;;  %v4537_v46 = vmul.f32 %v7830_v10, %v11014_v2  ;;  %v9777_v35 = vsub.s32 6, %v388_v52  ;;  %v421_v10 = vmul.f32 %v9771_v23, %v9731_v16  ;;  %v9790_v2 = vld [vmem:[#allocation2 + $0x31] sm:$0xff]  ;;  %v9815_v52 = vld [vmem:[%s10682_s4 + $0x8] sm:$0xff] }
 0x3bf   : > { %v4569_v45 = vpack.c.bf16 %v4536_v55, %v4535_v3  ;;  %7480 = vmatprep.subr.msk.bf16.mxu1 %vm5271_vm3, %v9668_v29  ;;  %v503_v3 = vmul.f32 %v9765_v58, %v491_v36  ;;  %v393_v55 = vmul.f32 %v9769_v32, %v9727_v9  ;;  %v512_v42 = vadd.f32 %v504_v4, %v484_v25 }
 0x3c0   : > { %v7832_v43 = vpop.eup %7831  ;;  %11030 = vst [vmem:[#allocation55_spill] sm:$0xff] %v9777_v35  ;;  %v533_v6 = vmul.f32 %v9775_v63, %v9769_v32  ;;  %v422_v1 = vmul.f32 %v9790_v2, %v9731_v16  ;;  %v9835_v15 = vrot.slane %v9815_v52, %v9716_v19  ;;  %v588_v25 = vmul.f32 %v9821_v53, %v9745_v49 }
 0x3c1   : > { %v4538_v50 = vmul.f32 %v7832_v43, %v11015_v57  ;;  %7345 = vmatprep.mubr.msk.bf16.mxu1 %vm3834_vm2, %v4569_v45  ;;  %v9786_v45 = vld [vmem:[#allocation2 + $0x22] sm:$0xff]  ;;  %v9788_v43 = vld [vmem:[#allocation2 + $0x30] sm:$0xff]  ;;  %v532_v57 = vmul.f32 %v9775_v63, %v380_v8  ;;  %v429_v44 = vadd.f32 %v421_v10, %v393_v55  ;;  %v478_v55 = vmul.f32 %v9829_v11, %v9752_v20 }
 0x3c2   : > { %11031 = vst [vmem:[#allocation54_spill] sm:$0xff] %v9788_v43  ;;  %v394_v39 = vmul.f32 %v9788_v43, %v9727_v9  ;;  %v449_v22 = vmul.f32 %v9786_v45, %v9739_v34  ;;  %v541_v13 = vadd.f32 %v533_v6, %v512_v42  ;;  %v616_v49 = vmul.f32 %v9835_v15, %v9756_v12  ;;  %v9855_v42 = vld [vmem:[#allocation2 + $0x40] sm:$0xff] }
 0x3c3   : > { %v4570_v56 = vpack.c.bf16 %v4538_v50, %v4537_v46  ;;  %v9795_v50 = vrot.slane %v9723_v48, %v9777_v35  ;;  %v5433_v48 = vsel %vm5271_vm3, %v9650_v21, 0  ;;  %11033 = vst [vmem:[#allocation32_spill] sm:$0xff] %v9855_v42 }
 0x3c4   : > { %v430_v51 = vadd.f32 %v422_v1, %v394_v39  ;;  %v617_v39 = vmul.f32 %v9835_v15, %v9807_v38  ;;  %v9861_v1 = vrot.slane %v9815_v52, %v9718_v54  ;;  %v9935_v54 = vld [vmem:[#allocation2 + $0x53] sm:$0xff] }
 0x3c5   : > { %7346 = vmatmul.mubr.msk.bf16.gmra.mxu1 %vm3834_vm2, %v4570_v56  ;;  %v511_v56 = vadd.f32 %v503_v3, %v483_v26  ;;  %v560_v7 = vmul.f32 %v9795_v50, %v408_v62  ;;  %v561_v28 = vmul.f32 %v9795_v50, %v9771_v23  ;;  %v457_v62 = vadd.f32 %v449_v22, %v429_v44  ;;  %v9863_v44 = vld [vmem:[#allocation2 + $0x41] sm:$0xff]  ;;  %v9865_v22 = vld [vmem:[#allocation2 + $0x50] sm:$0xff] }
 0x3c6   : > { %v589_v3 = vmul.f32 %v9821_v53, %v9786_v45  ;;  %v458_v21 = vadd.f32 %v450_v30, %v430_v51  ;;  %11034 = vst [vmem:[#allocation51_spill] sm:$0xff] %v9861_v1  ;;  %v534_v51 = vmul.f32 %v9788_v43, %v9775_v63  ;;  %v395_v30 = vmul.f32 %v9855_v42, %v9727_v9 }
 0x3c7   : > { %v540_v8 = vadd.f32 %v532_v57, %v511_v56  ;;  %v569_v26 = vadd.f32 %v561_v28, %v541_v13  ;;  %v485_v10 = vadd.f32 %v477_v40, %v457_v62  ;;  %v9850_v57 = vld [vmem:[#allocation2 + $0x34] sm:$0xff]  ;;  %v396_v40 = vmul.f32 %v9865_v22, %v9727_v9  ;;  %11041 = vst [vmem:[#allocation48_spill] sm:$0xff] %v9935_v54 }
 0x3c8   : > { %v506_v12 = vmul.f32 %v9850_v57, %v9765_v58 }
 0x3c9   : > { %v568_v36 = vadd.f32 %v560_v7, %v540_v8  ;;  %v486_v8 = vadd.f32 %v478_v55, %v458_v21  ;;  %v5513_v21 = vsel %vm5271_vm3, %v9668_v29, 0  ;;  %v9902_v55 = vld [vmem:[%s10684_s6 + $0xa] sm:$0x3] }
 0x3cb   : > { %v596_v6 = vadd.f32 %v588_v25, %v568_v36  ;;  %v644_v25 = vmul.f32 %v9861_v1, %v9767_v31  ;;  %v9906_v31 = vrot.slane %v9815_v52, %v9743_v18 }
 0x3cd   : > { %v624_v36 = vadd.f32 %v616_v49, %v596_v6  ;;  %v9911_v49 = vsel %vm5271_vm3, %v5255_v60, 0 }
 0x3ce   : > { %11037 = vst [vmem:[#allocation56_spill] sm:$0xff] %v9911_v49  ;;  %v562_v49 = vmul.f32 %v9790_v2, %v9795_v50 }
 0x409   : > { %v7231_v46 = vpop.f32.mrf.mxu0 }
 0x40b   : > { %v4649_v41 = vpop.f32.mrf.mxu0 }
 0x40d   : > { %v7232_v17 = vpop.f32.mrf.mxu0 }
 0x40e   : > { %v5220_v14 = vpack.c.bf16 %v7232_v17, %v7231_v46  ;;  %v505_v46 = vmul.f32 %v9827_v61, %v9765_v58  ;;  %v9867_v17 = vld [vmem:[#allocation2 + $0x51] sm:$0xff] }
 0x40f   : > { %v4652_v27 = vpop.f32.mrf.mxu0 }
 0x410   : > { %v5219_v37 = vpack.c.bf16 %v4652_v27, %v4649_v41  ;;  %v597_v41 = vadd.f32 %v589_v3, %v569_v26  ;;  %v513_v13 = vadd.f32 %v505_v46, %v485_v10  ;;  %v9873_v27 = vrot.slane %v9815_v52, %v9733_v0  ;;  %v9892_v3 = vld [vmem:[#allocation2 + $0x42] sm:$0xff] }
 0x411   : > { %v7235_v5 = vpop.f32.mrf.mxu0  ;;  %v514_v10 = vadd.f32 %v506_v12, %v486_v8  ;;  %v535_v46 = vmul.f32 %v9855_v42, %v9775_v63  ;;  %v9923_v8 = vld [vmem:[#allocation2 + $0x70] sm:$0xff]  ;;  %v451_v18 = vmul.f32 %v9892_v3, %v9739_v34 }
 0x412   : > { %7351 = vmatprep.mubr.msk.bf16.mxu0 %vm3121_vm1, %v5219_v37  ;;  %11035 = vst [vmem:[#allocation49_spill] sm:$0xff] %v9873_v27  ;;  %v423_v37 = vmul.f32 %v9863_v44, %v9731_v16  ;;  %v625_v26 = vadd.f32 %v617_v39, %v597_v41  ;;  %v672_v29 = vmul.f32 %v9873_v27, %v9769_v32  ;;  %v9917_v41 = vld [vmem:[#allocation2 + $0x43] sm:$0xff]  ;;  %11039 = vst [vmem:[#allocation18_spill] sm:$0xff] %v9923_v8  ;;  %v9925_v12 = vld [vmem:[#allocation2 + $0x71] sm:$0xff] }
 0x413   : > { %v4665_v4 = vpop.f32.mrf.mxu0  ;;  %7352 = vmatmul.mubr.msk.bf16.vlgmr.msra.gmra.mxu0 %vm3121_vm1, %v5220_v14  ;;  %v424_v14 = vmul.f32 %v9867_v17, %v9731_v16  ;;  %v673_v6 = vmul.f32 %v9873_v27, %v9788_v43  ;;  %11038 = vst [vmem:[#allocation17_spill] sm:$0xff] %v9917_v41  ;;  %v542_v39 = vadd.f32 %v534_v51, %v513_v13  ;;  %v9933_v13 = vsel %vm5271_vm3, %v9902_v55, 0 }
 0x414   : > { %7370 = vmatpush3.bf16.msra.mxu0 %v5433_v48  ;;  %11040 = vst [vmem:[#allocation50_spill] sm:$0xff] %v9933_v13  ;;  %v652_v51 = vadd.f32 %v644_v25, %v624_v36  ;;  %v480_v43 = vmul.f32 %v9935_v54, %v9752_v20 }
 0x415   : > { %v7236_v56 = vpop.f32.mrf.mxu0  ;;  %7481 = vmatprep.subr.msk.bf16.mxu0 %vm5271_vm3, %v5255_v60  ;;  %v432_v60 = vadd.f32 %v424_v14, %v396_v40  ;;  %v9943_v40 = vrot.slane %v9815_v52, %v9754_v59  ;;  %v479_v14 = vmul.f32 %v9917_v41, %v9752_v20  ;;  %v9955_v59 = vld [vmem:[#allocation2 + $0x62] sm:$0xff] }
 0x416   : > { %v5222_v62 = vpack.c.bf16 %v7236_v56, %v7235_v5  ;;  %v645_v5 = vmul.f32 %v9861_v1, %v9827_v61 }
 0x417   : > { %v4668_v7 = vpop.f32.mrf.mxu0  ;;  %11042 = vst [vmem:[#allocation52_spill] sm:$0xff] %v9943_v40 }
 0x418   : > { %v5221_v28 = vpack.c.bf16 %v4668_v7, %v4665_v4  ;;  %v9894_v4 = vld [vmem:[#allocation2 + $0x52] sm:$0xff]  ;;  %v9919_v7 = vld [vmem:[#allocation2 + $0x60] sm:$0xff]  ;;  %v653_v27 = vadd.f32 %v645_v5, %v625_v26  ;;  %v398_v26 = vmul.f32 %v9923_v8, %v9727_v9  ;;  %v701_v8 = vmul.f32 %v9906_v31, %v9790_v2 }
 0x419   : > { %11036 = vst [vmem:[#allocation53_spill] sm:$0xff] %v9894_v4  ;;  %v452_v32 = vmul.f32 %v9894_v4, %v9739_v34  ;;  %v397_v36 = vmul.f32 %v9919_v7, %v9727_v9  ;;  %v680_v9 = vadd.f32 %v672_v29, %v652_v51  ;;  %v9964_v4 = vld [vmem:[#allocation2 + $0x44] sm:$0xff] }
 0x41a   : > { %v9885_v48 = vpop.f32.mrf.mxu1  ;;  %7355 = vmatprep.mubr.msk.bf16.mxu0 %vm3121_vm1, %v5221_v28  ;;  %v9921_v28 = vld [vmem:[#allocation2 + $0x61] sm:$0xff]  ;;  %11043 = vst [vmem:[#allocation16_spill] sm:$0xff] %v9964_v4 }
 0x41b   : > { %7356 = vmatmul.mubr.msk.bf16.gmra.mxu0 %vm3121_vm1, %v5222_v62  ;;  %v431_v62 = vadd.f32 %v423_v37, %v395_v30  ;;  %v700_v30 = vmul.f32 %v9906_v31, %v9771_v23  ;;  %v543_v37 = vadd.f32 %v535_v46, %v514_v10  ;;  %v425_v25 = vmul.f32 %v9921_v28, %v9731_v16  ;;  %v9957_v10 = vld [vmem:[#allocation2 + $0x72] sm:$0xff] }
 0x41c   : > { %v4726_v56 = vpop.f32.mrf.mxu1  ;;  %v426_v23 = vmul.f32 %v9925_v12, %v9731_v16  ;;  %v460_v13 = vadd.f32 %v452_v32, %v432_v60  ;;  %v9966_v16 = vld [vmem:[#allocation2 + $0x54] sm:$0xff]  ;;  %v453_v32 = vmul.f32 %v9955_v59, %v9739_v34  ;;  %v454_v51 = vmul.f32 %v9957_v10, %v9739_v34 }
 0x41d   : > { %v459_v46 = vadd.f32 %v451_v18, %v431_v62  ;;  %v681_v18 = vadd.f32 %v673_v6, %v653_v27  ;;  %v570_v62 = vadd.f32 %v562_v49, %v542_v39  ;;  %v433_v29 = vadd.f32 %v425_v25, %v397_v36  ;;  %v9980_v27 = vld [vmem:[#allocation2 + $0x63] sm:$0xff]  ;;  %v9982_v6 = vld [vmem:[#allocation2 + $0x73] sm:$0xff] }
 0x41e   : > { %v7248_v0 = vpop.f32.mrf.mxu1  ;;  %v434_v60 = vadd.f32 %v426_v23, %v398_v26  ;;  %11044 = vst [vmem:[#allocation30_spill] sm:$0xff] %v9980_v27  ;;  %v488_v49 = vadd.f32 %v480_v43, %v460_v13  ;;  %v507_v39 = vmul.f32 %v9964_v4, %v9765_v58  ;;  %v708_v26 = vadd.f32 %v700_v30, %v680_v9 }
 0x41f   : > { %v5224_v1 = vpack.c.bf16 %v7248_v0, %v9885_v48  ;;  %v590_v0 = vmul.f32 %v9809_v33, %v9821_v53  ;;  %v729_v34 = vmul.f32 %v9943_v40, %v9809_v33  ;;  %v709_v43 = vadd.f32 %v701_v8, %v681_v18  ;;  %v10006_v8 = vld [vmem:[#allocation2 + $0x74] sm:$0xff] }
 0x420   : > { %v4729_v42 = vpop.f32.mrf.mxu1  ;;  %v591_v13 = vmul.f32 %v9892_v3, %v9821_v53  ;;  %v536_v23 = vmul.f32 %v9865_v22, %v9775_v63  ;;  %v481_v30 = vmul.f32 %v9980_v27, %v9752_v20  ;;  %v482_v9 = vmul.f32 %v9982_v6, %v9752_v20  ;;  %11047 = vst [vmem:[#allocation36_spill] sm:$0xff] %v10006_v8 }
 0x421   : > { %v5223_v5 = vpack.c.bf16 %v4729_v42, %v4726_v56  ;;  %v563_v42 = vmul.f32 %v9863_v44, %v9795_v50  ;;  %v728_v56 = vmul.f32 %v9943_v40, %v9786_v45  ;;  %v487_v45 = vadd.f32 %v479_v14, %v459_v46  ;;  %v10004_v40 = vld [vmem:[#allocation2 + $0x64] sm:$0xff] }
 0x422   : > { %v7251_v19 = vpop.f32.mrf.mxu1  ;;  %v598_v25 = vadd.f32 %v590_v0, %v570_v62  ;;  %v461_v46 = vadd.f32 %v453_v32, %v433_v29  ;;  %11046 = vst [vmem:[#allocation26_spill] sm:$0xff] %v10004_v40  ;;  %v537_v18 = vmul.f32 %v9919_v7, %v9775_v63  ;;  %v10016_v20 = vrot.slane %v9815_v52, %v9777_v35 }
 0x423   : > { %7361 = vmatprep.mubr.msk.bf16.mxu1 %vm3121_vm1, %v5223_v5  ;;  %v571_v14 = vadd.f32 %v563_v42, %v543_v37  ;;  %v515_v37 = vadd.f32 %v507_v39, %v487_v45  ;;  %v737_v32 = vadd.f32 %v729_v34, %v709_v43  ;;  %v618_v45 = vmul.f32 %v9829_v11, %v9835_v15 }
 0x424   : > { %v4742_v48 = vpop.f32.mrf.mxu1  ;;  %7362 = vmatmul.mubr.msk.bf16.vlgmr.msra.gmra.mxu1 %vm3121_vm1, %v5224_v1  ;;  %v508_v1 = vmul.f32 %v9966_v16, %v9765_v58  ;;  %11048 = vst [vmem:[#allocation19_spill] sm:$0xff] %v10016_v20  ;;  %v509_v39 = vmul.f32 %v10004_v40, %v9765_v58  ;;  %v785_v43 = vmul.f32 %v10016_v20, %v9850_v57 }
 0x425   : > { %7380 = vmatpush3.bf16.msra.mxu1 %v5513_v21  ;;  %v9994_v21 = vrot.slane %v9815_v52, %v9758_v47 }
 0x426   : > { %v7252_v36 = vpop.f32.mrf.mxu1  ;;  %7482 = vmatprep.subr.msk.bf16.mxu1 %vm5271_vm3, %v9902_v55  ;;  %v462_v55 = vadd.f32 %v454_v51, %v434_v60  ;;  %v516_v42 = vadd.f32 %v508_v1, %v488_v49  ;;  %v599_v51 = vadd.f32 %v591_v13, %v571_v14  ;;  %v489_v49 = vadd.f32 %v481_v30, %v461_v46 }
 0x427   : > { %11045 = vst [vmem:[#allocation14_spill] sm:$0xff] %v9994_v21  ;;  %v5226_v62 = vpack.c.bf16 %v7252_v36, %v7251_v19  ;;  %v756_v29 = vmul.f32 %v9994_v21, %v9807_v38  ;;  %v757_v60 = vmul.f32 %v9994_v21, %v9829_v11  ;;  %v510_v1 = vmul.f32 %v10006_v8, %v9765_v58  ;;  %v11053_v21 = vld [vmem:[#allocation46_spill] sm:$0xff] }
 0x428   : > { %v4745_v5 = vpop.f32.mrf.mxu1  ;;  %v490_v38 = vadd.f32 %v482_v9, %v462_v55  ;;  %v544_v36 = vadd.f32 %v536_v23, %v515_v37  ;;  %v784_v14 = vmul.f32 %v10016_v20, %v9827_v61  ;;  %v10038_v58 = vrot.slane %v9815_v52, %v9799_v24  ;;  %v10045_v23 = vld [vmem:[%s10682_s4 + $0x10] sm:$0xff]  ;;  %v11050_v61 = vld [vmem:[#allocation53_spill] sm:$0xff]  ;;  %v5257_v52 = vld [vmem:[%s10684_s6 + $0xc] sm:$0x3] }
 0x429   : > { %v5225_v47 = vpack.c.bf16 %v4745_v5, %v4742_v48  ;;  %v736_v48 = vadd.f32 %v728_v56, %v708_v26  ;;  %v545_v5 = vadd.f32 %v537_v18, %v516_v42  ;;  %v565_v56 = vmul.f32 %v9921_v28, %v9795_v50  ;;  %v10030_v26 = vld [vmem:[#allocation2 + $0x80] sm:$0xff] }
 0x42a   : > { %v7263_v0 = vpop.f32.mrf.mxu0  ;;  %11049 = vst [vmem:[#allocation28_spill] sm:$0xff] %v10038_v58  ;;  %v619_v13 = vmul.f32 %v9917_v41, %v9835_v15  ;;  %v765_v55 = vadd.f32 %v757_v60, %v737_v32  ;;  %v626_v30 = vadd.f32 %v618_v45, %v598_v25  ;;  %v592_v9 = vmul.f32 %v11050_v61, %v9821_v53 }
 0x42b   : > { %7365 = vmatprep.mubr.msk.bf16.mxu1 %vm3121_vm1, %v5225_v47  ;;  %v564_v47 = vmul.f32 %v9867_v17, %v9795_v50  ;;  %v764_v46 = vadd.f32 %v756_v29, %v736_v48  ;;  %v517_v42 = vadd.f32 %v509_v39, %v489_v49  ;;  %v518_v18 = vadd.f32 %v510_v1, %v490_v38  ;;  %v10058_v48 = vld [vmem:[#allocation2 + $0x81] sm:$0xff] }
 0x42c   : > { %v4803_v19 = vpop.f32.mrf.mxu0  ;;  %7366 = vmatmul.mubr.msk.bf16.gmra.mxu1 %vm3121_vm1, %v5226_v62  ;;  %v11051_v62 = vld [vmem:[#allocation18_spill] sm:$0xff]  ;;  %v539_v35 = vmul.f32 %v10030_v26, %v9775_v63  ;;  %v573_v60 = vadd.f32 %v565_v56, %v545_v5  ;;  %v593_v25 = vmul.f32 %v9955_v59, %v9821_v53  ;;  %11052 = vst [vmem:[#allocation15_spill] sm:$0xff] %v10058_v48  ;;  %v11055_v39 = vld [vmem:[#allocation51_spill] sm:$0xff]  ;;  %v11058_v5 = vld [vmem:[#allocation32_spill] sm:$0xff] }
 0x42d   : > { %v538_v24 = vmul.f32 %v11051_v62, %v9775_v63  ;;  %v572_v29 = vadd.f32 %v564_v47, %v544_v36  ;;  %v10062_v49 = vrot.slane %v10045_v23, %v11053_v21  ;;  %v627_v38 = vadd.f32 %v619_v13, %v599_v51  ;;  %v11059_v13 = vld [vmem:[#allocation56_spill] sm:$0xff] }
 0x42e   : > { %v7264_v34 = vpop.f32.mrf.mxu0  ;;  %v646_v1 = vmul.f32 %v9850_v57, %v11055_v39  ;;  %v10068_v63 = vsel %vm5271_vm3, %v5257_v52, 0  ;;  %v647_v47 = vmul.f32 %v9964_v4, %v11055_v39  ;;  %v547_v56 = vadd.f32 %v539_v35, %v518_v18  ;;  %v10086_v4 = vld [vmem:[#allocation2 + $0x82] sm:$0xff] }
 0x42f   : > { %v5228_v32 = vpack.c.bf16 %v7264_v34, %v7263_v0  ;;  %11054 = vst [vmem:[#allocation23_spill] sm:$0xff] %v10062_v49  ;;  %11056 = vst [vmem:[#allocation22_spill] sm:$0xff] %v10068_v63  ;;  %v814_v0 = vmul.f32 %v10038_v58, %v11058_v5  ;;  %v546_v51 = vadd.f32 %v538_v24, %v517_v42 }
 0x430   : > { %v4806_v37 = vpop.f32.mrf.mxu0  ;;  %v567_v34 = vmul.f32 %v10058_v48, %v9795_v50  ;;  %v620_v63 = vmul.f32 %v9935_v54, %v9835_v15  ;;  %v792_v35 = vadd.f32 %v784_v14, %v764_v46  ;;  %v793_v42 = vadd.f32 %v785_v43, %v765_v55 }
 0x431   : > { %v5227_v20 = vpack.c.bf16 %v4806_v37, %v4803_v19  ;;  %v11057_v19 = vld [vmem:[#allocation54_spill] sm:$0xff]  ;;  %v600_v37 = vadd.f32 %v592_v9, %v572_v29  ;;  %v654_v18 = vadd.f32 %v646_v1, %v626_v30  ;;  %v842_v9 = vmul.f32 %v10062_v49, %v9863_v44  ;;  %v11060_v29 = vld [vmem:[#allocation47_spill] sm:$0xff] }
 0x432   : > { %v7267_v45 = vpop.f32.mrf.mxu0  ;;  %v813_v36 = vmul.f32 %v10038_v58, %v11057_v19  ;;  %v601_v19 = vadd.f32 %v593_v25, %v573_v60  ;;  %v621_v58 = vmul.f32 %v9980_v27, %v9835_v15  ;;  %v10095_v60 = vrot.slane %v10045_v23, %v11060_v29  ;;  %v10105_v1 = vld [vmem:[#allocation2 + $0x83] sm:$0xff] }
 0x433   : > { %7371 = vmatprep.mubr.msk.bf16.mxu0 %vm3121_vm1, %v5227_v20  ;;  %v566_v20 = vmul.f32 %v9925_v12, %v9795_v50  ;;  %v841_v50 = vmul.f32 %v10062_v49, %v9790_v2  ;;  %v655_v25 = vadd.f32 %v647_v47, %v627_v38  ;;  %v594_v14 = vmul.f32 %v9957_v10, %v9821_v53 }
 0x434   : > { %v4819_v21 = vpop.f32.mrf.mxu0  ;;  %7372 = vmatmul.mubr.msk.bf16.vlgmr.msra.gmra.mxu0 %vm3121_vm1, %v5228_v32  ;;  %v648_v32 = vmul.f32 %v9966_v16, %v11055_v39  ;;  %v595_v2 = vmul.f32 %v10086_v4, %v9821_v53  ;;  %v628_v46 = vadd.f32 %v620_v63, %v600_v37  ;;  %v629_v55 = vadd.f32 %v621_v58, %v601_v19  ;;  %v11063_v63 = vld [vmem:[#allocation38_spill] sm:$0xff] }
 0x435   : > { %7390 = vmatpush3.bf16.msra.mxu0 %v11059_v13  ;;  %v574_v48 = vadd.f32 %v566_v20, %v546_v51  ;;  %v649_v30 = vmul.f32 %v10004_v40, %v11055_v39  ;;  %11061 = vst [vmem:[#allocation29_spill] sm:$0xff] %v10105_v1  ;;  %v821_v29 = vadd.f32 %v813_v36, %v792_v35  ;;  %v11062_v51 = vld [vmem:[#allocation49_spill] sm:$0xff] }
 0x436   : > { %v7268_v24 = vpop.f32.mrf.mxu0  ;;  %7483 = vmatprep.subr.msk.bf16.mxu0 %vm5271_vm3, %v5257_v52  ;;  %v575_v52 = vadd.f32 %v567_v34, %v547_v56  ;;  %v822_v49 = vadd.f32 %v814_v0, %v793_v42  ;;  %v674_v56 = vmul.f32 %v11058_v5, %v11062_v51  ;;  %v869_v53 = vmul.f32 %v10095_v60, %v9809_v33  ;;  %v10129_v42 = vld [vmem:[#allocation2 + $0x84] sm:$0xff] }
 0x437   : > { %v5230_v38 = vpack.c.bf16 %v7268_v24, %v7267_v45  ;;  %v870_v58 = vmul.f32 %v10095_v60, %v9892_v3  ;;  %v675_v45 = vmul.f32 %v9865_v22, %v11062_v51  ;;  %v602_v0 = vadd.f32 %v594_v14, %v574_v48 }
 0x438   : > { %v4822_v13 = vpop.f32.mrf.mxu0  ;;  %v603_v20 = vadd.f32 %v595_v2, %v575_v52  ;;  %v622_v34 = vmul.f32 %v9982_v6, %v9835_v15  ;;  %v623_v33 = vmul.f32 %v10105_v1, %v9835_v15  ;;  %v656_v37 = vadd.f32 %v648_v32, %v628_v46 }
 0x439   : > { %v5229_v43 = vpack.c.bf16 %v4822_v13, %v4819_v21  ;;  %v10116_v21 = vrot.slane %v10045_v23, %v11063_v63  ;;  %v657_v19 = vadd.f32 %v649_v30, %v629_v55  ;;  %v676_v24 = vmul.f32 %v9919_v7, %v11062_v51 }
 0x43a   : > { %v7279_v47 = vpop.f32.mrf.mxu1  ;;  %v677_v35 = vmul.f32 %v11051_v62, %v11062_v51  ;;  %v850_v48 = vadd.f32 %v842_v9, %v822_v49  ;;  %v682_v52 = vadd.f32 %v674_v56, %v654_v18  ;;  %v702_v14 = vmul.f32 %v9863_v44, %v9906_v31 }
 0x43b   : > { %7375 = vmatprep.mubr.msk.bf16.mxu0 %vm3121_vm1, %v5229_v43  ;;  %11064 = vst [vmem:[#allocation24_spill] sm:$0xff] %v10116_v21  ;;  %v849_v43 = vadd.f32 %v841_v50, %v821_v29  ;;  %v10135_v15 = vmul.f32 %v10116_v21, %v9829_v11  ;;  %v683_v32 = vadd.f32 %v675_v45, %v655_v25  ;;  %v10147_v29 = vld [vmem:[#allocation2 + $0x90] sm:$0xff] }
 0x43c   : > { %v4880_v36 = vpop.f32.mrf.mxu1  ;;  %7376 = vmatmul.mubr.msk.bf16.gmra.mxu0 %vm3121_vm1, %v5230_v38  ;;  %v703_v2 = vmul.f32 %v9867_v17, %v9906_v31  ;;  %v704_v46 = vmul.f32 %v9921_v28, %v9906_v31  ;;  %v630_v30 = vadd.f32 %v622_v34, %v602_v0  ;;  %v631_v38 = vadd.f32 %v623_v33, %v603_v20  ;;  %v11065_v45 = vld [vmem:[#allocation44_spill] sm:$0xff] }
 0x43d   : > { %v650_v49 = vmul.f32 %v10006_v8, %v11055_v39  ;;  %v651_v50 = vmul.f32 %v10129_v42, %v11055_v39  ;;  %v684_v9 = vadd.f32 %v676_v24, %v656_v37  ;;  %v685_v11 = vadd.f32 %v677_v35, %v657_v19  ;;  %v11067_v34 = vld [vmem:[#allocation52_spill] sm:$0xff]  ;;  %v10159_v39 = vld [vmem:[%s10684_s6 + $0xe] sm:$0x3] }
 0x43e   : > { %v7280_v13 = vpop.f32.mrf.mxu1  ;;  %v705_v25 = vmul.f32 %v9925_v12, %v9906_v31  ;;  %v10151_v0 = vrot.slane %v10045_v23, %v11065_v45  ;;  %v710_v20 = vadd.f32 %v702_v14, %v682_v52  ;;  %v730_v33 = vmul.f32 %v9892_v3, %v11067_v34  ;;  %11068 = vst [vmem:[#allocation34_spill] sm:$0xff] %v10159_v39 }
 0x43f   : > { %v5232_v56 = vpack.c.bf16 %v7280_v13, %v7279_v47  ;;  %v898_v47 = vmul.f32 %v10116_v21, %v9917_v41  ;;  %v711_v37 = vadd.f32 %v703_v2, %v683_v32  ;;  %v731_v19 = vmul.f32 %v11050_v61, %v11067_v34 }
 0x440   : > { %v4883_v55 = vpop.f32.mrf.mxu1  ;;  %11066 = vst [vmem:[#allocation33_spill] sm:$0xff] %v10151_v0  ;;  %v658_v35 = vadd.f32 %v650_v49, %v630_v30  ;;  %v659_v13 = vadd.f32 %v651_v50, %v631_v38  ;;  %v678_v52 = vmul.f32 %v10030_v26, %v11062_v51  ;;  %v679_v14 = vmul.f32 %v10147_v29, %v11062_v51  ;;  %v11070_v50 = vld [vmem:[#allocation14_spill] sm:$0xff] }
 0x441   : > { %v5231_v18 = vpack.c.bf16 %v4883_v55, %v4880_v36  ;;  %v877_v36 = vadd.f32 %v869_v53, %v849_v43  ;;  %v11069_v55 = vld [vmem:[#allocation50_spill] sm:$0xff]  ;;  %v712_v53 = vadd.f32 %v704_v46, %v684_v9  ;;  %v713_v43 = vadd.f32 %v705_v25, %v685_v11  ;;  %v11071_v9 = vld [vmem:[#allocation16_spill] sm:$0xff] }
 0x442   : > { %v7283_v63 = vpop.f32.mrf.mxu1  ;;  %v732_v32 = vmul.f32 %v9955_v59, %v11067_v34  ;;  %v733_v2 = vmul.f32 %v9957_v10, %v11067_v34  ;;  %v878_v38 = vadd.f32 %v870_v58, %v850_v48  ;;  %v925_v51 = vmul.f32 %v10151_v0, %v9850_v57  ;;  %v11072_v48 = vld [vmem:[#allocation15_spill] sm:$0xff] }
 0x443   : > { %7381 = vmatprep.mubr.msk.bf16.mxu1 %vm3121_vm1, %v5231_v18  ;;  %v10175_v18 = vld [vmem:[#allocation2 + $0x91] sm:$0xff]  ;;  %v738_v49 = vadd.f32 %v730_v33, %v710_v20  ;;  %v758_v46 = vmul.f32 %v9917_v41, %v11070_v50  ;;  %v926_v11 = vmul.f32 %v10151_v0, %v11071_v9  ;;  %v739_v25 = vadd.f32 %v731_v19, %v711_v37 }
 0x444   : > { %v4896_v24 = vpop.f32.mrf.mxu1  ;;  %7382 = vmatmul.mubr.msk.bf16.vlgmr.msra.gmra.mxu1 %vm3121_vm1, %v5232_v56  ;;  %v759_v56 = vmul.f32 %v9935_v54, %v11070_v50  ;;  %v760_v45 = vmul.f32 %v9980_v27, %v11070_v50  ;;  %v687_v58 = vadd.f32 %v679_v14, %v659_v13  ;;  %v706_v57 = vmul.f32 %v11072_v48, %v9906_v31  ;;  %v10195_v19 = vld [vmem:[#allocation2 + $0x92] sm:$0xff]  ;;  %v11073_v27 = vld [vmem:[#allocation43_spill] sm:$0xff] }
 0x445   : > { %7400 = vmatpush3.bf16.msra.mxu1 %v11069_v55  ;;  %v707_v20 = vmul.f32 %v10175_v18, %v9906_v31  ;;  %v740_v41 = vadd.f32 %v732_v32, %v712_v53  ;;  %v741_v21 = vadd.f32 %v733_v2, %v713_v43  ;;  %v761_v37 = vmul.f32 %v9982_v6, %v11070_v50 }
 0x446   : > { %v7284_v30 = vpop.f32.mrf.mxu1  ;;  %7484 = vmatprep.subr.msk.bf16.mxu1 %vm5271_vm3, %v10159_v39  ;;  %v686_v39 = vadd.f32 %v678_v52, %v658_v35  ;;  %v10199_v35 = vrot.slane %v10045_v23, %v11073_v27  ;;  %v766_v13 = vadd.f32 %v758_v46, %v738_v49  ;;  %v11074_v52 = vld [vmem:[#allocation19_spill] sm:$0xff]  ;;  %v905_v31 = vadd.f32 %v10135_v15, %v877_v36 }
 0x447   : > { %v5234_v0 = vpack.c.bf16 %v7284_v30, %v7283_v63  ;;  %v786_v14 = vmul.f32 %v11071_v9, %v11074_v52  ;;  %v767_v53 = vadd.f32 %v759_v56, %v739_v25  ;;  %v787_v43 = vmul.f32 %v9966_v16, %v11074_v52  ;;  %v11075_v25 = vld [vmem:[#allocation45_spill] sm:$0xff]  ;;  %v11076_v56 = vld [vmem:[#allocation28_spill] sm:$0xff] }
 0x448   : > { %v4899_v55 = vpop.f32.mrf.mxu1  ;;  %v714_v63 = vadd.f32 %v706_v57, %v686_v39  ;;  %v715_v2 = vadd.f32 %v707_v20, %v687_v58  ;;  %v734_v27 = vmul.f32 %v10086_v4, %v11067_v34  ;;  %v735_v30 = vmul.f32 %v10195_v19, %v11067_v34 }
 0x449   : > { %v5233_v33 = vpack.c.bf16 %v4899_v55, %v4896_v24  ;;  %v906_v24 = vadd.f32 %v898_v47, %v878_v38  ;;  %v768_v49 = vadd.f32 %v760_v45, %v740_v41  ;;  %v769_v46 = vadd.f32 %v761_v37, %v741_v21  ;;  %v10216_v47 = vld [vmem:[#allocation2 + $0x93] sm:$0xff] }
 0x44a   : > { %v7295_v54 = vpop.f32.mrf.mxu0  ;;  %v788_v15 = vmul.f32 %v10004_v40, %v11074_v52  ;;  %v789_v36 = vmul.f32 %v10006_v8, %v11074_v52  ;;  %v955_v39 = vmul.f32 %v10199_v35, %v9865_v22  ;;  %v10224_v34 = vrot.slane %v10045_v23, %v11075_v25 }
 0x44b   : > { %7385 = vmatprep.mubr.msk.bf16.mxu1 %vm3121_vm1, %v5233_v33  ;;  %v794_v41 = vadd.f32 %v786_v14, %v766_v13  ;;  %v795_v21 = vadd.f32 %v787_v43, %v767_v53  ;;  %v815_v45 = vmul.f32 %v9865_v22, %v11076_v56  ;;  %v816_v55 = vmul.f32 %v11076_v56, %v9919_v7  ;;  %v10238_v43 = vld [vmem:[#allocation2 + $0x94] sm:$0xff] }
 0x44c   : > { %v4957_v32 = vpop.f32.mrf.mxu0  ;;  %7386 = vmatmul.mubr.msk.bf16.gmra.mxu1 %vm3121_vm1, %v5234_v0  ;;  %v954_v0 = vmul.f32 %v10199_v35, %v11058_v5  ;;  %v817_v58 = vmul.f32 %v11051_v62, %v11076_v56  ;;  %v742_v5 = vadd.f32 %v734_v27, %v714_v63  ;;  %v743_v20 = vadd.f32 %v735_v30, %v715_v2  ;;  %v10243_v63 = vld [vmem:[%s10685_s7 + $0x8] sm:$0xff]  }
 0x44d   : > { %v762_v33 = vmul.f32 %v10105_v1, %v11070_v50  ;;  %v763_v37 = vmul.f32 %v10216_v47, %v11070_v50  ;;  %v796_v14 = vadd.f32 %v788_v15, %v768_v49  ;;  %v797_v53 = vadd.f32 %v789_v36, %v769_v46  ;;  %11077 = vst [vmem:[#allocation21_spill] sm:$0xff] %v10243_v63  ;;  %v11078_v49 = vld [vmem:[#allocation23_spill] sm:$0xff] }
 0x44e   : > { %v7296_v38 = vpop.f32.mrf.mxu0  ;;  %v818_v22 = vmul.f32 %v11076_v56, %v10030_v26  ;;  %v933_v2 = vadd.f32 %v925_v51, %v905_v31  ;;  %v934_v27 = vadd.f32 %v926_v11, %v906_v24  ;;  %v982_v50 = vmul.f32 %v10224_v34, %v9863_v44  ;;  %v11079_v11 = vld [vmem:[#allocation22_spill] sm:$0xff] }
 0x44f   : > { %v5236_v25 = vpack.c.bf16 %v7296_v38, %v7295_v54  ;;  %v824_v30 = vadd.f32 %v816_v55, %v795_v21  ;;  %v843_v46 = vmul.f32 %v9867_v17, %v11078_v49  ;;  %v844_v54 = vmul.f32 %v11078_v49, %v9921_v28 }
 0x450   : > { %v4960_v57 = vpop.f32.mrf.mxu0  ;;  %v770_v36 = vadd.f32 %v762_v33, %v742_v5  ;;  %v771_v38 = vadd.f32 %v763_v37, %v743_v20  ;;  %v790_v51 = vmul.f32 %v10129_v42, %v11074_v52  ;;  %v791_v44 = vmul.f32 %v10238_v43, %v11074_v52  ;;  %v11080_v52 = vld [vmem:[#allocation55_spill] sm:$0xff] }
 0x451   : > { %v5235_v13 = vpack.c.bf16 %v4960_v57, %v4957_v32  ;;  %v823_v32 = vadd.f32 %v815_v45, %v794_v41  ;;  %v825_v31 = vadd.f32 %v817_v58, %v796_v14  ;;  %v826_v24 = vadd.f32 %v818_v22, %v797_v53  ;;  %v10262_v45 = vld [vmem:[#allocation2 + $0xa0] sm:$0xff] }
 0x452   : > { %v7299_v9 = vpop.f32.mrf.mxu0  ;;  %v845_v41 = vmul.f32 %v9925_v12, %v11078_v49  ;;  %v846_v21 = vmul.f32 %v11078_v49, %v11072_v48  ;;  %v962_v57 = vadd.f32 %v954_v0, %v933_v2  ;;  %v983_v5 = vmul.f32 %v10224_v34, %v9867_v17 }
 0x453   : > { %7391 = vmatprep.mubr.msk.bf16.mxu0 %vm3121_vm1, %v5235_v13  ;;  %v10269_v20 = vrot.slane %v10045_v23, %v11080_v52  ;;  %v871_v58 = vmul.f32 %v11050_v61, %v10095_v60  ;;  %v851_v33 = vadd.f32 %v843_v46, %v823_v32  ;;  %v852_v37 = vadd.f32 %v844_v54, %v824_v30  ;;  %v10283_v30 = vld [vmem:[#allocation2 + $0xa1] sm:$0xff] }
 0x454   : > { %v4973_v15 = vpop.f32.mrf.mxu0  ;;  %7392 = vmatmul.mubr.msk.bf16.vlgmr.msra.gmra.mxu0 %vm3121_vm1, %v5236_v25  ;;  %v872_v13 = vmul.f32 %v10095_v60, %v9955_v59  ;;  %v873_v14 = vmul.f32 %v9957_v10, %v10095_v60  ;;  %v798_v0 = vadd.f32 %v790_v51, %v770_v36  ;;  %v799_v22 = vadd.f32 %v791_v44, %v771_v38  ;;  %v11082_v51 = vld [vmem:[#allocation24_spill] sm:$0xff] }
 0x455   : > { %7410 = vmatpush3.bf16.msra.mxu0 %v11079_v11  ;;  %v819_v17 = vmul.f32 %v10147_v29, %v11076_v56  ;;  %v820_v25 = vmul.f32 %v11076_v56, %v10262_v45  ;;  %v853_v11 = vadd.f32 %v845_v41, %v825_v31  ;;  %v854_v52 = vadd.f32 %v846_v21, %v826_v24  ;;  %v11083_v44 = vld [vmem:[#allocation48_spill] sm:$0xff]  ;;  %v11084_v24 = vld [vmem:[#allocation30_spill] sm:$0xff] }
 0x456   : > { %v7300_v55 = vpop.f32.mrf.mxu0  ;;  %7429 = vmatprep.subr.bf16.mxu0 %v10243_v63  ;;  %v874_v32 = vmul.f32 %v10095_v60, %v10086_v4  ;;  %11081 = vst [vmem:[#allocation25_spill] sm:$0xff] %v10283_v30  ;;  %v963_v63 = vadd.f32 %v955_v39, %v934_v27  ;;  %v1010_v36 = vmul.f32 %v10269_v20, %v9892_v3 }
 0x457   : > { %v5238_v46 = vpack.c.bf16 %v7300_v55, %v7299_v9  ;;  %v1011_v38 = vmul.f32 %v10269_v20, %v11050_v61  ;;  %v879_v56 = vadd.f32 %v871_v58, %v851_v33  ;;  %v899_v31 = vmul.f32 %v11083_v44, %v11082_v51 }
 0x458   : > { %v4976_v53 = vpop.f32.mrf.mxu0  ;;  %v900_v41 = vmul.f32 %v11082_v51, %v11084_v24  ;;  %v827_v9 = vadd.f32 %v819_v17, %v798_v0  ;;  %v828_v39 = vadd.f32 %v820_v25, %v799_v22  ;;  %v847_v3 = vmul.f32 %v10175_v18, %v11078_v49  ;;  %v11086_v17 = vld [vmem:[#allocation20_spill] sm:$0xff] }
 0x459   : > { %v5237_v2 = vpack.c.bf16 %v4976_v53, %v4973_v15  ;;  %v880_v15 = vadd.f32 %v872_v13, %v852_v37  ;;  %v848_v61 = vmul.f32 %v11078_v49, %v10283_v30  ;;  %v881_v27 = vadd.f32 %v873_v14, %v853_v11  ;;  %v10303_v37 = vld [vmem:[#allocation2 + $0xa2] sm:$0xff]  ;;  %v11087_v49 = vld [vmem:[#allocation33_spill] sm:$0xff] }
 0x45a   : > { %v7311_v54 = vpop.f32.mrf.mxu1  ;;  %v882_v55 = vadd.f32 %v874_v32, %v854_v52  ;;  %v901_v58 = vmul.f32 %v9982_v6, %v11082_v51  ;;  %v902_v33 = vmul.f32 %v11082_v51, %v10105_v1  ;;  %v11085_v53 = vld [vmem:[#allocation34_spill] sm:$0xff]  ;;  %v990_v22 = vadd.f32 %v982_v50, %v962_v57 }
 0x45b   : > { %7395 = vmatprep.mubr.msk.bf16.mxu0 %vm3121_vm1, %v5237_v2  ;;  %v5833_v0 = vsel %vm5271_vm3, %v11085_v53, 0  ;;  %v10309_v25 = vrot.slane %v10045_v23, %v11086_v17  ;;  %v927_v14 = vmul.f32 %v9966_v16, %v11087_v49  ;;  %v907_v2 = vadd.f32 %v899_v31, %v879_v56 }
 0x45c   : > { %v5034_v21 = vpop.f32.mrf.mxu1  ;;  %7396 = vmatmul.mubr.msk.bf16.gmra.mxu0 %vm3121_vm1, %v5238_v46  ;;  %v908_v11 = vadd.f32 %v900_v41, %v880_v15  ;;  %v928_v52 = vmul.f32 %v11087_v49, %v10004_v40  ;;  %v929_v32 = vmul.f32 %v10006_v8, %v11087_v49  ;;  %v855_v30 = vadd.f32 %v847_v3, %v827_v9  ;;  %v10323_v15 = vld [vmem:[#allocation2 + $0xa3] sm:$0xff]  ;;  %v11088_v40 = vld [vmem:[#allocation17_spill] sm:$0xff] }
 0x45d   : > { %v856_v1 = vadd.f32 %v848_v61, %v828_v39  ;;  %v875_v50 = vmul.f32 %v10195_v19, %v10095_v60  ;;  %v876_v23 = vmul.f32 %v10095_v60, %v10303_v37  ;;  %v909_v53 = vadd.f32 %v901_v58, %v881_v27  ;;  %v10333_v60 = vld [vmem:[%s10682_s4 + $0x18] ss:$0 sm:$0xff] }
 0x45e   : > { %v7312_v13 = vpop.f32.mrf.mxu1  ;;  %v910_v17 = vadd.f32 %v902_v33, %v882_v55  ;;  %v930_v56 = vmul.f32 %v11087_v49, %v10129_v42  ;;  %v991_v8 = vadd.f32 %v983_v5, %v963_v63  ;;  %v1038_v9 = vmul.f32 %v10309_v25, %v11088_v40  ;;  %v10348_v33 = vld [vmem:[#allocation2 + $0xa4] sm:$0xff] }
 0x45f   : > { %v5240_v31 = vpack.c.bf16 %v7312_v13, %v7311_v54  ;;  %v1039_v39 = vmul.f32 %v10309_v25, %v11083_v44  ;;  %v936_v3 = vadd.f32 %v928_v52, %v908_v11  ;;  %v956_v54 = vmul.f32 %v10199_v35, %v9919_v7 }
 0x460   : > { %v5037_v46 = vpop.f32.mrf.mxu1  ;;  %v957_v63 = vmul.f32 %v10199_v35, %v11051_v62  ;;  %v883_v40 = vadd.f32 %v875_v50, %v855_v30  ;;  %v884_v44 = vadd.f32 %v876_v23, %v856_v1  ;;  %v903_v61 = vmul.f32 %v10216_v47, %v11082_v51  ;;  %v949_v23 = vld [vmem:[#allocation2 + $0xb0] sm:$0xff] }
 0x461   : > { %v5239_v57 = vpack.c.bf16 %v5037_v46, %v5034_v21  ;;  %v935_v21 = vadd.f32 %v927_v14, %v907_v2  ;;  %v904_v27 = vmul.f32 %v11082_v51, %v10323_v15  ;;  %v937_v55 = vadd.f32 %v929_v32, %v909_v53  ;;  %v11089_v14 = vld [vmem:[#allocation16_spill] sm:$0xff] }
 0x462   : > { %v7315_v41 = vpop.f32.mrf.mxu1  ;;  %v938_v58 = vadd.f32 %v930_v56, %v910_v17  ;;  %v958_v7 = vmul.f32 %v10199_v35, %v10030_v26  ;;  %v959_v62 = vmul.f32 %v10199_v35, %v10147_v29  ;;  %v1018_v30 = vadd.f32 %v1010_v36, %v990_v22 }
 0x463   : > { %7401 = vmatprep.mubr.msk.bf16.mxu1 %vm3121_vm1, %v5239_v57  ;;  %v1019_v1 = vadd.f32 %v1011_v38, %v991_v8  ;;  %v1066_v2 = vmul.f32 %v10333_v60, %v11089_v14  ;;  %v984_v51 = vmul.f32 %v10224_v34, %v9921_v28  ;;  %v965_v11 = vadd.f32 %v957_v63, %v936_v3 }
 0x464   : > { %v5050_v5 = vpop.f32.mrf.mxu1  ;;  %7402 = vmatmul.mubr.msk.bf16.vlgmr.msra.gmra.mxu1 %vm3121_vm1, %v5240_v31  ;;  %v985_v52 = vmul.f32 %v10224_v34, %v9925_v12  ;;  %v986_v26 = vmul.f32 %v10224_v34, %v11072_v48  ;;  %v911_v32 = vadd.f32 %v903_v61, %v883_v40  ;;  %v912_v46 = vadd.f32 %v904_v27, %v884_v44 }
 0x465   : > { %7420 = vmatpush3.bf16.msra.mxu1 %v5833_v0  ;;  %v964_v0 = vadd.f32 %v956_v54, %v935_v21  ;;  %v931_v8 = vmul.f32 %v10238_v43, %v11087_v49  ;;  %v932_v36 = vmul.f32 %v11087_v49, %v10348_v33  ;;  %v966_v22 = vadd.f32 %v958_v7, %v937_v55  ;;  %v11090_v55 = vld [vmem:[#allocation29_spill] sm:$0xff] }
 0x466   : > { %v7316_v13 = vpop.f32.mrf.mxu1  ;;  %v967_v28 = vadd.f32 %v959_v62, %v938_v58  ;;  %v987_v50 = vmul.f32 %v10224_v34, %v10175_v18  ;;  %v1046_v53 = vadd.f32 %v1038_v9, %v1018_v30  ;;  %v1047_v48 = vadd.f32 %v1039_v39, %v1019_v1 }
 0x467   : > { %v5242_v12 = vpack.c.bf16 %v7316_v13, %v7315_v41  ;;  %v1067_v17 = vmul.f32 %v10333_v60, %v9966_v16  ;;  %v992_v56 = vadd.f32 %v984_v51, %v964_v0  ;;  %v993_v31 = vadd.f32 %v985_v52, %v965_v11  ;;  %v11091_v13 = vld [vmem:[#allocation25_spill] sm:$0xff]  ;;  %v7576_v52 = vld [vmem:[%s10685_s7] sm:$0xff]  }
 0x468   : > { %v5053_v29 = vpop.f32.mrf.mxu1  ;;  %v1012_v49 = vmul.f32 %v10269_v20, %v9955_v59  ;;  %v1013_v21 = vmul.f32 %v10269_v20, %v9957_v10  ;;  %v939_v18 = vadd.f32 %v931_v8, %v911_v32  ;;  %v940_v41 = vadd.f32 %v932_v36, %v912_v46  ;;  %v1005_v0 = vld [vmem:[#allocation2 + $0xb2] sm:$0xff]  ;;  %v11092_v46 = vld [vmem:[#allocation26_spill] sm:$0xff] }
 0x469   : > { %v5241_v38 = vpack.c.bf16 %v5053_v29, %v5050_v5  ;;  %v960_v9 = vmul.f32 %v10199_v35, %v10262_v45  ;;  %v961_v16 = vmul.f32 %v10199_v35, %v949_v23  ;;  %v994_v39 = vadd.f32 %v986_v26, %v966_v22  ;;  %v977_v5 = vld [vmem:[#allocation2 + $0xb1] sm:$0xff]  ;;  %v10384_v45 = vld [vmem:[%s10683_s5] ss:$0 sm:$0xff] }
 0x46a   : > { %v7327_v57 = vpop.f32.mrf.mxu0  ;;  %v995_v54 = vadd.f32 %v987_v50, %v967_v28  ;;  %v1014_v63 = vmul.f32 %v10269_v20, %v10086_v4  ;;  %v1015_v59 = vmul.f32 %v10269_v20, %v10195_v19  ;;  %v1074_v40 = vadd.f32 %v1066_v2, %v1046_v53  ;;  %v11093_v36 = vld [vmem:[#allocation36_spill] sm:$0xff] }
 0x46b   : > { %7405 = vmatprep.mubr.msk.bf16.mxu1 %vm3121_vm1, %v5241_v38  ;;  %v1075_v44 = vadd.f32 %v1067_v17, %v1047_v48  ;;  %v1040_v61 = vmul.f32 %v10309_v25, %v11084_v24  ;;  %v1020_v35 = vadd.f32 %v1012_v49, %v992_v56  ;;  %v1021_v27 = vadd.f32 %v1013_v21, %v993_v31  ;;  %v1033_v56 = vld [vmem:[#allocation2 + $0xb3] sm:$0xff] }
 0x46c   : > { %v5111_v3 = vpop.f32.mrf.mxu0  ;;  %7406 = vmatmul.mubr.msk.bf16.gmra.mxu1 %vm3121_vm1, %v5242_v12  ;;  %v1041_v4 = vmul.f32 %v10309_v25, %v9982_v6  ;;  %v1042_v19 = vmul.f32 %v10309_v25, %v11090_v55  ;;  %v968_v7 = vadd.f32 %v960_v9, %v939_v18  ;;  %v969_v62 = vadd.f32 %v961_v16, %v940_v41  ;;  %v11094_v12 = vld [vmem:[#allocation21_spill] sm:$0xff] }
 0x46d   : > { %v988_v30 = vmul.f32 %v10224_v34, %v11091_v13  ;;  %v989_v24 = vmul.f32 %v10224_v34, %v977_v5  ;;  %v1022_v14 = vadd.f32 %v1014_v63, %v994_v39  ;;  %v1023_v2 = vadd.f32 %v1015_v59, %v995_v54  ;;  %v1061_v54 = vld [vmem:[#allocation2 + $0xb4] sm:$0xff] }
 0x46e   : > { %v7328_v10 = vpop.f32.mrf.mxu0  ;;  %v1043_v51 = vmul.f32 %v10309_v25, %v10216_v47  ;;  %v1089_v26 = vadd.f32 %v10384_v45, %v1074_v40  ;;  %v1090_v29 = vadd.f32 %v10384_v45, %v1075_v44  ;;  %v1048_v34 = vadd.f32 %v1040_v61, %v1020_v35 }
 0x46f   : > { %v5244_v11 = vpack.c.bf16 %v7328_v10, %v7327_v57  ;;  %v1049_v32 = vadd.f32 %v1041_v4, %v1021_v27  ;;  %v1068_v8 = vmul.f32 %v10333_v60, %v11092_v46  ;;  %v1069_v47 = vmul.f32 %v10333_v60, %v11093_v36 }
 0x470   : > { %v5114_v58 = vpop.f32.mrf.mxu0  ;;  %v996_v22 = vadd.f32 %v988_v30, %v968_v7  ;;  %v997_v28 = vadd.f32 %v989_v24, %v969_v62  ;;  %v1016_v50 = vmul.f32 %v10269_v20, %v10303_v37  ;;  %v1017_v23 = vmul.f32 %v10269_v20, %v1005_v0 }
 0x471   : > { %v5243_v1 = vpack.c.bf16 %v5114_v58, %v5111_v3  ;;  %v1050_v57 = vadd.f32 %v1042_v19, %v1022_v14  ;;  %v1051_v53 = vadd.f32 %v1043_v51, %v1023_v2  ;;  %v1070_v48 = vmul.f32 %v10333_v60, %v10129_v42 }
 0x472   : > { %v7331_v6 = vpop.f32.mrf.mxu0  ;;  %v1071_v17 = vmul.f32 %v10333_v60, %v10238_v43  ;;  %v1076_v49 = vadd.f32 %v1068_v8, %v1048_v34  ;;  %v1077_v21 = vadd.f32 %v1069_v47, %v1049_v32  ;;  %v1024_v18 = vadd.f32 %v1016_v50, %v996_v22 }
 0x473   : > { %7411 = vmatprep.mubr.msk.bf16.mxu0 %vm3121_vm1, %v5243_v1  ;;  %v1025_v37 = vadd.f32 %v1017_v23, %v997_v28  ;;  %v1044_v20 = vmul.f32 %v10309_v25, %v10323_v15  ;;  %v1045_v41 = vmul.f32 %v10309_v25, %v1033_v56  ;;  %v6020_v16 = vpack.c.bf16 %v1090_v29, %v1089_v26 }
 0x474   : > { %v5127_v38 = vpop.f32.mrf.mxu0  ;;  %7412 = vmatmul.mubr.msk.bf16.vlgmr.msra.gmra.mxu0 %vm3121_vm1, %v5244_v11  ;;  %v1078_v42 = vadd.f32 %v1070_v48, %v1050_v57  ;;  %v1079_v39 = vadd.f32 %v1071_v17, %v1051_v53  ;;  %v1091_v63 = vadd.f32 %v10384_v45, %v1076_v49  ;;  %v1092_v59 = vadd.f32 %v10384_v45, %v1077_v21 }
 0x475   : > { %7430 = vmatpush3.bf16.msra.mxu0 %v11094_v12  ;;  %v1052_v5 = vadd.f32 %v1044_v20, %v1024_v18  ;;  %v1053_v10 = vadd.f32 %v1045_v41, %v1025_v37  ;;  %v1072_v25 = vmul.f32 %v10333_v60, %v10348_v33  ;;  %v1073_v15 = vmul.f32 %v10333_v60, %v1061_v54 }
 0x476   : > { %v7332_v31 = vpop.f32.mrf.mxu0  ;;  %7431 = vmatprep.subr.bf16.mxu0 %v7576_v52  ;;  %v1093_v44 = vadd.f32 %v10384_v45, %v1078_v42  ;;  %v1094_v61 = vadd.f32 %v10384_v45, %v1079_v39  ;;  %v6021_v27 = vpack.c.bf16 %v1092_v59, %v1091_v63 }
 0x477   : > { %v5246_v43 = vpack.c.bf16 %v7332_v31, %v7331_v6  ;;  %v1080_v4 = vadd.f32 %v1072_v25, %v1052_v5  ;;  %v1081_v55 = vadd.f32 %v1073_v15, %v1053_v10 }
 0x478   : > { %v5130_v3 = vpop.f32.mrf.mxu0  ;;  %v6022_v58 = vpack.c.bf16 %v1094_v61, %v1093_v44 }
 0x479   : > { %v5245_v9 = vpack.c.bf16 %v5130_v3, %v5127_v38  ;;  %7432 = vmatpush3.bf16.msra.mxu0 %v7576_v52  ;;  %v1095_v33 = vadd.f32 %v10384_v45, %v1080_v4  ;;  %v1096_v60 = vadd.f32 %v10384_v45, %v1081_v55 }
 0x47b   : > { %7415 = vmatprep.mubr.msk.bf16.mxu0 %vm3121_vm1, %v5245_v9  ;;  %v6023_v1 = vpack.c.bf16 %v1096_v60, %v1095_v33 }
 0x47c   : > { %7416 = vmatmul.mubr.msk.bf16.gmra.mxu0 %vm3121_vm1, %v5246_v43 }
 0x47d   : > { %v7343_v40 = vpop.f32.mrf.mxu1  ;;  %7433 = vmatprep.mubr.msk.bf16.mxu0 %vm340_vm0, %v6020_v16 }
 0x47f   : > { %v5188_v35 = vpop.f32.mrf.mxu1 }
 0x481   : > { %v7344_v19 = vpop.f32.mrf.mxu1 }
 0x482   : > { %v5248_v13 = vpack.c.bf16 %v7344_v19, %v7343_v40 }
 0x483   : > { %v5191_v7 = vpop.f32.mrf.mxu1 }
 0x484   : > { %v5247_v62 = vpack.c.bf16 %v5191_v7, %v5188_v35  ;;  %7434 = vmatmul.mubr.msk.bf16.vlgmr.msra.gmra.mxu0 %vm340_vm0, %v6021_v27 }
 0x485   : > { %v7347_v30 = vpop.f32.mrf.mxu1  ;;  %7437 = vmatprep.mubr.msk.bf16.mxu0 %vm340_vm0, %v6022_v58 }
 0x486   : > { %7421 = vmatprep.mubr.msk.bf16.mxu1 %vm3121_vm1, %v5247_v62 }
 0x487   : > { %v5204_v24 = vpop.f32.mrf.mxu1  ;;  %7422 = vmatmul.mubr.msk.bf16.vlgmr.msra.gmra.mxu1 %vm3121_vm1, %v5248_v13 }
 0x489   : > { %v7348_v14 = vpop.f32.mrf.mxu1 }
 0x48a   : > { %v5250_v0 = vpack.c.bf16 %v7348_v14, %v7347_v30 }
 0x48b   : > { %v5207_v2 = vpop.f32.mrf.mxu1 }
 0x48c   : > { %v5249_v51 = vpack.c.bf16 %v5207_v2, %v5204_v24  ;;  %7438 = vmatmul.mubr.msk.bf16.gmra.mxu0 %vm340_vm0, %v6023_v1 }
 0x48e   : > { %7425 = vmatprep.mubr.msk.bf16.mxu1 %vm3121_vm1, %v5249_v51 }
 0x48f   : > { %7426 = vmatmul.mubr.msk.bf16.gmra.mxu1 %vm3121_vm1, %v5250_v0 }
 0x4d3   : > { %v7353_v45 = vpop.f32.mrf.mxu0 }
 0x4d4   : > { %v5930_v40 = vsel %vm340_vm0, %v7353_v45, 0.0 }
 0x4d5   : > { %v5309_v11 = vpop.f32.mrf.mxu0 }
 0x4d6   : > { %v5900_v61 = vsel %vm340_vm0, %v5309_v11, 0.0 }
 0x4d7   : > { %v7354_v6 = vpop.f32.mrf.mxu0 }
 0x4d8   : > { %v5945_v35 = vsel %vm340_vm0, %v7354_v6, 0.0 }
 0x4d9   : > { %v5312_v52 = vpop.f32.mrf.mxu0 }
 0x4da   : > { %v5915_v27 = vsel %vm340_vm0, %v5312_v52, 0.0 }
 0x4db   : > { %v7357_v26 = vpop.f32.mrf.mxu0 }
 0x4dc   : > { %v5990_v19 = vsel %vm340_vm0, %v7357_v26, 0.0 }
 0x4dd   : > { %v5325_v34 = vpop.f32.mrf.mxu0 }
 0x4de   : > { %v5960_v58 = vsel %vm340_vm0, %v5325_v34, 0.0 }
 0x4df   : > { %v7358_v46 = vpop.f32.mrf.mxu0 }
 0x4e0   : > { %v6005_v60 = vsel %vm340_vm0, %v7358_v46, 0.0 }
 0x4e1   : > { %v5328_v36 = vpop.f32.mrf.mxu0 }
 0x4e2   : > { %v5975_v13 = vsel %vm340_vm0, %v5328_v36, 0.0 }
 0x4e4   : > { %v7363_v29 = vpop.f32.mrf.mxu1 }
 0x4e5   : > { %v5931_v4 = vsel %vm340_vm0, %v7363_v29, 0.0 }
 0x4e6   : > { %v5389_v32 = vpop.f32.mrf.mxu1  ;;  %v5932_v1 = vadd.f32 %v5931_v4, %v5930_v40 }
 0x4e7   : > { %v5901_v7 = vsel %vm340_vm0, %v5389_v32, 0.0 }
 0x4e8   : > { %v7364_v8 = vpop.f32.mrf.mxu1  ;;  %v5902_v45 = vadd.f32 %v5901_v7, %v5900_v61 }
 0x4e9   : > { %v5946_v62 = vsel %vm340_vm0, %v7364_v8, 0.0 }
 0x4ea   : > { %v5392_v38 = vpop.f32.mrf.mxu1  ;;  %v5947_v11 = vadd.f32 %v5946_v62, %v5945_v35 }
 0x4eb   : > { %v5916_v30 = vsel %vm340_vm0, %v5392_v38, 0.0 }
 0x4ec   : > { %v7367_v28 = vpop.f32.mrf.mxu1  ;;  %v5917_v29 = vadd.f32 %v5916_v30, %v5915_v27 }
 0x4ed   : > { %v5991_v24 = vsel %vm340_vm0, %v7367_v28, 0.0 }
 0x4ee   : > { %v5405_v23 = vpop.f32.mrf.mxu1  ;;  %v5992_v34 = vadd.f32 %v5991_v24, %v5990_v19 }
 0x4ef   : > { %v5961_v14 = vsel %vm340_vm0, %v5405_v23, 0.0 }
 0x4f0   : > { %v7368_v57 = vpop.f32.mrf.mxu1  ;;  %v5962_v36 = vadd.f32 %v5961_v14, %v5960_v58 }
 0x4f1   : > { %v6006_v2 = vsel %vm340_vm0, %v7368_v57, 0.0 }
 0x4f2   : > { %v5408_v48 = vpop.f32.mrf.mxu1  ;;  %v6007_v38 = vadd.f32 %v6006_v2, %v6005_v60 }
 0x4f3   : > { %v5976_v51 = vsel %vm340_vm0, %v5408_v48, 0.0 }
 0x4f4   : > { %v7373_v47 = vpop.f32.mrf.mxu0  ;;  %v5977_v28 = vadd.f32 %v5976_v51, %v5975_v13 }
 0x4f5   : > { %v5933_v6 = vsel %vm340_vm0, %v7373_v47, 0.0 }
 0x4f6   : > { %v5469_v22 = vpop.f32.mrf.mxu0  ;;  %v5934_v57 = vadd.f32 %v5933_v6, %v5932_v1 }
 0x4f7   : > { %v5903_v52 = vsel %vm340_vm0, %v5469_v22, 0.0 }
 0x4f8   : > { %v7374_v50 = vpop.f32.mrf.mxu0  ;;  %v5904_v48 = vadd.f32 %v5903_v52, %v5902_v45 }
 0x4f9   : > { %v5948_v32 = vsel %vm340_vm0, %v7374_v50, 0.0 }
 0x4fa   : > { %v5472_v12 = vpop.f32.mrf.mxu0  ;;  %v5949_v61 = vadd.f32 %v5948_v32, %v5947_v11 }
 0x4fb   : > { %v5918_v46 = vsel %vm340_vm0, %v5472_v12, 0.0 }
 0x4fc   : > { %v7377_v53 = vpop.f32.mrf.mxu0  ;;  %v5919_v35 = vadd.f32 %v5918_v46, %v5917_v29 }
 0x4fd   : > { %v5993_v23 = vsel %vm340_vm0, %v7377_v53, 0.0 }
 0x4fe   : > { %v5485_v56 = vpop.f32.mrf.mxu0  ;;  %v5994_v4 = vadd.f32 %v5993_v23, %v5992_v34 }
 0x4ff   : > { %v5963_v47 = vsel %vm340_vm0, %v5485_v56, 0.0 }
 0x500   : > { %v7378_v49 = vpop.f32.mrf.mxu0  ;;  %v5964_v58 = vadd.f32 %v5963_v47, %v5962_v36 }
 0x501   : > { %v6008_v22 = vsel %vm340_vm0, %v7378_v49, 0.0 }
 0x502   : > { %v5488_v3 = vpop.f32.mrf.mxu0  ;;  %v6009_v7 = vadd.f32 %v6008_v22, %v6007_v38 }
 0x503   : > { %v5978_v50 = vsel %vm340_vm0, %v5488_v3, 0.0 }
 0x504   : > { %v10436_v17 = vpop.f32.mrf.mxu1  ;;  %v5979_v62 = vadd.f32 %v5978_v50, %v5977_v28 }
 0x505   : > { %v5935_v12 = vsel %vm340_vm0, %v10436_v17, 0.0 }
 0x506   : > { %v10438_v31 = vpop.f32.mrf.mxu1  ;;  %v5936_v60 = vadd.f32 %v5935_v12, %v5934_v57 }
 0x507   : > { %v5905_v53 = vsel %vm340_vm0, %v10438_v31, 0.0 }
 0x508   : > { %v10440_v21 = vpop.f32.mrf.mxu1 }
 0x509   : > { %v5950_v56 = vsel %vm340_vm0, %v10440_v21, 0.0 }
 0x50a   : > { %v10444_v37 = vpop.f32.mrf.mxu1  ;;  %v5951_v30 = vadd.f32 %v5950_v56, %v5949_v61 }
 0x50b   : > { %v5920_v49 = vsel %vm340_vm0, %v10444_v37, 0.0  ;;  %v5906_v37 = vadd.f32 %v5905_v53, %v5904_v48 }
 0x50c   : > { %v10448_v41 = vpop.f32.mrf.mxu1  ;;  %v5921_v24 = vadd.f32 %v5920_v49, %v5919_v35 }
 0x50d   : > { %v5995_v3 = vsel %vm340_vm0, %v10448_v41, 0.0 }
 0x50e   : > { %v10452_v16 = vpop.f32.mrf.mxu1  ;;  %v5996_v14 = vadd.f32 %v5995_v3, %v5994_v4 }
 0x50f   : > { %v5965_v17 = vsel %vm340_vm0, %v10452_v16, 0.0 }
 0x510   : > { %v10456_v39 = vpop.f32.mrf.mxu1  ;;  %v5966_v2 = vadd.f32 %v5965_v17, %v5964_v58 }
 0x511   : > { %v6010_v31 = vsel %vm340_vm0, %v10456_v39, 0.0 }
 0x512   : > { %v10460_v43 = vpop.f32.mrf.mxu1 }
 0x513   : > { %v5980_v1 = vsel %vm340_vm0, %v10460_v43, 0.0 }
 0x514   : > { %v10442_v18 = vpop.f32.mrf.mxu0  ;;  %v10546_v6 = vadd.f32 %v5980_v1, %v5979_v62 }
 0x515   : > { %v5937_v21 = vsel %vm340_vm0, %v10442_v18, 0.0  ;;  %v6011_v18 = vadd.f32 %v6010_v31, %v6009_v7 }
 0x516   : > { %v10446_v20 = vpop.f32.mrf.mxu0  ;;  %v5938_v45 = vadd.f32 %v5937_v21, %v5936_v60 }
 0x517   : > { %v5907_v16 = vsel %vm340_vm0, %v10446_v20, 0.0 }
 0x518   : > { %v10450_v9 = vpop.f32.mrf.mxu0  ;;  %v5908_v34 = vadd.f32 %v5907_v16, %v5906_v37 }
 0x519   : > { %v5952_v11 = vsel %vm340_vm0, %v10450_v9, 0.0 }
 0x51a   : > { %v10454_v42 = vpop.f32.mrf.mxu0  ;;  %v5953_v36 = vadd.f32 %v5952_v11, %v5951_v30 }
 0x51b   : > { %v5922_v43 = vsel %vm340_vm0, %v10454_v42, 0.0 }
 0x51c   : > { %v10458_v54 = vpop.f32.mrf.mxu0  ;;  %v5923_v38 = vadd.f32 %v5922_v43, %v5921_v24 }
 0x51d   : > { %v5997_v52 = vsel %vm340_vm0, %v10458_v54, 0.0 }
 0x51e   : > { %v10464_v59 = vpop.f32.mrf.mxu0  ;;  %v5998_v28 = vadd.f32 %v5997_v52, %v5996_v14 }
 0x51f   : > { %v5967_v9 = vsel %vm340_vm0, %v10464_v59, 0.0 }
 0x520   : > { %v10468_v10 = vpop.f32.mrf.mxu0  ;;  %v5968_v48 = vadd.f32 %v5967_v9, %v5966_v2 }
 0x521   : > { %v6012_v32 = vsel %vm340_vm0, %v10468_v10, 0.0 }
 0x522   : > { %v10472_v15 = vpop.f32.mrf.mxu0  ;;  %v6013_v47 = vadd.f32 %v6012_v32, %v6011_v18 }
 0x524   : > { %v10462_v63 = vpop.f32.mrf.mxu1 }
 0x525   : > { %v5939_v39 = vsel %vm340_vm0, %v10462_v63, 0.0 }
 0x526   : > { %v10466_v5 = vpop.f32.mrf.mxu1  ;;  %v5940_v42 = vadd.f32 %v5939_v39, %v5938_v45 }
 0x527   : > { %v5909_v20 = vsel %vm340_vm0, %v10466_v5, 0.0 }
 0x528   : > { %v10470_v25 = vpop.f32.mrf.mxu1  ;;  %v5910_v23 = vadd.f32 %v5909_v20, %v5908_v34 }
 0x529   : > { %v5954_v54 = vsel %vm340_vm0, %v10470_v25, 0.0 }
 0x52a   : > { %v10481_v55 = vpop.f32.mrf.mxu1  ;;  %v5955_v35 = vadd.f32 %v5954_v54, %v5953_v36 }
 0x52b   : > { %v5924_v59 = vsel %vm340_vm0, %v10481_v55, 0.0  ;;  %v5982_v55 = vsel %vm340_vm0, %v10472_v15, 0.0 }
 0x52c   : > { %v10500_v26 = vpop.f32.mrf.mxu1  ;;  %v5925_v53 = vadd.f32 %v5924_v59, %v5923_v38  ;;  %v5983_v43 = vadd.f32 %v5982_v55, %v10546_v6 }
 0x52e   : > { %v10514_v27 = vpop.f32.mrf.mxu1 }
 0x52f   : > { %v5969_v58 = vsel %vm340_vm0, %v10514_v27, 0.0 }
 0x530   : > { %v7408_v41 = vpop.f32.mrf.mxu1  ;;  %v5970_v27 = vadd.f32 %v5969_v58, %v5968_v48 }
 0x531   : > { %v6014_v60 = vsel %vm340_vm0, %v7408_v41, 0.0 }
 0x532   : > { %v5728_v46 = vpop.f32.mrf.mxu1  ;;  %v6015_v52 = vadd.f32 %v6014_v60, %v6013_v47 }
 0x533   : > { %v5984_v2 = vsel %vm340_vm0, %v5728_v46, 0.0 }
 0x534   : > { %v10475_v44 = vpop.f32.mrf.mxu0  ;;  %v5985_v46 = vadd.f32 %v5984_v2, %v5983_v43 }
 0x535   : > { %v5941_v63 = vsel %vm340_vm0, %v10475_v44, 0.0 }
 0x536   : > { %v10487_v33 = vpop.f32.mrf.mxu0  ;;  %v5942_v57 = vadd.f32 %v5941_v63, %v5940_v42 }
 0x537   : > { %v5911_v5 = vsel %vm340_vm0, %v10487_v33, 0.0  ;;  %v5999_v33 = vsel %vm340_vm0, %v10500_v26, 0.0 }
 0x538   : > { %v10496_v0 = vpop.f32.mrf.mxu0  ;;  %v5912_v50 = vadd.f32 %v5911_v5, %v5910_v23  ;;  %v6000_v15 = vadd.f32 %v5999_v33, %v5998_v28 }
 0x539   : > { %v5956_v22 = vsel %vm340_vm0, %v10496_v0, 0.0  ;;  %v10579_v0 = vld [vmem:[%s10686_s8] ss:$0 sm:$0xff] }
 0x53a   : > { %v10504_v8 = vpop.f32.mrf.mxu0  ;;  %v5957_v7 = vadd.f32 %v5956_v22, %v5955_v35 }
 0x53b   : > { %v5926_v56 = vsel %vm340_vm0, %v10504_v8, 0.0 }
 0x53c   : > { %v10509_v40 = vpop.f32.mrf.mxu0  ;;  %v5927_v37 = vadd.f32 %v5926_v56, %v5925_v53 }
 0x53d   : > { %v6001_v8 = vsel %vm340_vm0, %v10509_v40, 0.0 }
 0x53e   : > { %v10522_v19 = vpop.f32.mrf.mxu0  ;;  %v6002_v39 = vadd.f32 %v6001_v8, %v6000_v15 }
 0x53f   : > { %v5971_v16 = vsel %vm340_vm0, %v10522_v19, 0.0 }
 0x540   : > { %v10532_v13 = vpop.f32.mrf.mxu0 }
 0x541   : > { %v6016_v19 = vsel %vm340_vm0, %v10532_v13, 0.0 }
 0x542   : > { %v10540_v51 = vpop.f32.mrf.mxu0  ;;  %v6017_v13 = vadd.f32 %v6016_v19, %v6015_v52 }
 0x543   : > { %v5986_v6 = vsel %vm340_vm0, %v10540_v51, 0.0 }
 0x544   : > { %v7435_v29 = vpop.f32.mrf.mxu0  ;;  %v5987_v59 = vadd.f32 %v5986_v6, %v5985_v46 }
 0x546   : > { %v6086_v44 = vpop.f32.mrf.mxu0 }
 0x547   : > { %v7423_v10 = vpop.f32.mrf.mxu1 }
 0x548   : > { %v5943_v25 = vsel %vm340_vm0, %v7423_v10, 0.0  ;;  %v7436_v61 = vpop.f32.mrf.mxu0 }
 0x549   : > { %v5944_v12 = vadd.f32 %v5943_v25, %v5942_v57  ;;  %v5869_v4 = vpop.f32.mrf.mxu1 }
 0x54a   : > { %v5913_v49 = vsel %vm340_vm0, %v5869_v4, 0.0  ;;  %v6089_v26 = vpop.f32.mrf.mxu0 }
 0x54b   : > { %v6119_v3 = vadd.f32 %v7435_v29, %v5944_v12  ;;  %v5914_v17 = vadd.f32 %v5913_v49, %v5912_v50  ;;  %v7424_v62 = vpop.f32.mrf.mxu1  ;;  %v5972_v29 = vadd.f32 %v5971_v16, %v5970_v27 }
 0x54c   : > { %v5958_v31 = vsel %vm340_vm0, %v7424_v62, 0.0  ;;  %v7439_v21 = vpop.f32.mrf.mxu0 }
 0x54d   : > { %v6134_v30 = vadd.f32 %v10579_v0, %v6119_v3  ;;  %v6117_v24 = vadd.f32 %v6086_v44, %v5914_v17  ;;  %v5959_v1 = vadd.f32 %v5958_v31, %v5957_v7  ;;  %v5872_v14 = vpop.f32.mrf.mxu1 }
 0x54e   : > { %v5928_v41 = vsel %vm340_vm0, %v5872_v14, 0.0  ;;  %v6102_v63 = vpop.f32.mrf.mxu0 }
 0x54f   : > { %6142 = vst.msk [vmem:[%s10593_s24 + $0x10] sm:$0xff] %vm340_vm0, %v6134_v30  ;;  %v6132_v40 = vadd.f32 %v10579_v0, %v6117_v24  ;;  %v6120_v18 = vadd.f32 %v7436_v61, %v5959_v1  ;;  %v5929_v45 = vadd.f32 %v5928_v41, %v5927_v37  ;;  %v7427_v11 = vpop.f32.mrf.mxu1 }
 0x550   : > { %v6003_v20 = vsel %vm340_vm0, %v7427_v11, 0.0  ;;  %v7440_v28 = vpop.f32.mrf.mxu0 }
 0x551   : > { %6140 = vst.msk [vmem:[%s10593_s24] sm:$0xff] %vm340_vm0, %v6132_v40  ;;  %v6135_v34 = vadd.f32 %v10579_v0, %v6120_v18  ;;  %v6118_v9 = vadd.f32 %v6089_v26, %v5929_v45  ;;  %v6004_v32 = vadd.f32 %v6003_v20, %v6002_v39  ;;  %v5885_v42 = vpop.f32.mrf.mxu1 }
 0x552   : > { %v5973_v36 = vsel %vm340_vm0, %v5885_v42, 0.0  ;;  %v6105_v35 = vpop.f32.mrf.mxu0 }
 0x553   : > { %6143 = vst.msk [vmem:[%s10593_s24 + $0x18] sm:$0xff] %vm340_vm0, %v6135_v34  ;;  %v6133_v38 = vadd.f32 %v10579_v0, %v6118_v9  ;;  %v6123_v54 = vadd.f32 %v7439_v21, %v6004_v32  ;;  %v5974_v5 = vadd.f32 %v5973_v36, %v5972_v29  ;;  %v7428_v44 = vpop.f32.mrf.mxu1 }
 0x554   : > { %v6018_v23 = vsel %vm340_vm0, %v7428_v44, 0.0 }
 0x555   : > { %6141 = vst.msk [vmem:[%s10593_s24 + $0x8] sm:$0xff] %vm340_vm0, %v6133_v38  ;;  %v6138_v51 = vadd.f32 %v10579_v0, %v6123_v54  ;;  %v6121_v57 = vadd.f32 %v6102_v63, %v5974_v5  ;;  %v6019_v10 = vadd.f32 %v6018_v23, %v6017_v13  ;;  %v5888_v48 = vpop.f32.mrf.mxu1 }
 0x556   : > { %v5988_v47 = vsel %vm340_vm0, %v5888_v48, 0.0 }
 0x557   : > { %6146 = vst.msk [vmem:[%s10593_s24 + $0x30] sm:$0xff] %vm340_vm0, %v6138_v51  ;;  %v6136_v22 = vadd.f32 %v10579_v0, %v6121_v57  ;;  %v6124_v25 = vadd.f32 %v7440_v28, %v6019_v10  ;;  %v5989_v61 = vadd.f32 %v5988_v47, %v5987_v59 }
 0x559   : > { %6144 = vst.msk [vmem:[%s10593_s24 + $0x20] sm:$0xff] %vm340_vm0, %v6136_v22  ;;  %v6139_v33 = vadd.f32 %v10579_v0, %v6124_v25  ;;  %v6122_v50 = vadd.f32 %v6105_v35, %v5989_v61 }
 0x55b   : > { %6147 = vst.msk [vmem:[%s10593_s24 + $0x38] sm:$0xff] %vm340_vm0, %v6139_v33  ;;  %v6137_v12 = vadd.f32 %v10579_v0, %v6122_v50 }
 0x55d   : > { %6145 = vst.msk [vmem:[%s10593_s24 + $0x28] sm:$0xff] %vm340_vm0, %v6137_v12 }
 0x55e   : > { %7846 = shalt.err (!%p7843_p3)
}
 0x55f   : > { %s7847_s17 = scalar_lea.hbm %s10627_s29, 1024  ;;  %s7851_s25 = scalar_lea.hbm %s10687_s9, 2048 }
 0x560   : > { %p7848_p4 = scmp.ne.s32.totalorder %s10627_s29, %s7847_s17  ;;  %p7852_p9 = scmp.lt.s32.totalorder %s10627_s29, %s10687_s9 }
 0x561   : > { %p7853_p10 = scmp.lt.s32.totalorder %s7851_s25, %s7847_s17 }
 0x562   : > { %p7849_p7 = pnand %p7848_p4, %p7987_p5 }
 0x563   : > { %p7854_p11 = por %p7853_p10, %p7852_p9 }
 0x564   : > { %p7850_p8 = pneg %p7849_p7 }
 0x566   : > { %p7855_p12 = pnand %p7854_p11, %p7850_p8 }
 0x568   : > { %7858 = shalt.err (!%p7855_p12)
}
 0x569   : > { %s7897_s14 = smov 128   ;;  %s7898_s16 = smov 8  }
 0x56a   : > { %7485 = dma.vmem_to_hbm [thread:$0]  (%p7987_p5), %s10629_s26, 1024, %s10627_s29, %s10638_s13, %s7897_s14, %s7897_s14, %s7898_s16  }
 0x56b PF: > { %p7491_p13 = scmp.ge.s32.totalorder %s7893_s12, 2  ;;  %s6177_s21 = sand.u32 1, %s7881_s30  }
 0x56c   : > { %s6178_s22 = scalar_lea.sflag [#allocation4], %s6177_s21 }
 0x56d   : > { %p7488_p0 = pnand %p7491_p13, %p7991_p6 }
 0x56f   : > { %p7489_p1 = pneg %p7488_p0 }
 0x571   : > { %7876 = dma.done.wait (%p7489_p1), %s6178_s22, 1024  }
 0x572   : > { %7878 = vsyncadd (%p7489_p1), %s6178_s22, 4294966272  ;;  %p19_p2 = scmp.ge.s32.totalorder %s7974_s15, 4   ;;  %s11095_s30 = smov %s7885_s10 }
 0x573   : > { %s11096_s10 = smov %s7889_s11  ;;  %s11097_s11 = smov %s7985_s18 }
 0x574   : > { %s11098_s12 = smov %s7974_s15  ;;  %21 = sbr.rel (!%p19_p2) target bundleno = 3 (0x3), region = 95 }
 0x579   :  { %6183 = vsyncpa [#allocation4], 1 }
 0x57a   :  { %6185 = vsyncpa [#allocation4 + $0x1], 1 }

</bundles_post_ra>
